<compile_context>
chip_gen: v7x
topology: tpu7x:2x2x1
jax: 0.10.0
libtpu: 0.0.40
codegen_flags: <defaults>
</compile_context>

<pallas_src>
import numpy as np
import jax
import jax.numpy as jnp
from jax import lax
from jax.experimental import pallas as pl
from jax.experimental.pallas import tpu as pltpu


# ----------------------------- fused Pallas kernel ---------------------------

def _make_lenet_kernel(k, c1, c2, hp1, wp1, ho2, wo2, hp2, wp2, wpl, n_s):
    """Fused per-image LeNet forward.  All spatial stages share the same row layout
    with row stride `wpl` (= W // 2, the parity-plane width), so every conv / pool
    stage reduces to static shifted row slices + one MXU matmul / elementwise max."""
    R1 = (hp1 - 1) * wpl + wp1     # rows carrying conv1/pool1 output (valid at pi*wpl+pj)
    R2 = (ho2 - 1) * wpl + wo2     # rows carrying conv2 output       (valid at i2*wpl+j2)
    bf16, f32 = jnp.bfloat16, jnp.float32

    def kernel(pln_ref, w1_ref, b1_ref, w2_ref, b2_ref, wh_ref, bh_ref, o_ref):
        pln = pln_ref[...]                                              # (hpl*wpl, 4) f32

        # ---- conv1: ONE matmul over the n_s^2 * 4 distinct shifted parity-plane
        # columns.  Pool-1 quadrants are lane-packed into the 4*c1 output columns;
        # the (quadrant, tap) -> (shift, plane) duplication lives in w1_ref.
        patches1 = jnp.concatenate(
            [pln[su * wpl + sv: su * wpl + sv + R1, :]
             for su in range(n_s) for sv in range(n_s)], axis=1)        # (R1, 4*n_s^2)
        y1 = jnp.dot(patches1.astype(bf16), w1_ref[...],
                     preferred_element_type=f32)                        # (R1, 4*c1)

        # ---- pool1 == elementwise max over the 4 quadrant lane groups; bias + relu
        # (bias / relu commute with the max since all 4 candidates share them).
        m = jnp.maximum(jnp.maximum(y1[:, 0 * c1:1 * c1], y1[:, 1 * c1:2 * c1]),
                        jnp.maximum(y1[:, 2 * c1:3 * c1], y1[:, 3 * c1:4 * c1]))
        m1 = jnp.maximum(m + b1_ref[...], 0.0)                          # (R1, c1)
        # m1 row pi*wpl+pj is valid only for pj < wp1; junk rows are NEVER read by a
        # valid downstream row (statically asserted in lenet_forward).

        # ---- conv2: im2col via two-level shifted row slices, then ONE matmul.
        w_dj = jnp.concatenate(
            [m1[dj: dj + R2 + (k - 1) * wpl, :] for dj in range(k)], axis=1)
        patches2 = jnp.concatenate(
            [w_dj[di * wpl: di * wpl + R2, :] for di in range(k)], axis=1)  # (R2, k*k*c1)
        acc = jnp.dot(patches2.astype(bf16), w2_ref[...],
                      preferred_element_type=f32)                       # (R2, c2)

        # ---- pool2 via shifted elementwise maxima; bias + relu.
        pw = jnp.maximum(acc[0:R2 - 1, :], acc[1:R2, :])                # (j2, j2+1)
        p2 = jnp.maximum(pw[0:R2 - 1 - wpl, :], pw[wpl:R2 - 1, :])      # (i2, i2+1)
        p2 = jnp.maximum(p2 + b2_ref[...], 0.0)
        # valid pooled value for (pa, pb) sits at row 2*pa*wpl + 2*pb; others unread.

        # ---- classifier head: gather the hp2*wp2 valid rows into one lane-dense
        # (1, hp2*wp2*c2) slab and do ONE matmul (fc1+fc2 and the NCHW flatten order
        # are folded into wh_ref / bh_ref on the host).
        act = jnp.concatenate(
            [p2[2 * pa * wpl + 2 * pb: 2 * pa * wpl + 2 * pb + 1, :]
             for pa in range(hp2) for pb in range(wp2)], axis=1)        # (1, hp2*wp2*c2)
        out = jnp.dot(act.astype(bf16), wh_ref[...],
                      preferred_element_type=f32) + bh_ref[...]
        o_ref[...] = out.astype(o_ref.dtype)

    return kernel


# --------------------------------- wrapper ------------------------------------

def lenet_forward(x, params):
    """x: (N, 1, H, W) float32 (NCHW, as in the PyTorch module)."""
    w1, b1, w2, b2, wf1, bf1, wf2, bf2 = params
    n, cin, H, W = x.shape
    assert cin == 1
    c1, _, k, _ = w1.shape
    c2 = w2.shape[0]
    hidden, in_dim = wf1.shape
    odim = wf2.shape[0]

    assert H % 2 == 0 and W % 2 == 0
    ho1, wo1 = H - k + 1, W - k + 1
    assert ho1 % 2 == 0 and wo1 % 2 == 0
    hp1, wp1 = ho1 // 2, wo1 // 2
    ho2, wo2 = hp1 - k + 1, wp1 - k + 1
    assert ho2 % 2 == 0 and wo2 % 2 == 0
    hp2, wp2 = ho2 // 2, wo2 // 2
    assert in_dim == c2 * hp2 * wp2

    hpl, wpl = H // 2, W // 2
    n_s = k // 2 + 1
    R1 = (hp1 - 1) * wpl + wp1
    R2 = (ho2 - 1) * wpl + wo2

    # Static layout invariants: shifted slices issued for VALID output rows never
    # wrap to the next spatial row and never read junk (pj >= wp1) positions.
    assert (wp1 - 1) + (n_s - 1) < wpl and (hp1 - 1) + (n_s - 1) < hpl     # conv1 reads
    assert (wo2 - 1) + (k - 1) <= wp1 - 1 and (ho2 - 1) + (k - 1) <= hp1 - 1  # conv2 reads
    assert 2 * (hp2 - 1) * wpl + 2 * (wp2 - 1) <= R2 - 2 - wpl             # head gather

    # ---- activation-path prep (cheap): space-to-depth parity planes, flattened.
    #      planes[n, u*wpl + v, a*2 + b] = x[n, 0, 2u+a, 2v+b]
    planes = (x.reshape(n, hpl, 2, wpl, 2)
                .transpose(0, 1, 3, 2, 4)
                .reshape(n, hpl * wpl, 4))

    # ---- weight prep (off the activation path) ----
    # conv1: map (pool-quadrant, tap) -> (shift, parity-plane) so the kernel only has
    # to build the 4*n_s^2 distinct shifted plane columns; duplication lives here.
    kk = k * k
    A = np.zeros((n_s * n_s * 4, 4, kk), np.float32)   # (k-col, pool-quadrant, tap)
    for su in range(n_s):
        for sv in range(n_s):
            for al in (0, 1):
                for be in (0, 1):
                    kcol = (su * n_s + sv) * 4 + al * 2 + be
                    for aq in (0, 1):
                        for bq in (0, 1):
                            di = 2 * su + al - aq
                            dj = 2 * sv + be - bq
                            if 0 <= di < k and 0 <= dj < k:
                                A[kcol, aq * 2 + bq, di * k + dj] = 1.0
    w1_flat = w1.reshape(c1, kk)
    w1p = jnp.einsum('kqt,ct->kqc', jnp.asarray(A), w1_flat)
    w1p = w1p.reshape(n_s * n_s * 4, 4 * c1).astype(jnp.bfloat16)
    b1r = b1.reshape(1, c1).astype(jnp.float32)

    w2m = jnp.transpose(w2, (2, 3, 1, 0)).reshape(kk * c1, c2).astype(jnp.bfloat16)
    b2r = b2.reshape(1, c2).astype(jnp.float32)

    # fc head: fold the PyTorch NCHW flatten order (f = c*hp2*wp2 + s) into fc1, then
    # fold fc1 @ fc2 (the module applies no activation between fc1 and fc2).
    wf1p = jnp.transpose(wf1.reshape(hidden, c2, hp2 * wp2), (2, 1, 0))
    wf1p = wf1p.reshape(hp2 * wp2 * c2, hidden)
    w_head = jnp.dot(wf1p, wf2.T).astype(jnp.bfloat16)                  # (hp2*wp2*c2, odim)
    b_head = (jnp.dot(bf1.reshape(1, hidden), wf2.T)
              + bf2.reshape(1, odim)).astype(jnp.float32)

    flops = 2 * n * (R1 * (n_s * n_s * 4) * (4 * c1)
                     + R2 * (kk * c1) * c2
                     + (hp2 * wp2 * c2) * odim)
    bytes_accessed = (4 * planes.size + 2 * (w1p.size + w2m.size + w_head.size)
                      + 4 * (b1r.size + b2r.size + b_head.size) + 4 * n * odim)

    kernel = _make_lenet_kernel(k, c1, c2, hp1, wp1, ho2, wo2, hp2, wp2, wpl, n_s)

    out = pl.pallas_call(
        kernel,
        out_shape=jax.ShapeDtypeStruct((n, 1, odim), jnp.float32),
        grid=(n,),
        in_specs=[
            pl.BlockSpec((None, hpl * wpl, 4), lambda i: (i, 0, 0)),    # per-image planes
            pl.BlockSpec(w1p.shape, lambda i: (0, 0)),
            pl.BlockSpec(b1r.shape, lambda i: (0, 0)),
            pl.BlockSpec(w2m.shape, lambda i: (0, 0)),
            pl.BlockSpec(b2r.shape, lambda i: (0, 0)),
            pl.BlockSpec(w_head.shape, lambda i: (0, 0)),
            pl.BlockSpec(b_head.shape, lambda i: (0, 0)),
        ],
        out_specs=pl.BlockSpec((None, 1, odim), lambda i: (i, 0, 0)),
        compiler_params=pltpu.CompilerParams(dimension_semantics=("parallel",)),
        cost_estimate=pl.CostEstimate(flops=flops, transcendentals=0,
                                      bytes_accessed=bytes_accessed),
    )(planes, w1p, b1r, w2m, b2r, w_head, b_head)
    return out.reshape(n, odim)


# ----------------------------- pure-JAX reference ----------------------------

def lenet_reference(x, params):
    w1, b1, w2, b2, wf1, bf1, wf2, bf2 = params
    dn = ('NCHW', 'OIHW', 'NCHW')
    hi = lax.Precision.HIGHEST
    y = lax.conv_general_dilated(x, w1, (1, 1), 'VALID', dimension_numbers=dn,
                                 precision=hi) + b1[None, :, None, None]
    y = lax.reduce_window(y, -jnp.inf, lax.max, (1, 1, 2, 2), (1, 1, 2, 2), 'VALID')
    y = jnp.maximum(y, 0.0)
    y = lax.conv_general_dilated(y, w2, (1, 1), 'VALID', dimension_numbers=dn,
                                 precision=hi) + b2[None, :, None, None]
    y = lax.reduce_window(y, -jnp.inf, lax.max, (1, 1, 2, 2), (1, 1, 2, 2), 'VALID')
    y = jnp.maximum(y, 0.0)
    y = y.reshape(y.shape[0], -1)
    y = jnp.dot(y, wf1.T, precision=hi) + bf1
    y = jnp.dot(y, wf2.T, precision=hi) + bf2
    return y


# ----------------------------------- main -------------------------------------

if __name__ == "__main__":
    # Module hyperparameters (small): LeNetContainer([4, 8], 5, 128, [32], 10)
    N = 2
    num_filters = (4, 8)
    kernel_size = 5
    hidden_dims = (32,)
    output_dim = 10
    H = W = 28                                 # 28 -> 24 -> 12 -> 8 -> 4
    input_dim = num_filters[1] * 4 * 4         # 128, matches fc1 input

    key = jax.random.PRNGKey(0)
    ks = jax.random.split(key, 9)
    x = jax.random.normal(ks[0], (N, 1, H, W), jnp.float32)
    w1 = 0.2 * jax.random.normal(ks[1], (num_filters[0], 1, kernel_size, kernel_size), jnp.float32)
    b1 = 0.1 * jax.random.normal(ks[2], (num_filters[0],), jnp.float32)
    w2 = 0.1 * jax.random.normal(ks[3], (num_filters[1], num_filters[0], kernel_size, kernel_size), jnp.float32)
    b2 = 0.1 * jax.random.normal(ks[4], (num_filters[1],), jnp.float32)
    wf1 = 0.1 * jax.random.normal(ks[5], (hidden_dims[0], input_dim), jnp.float32)
    bf1 = 0.1 * jax.random.normal(ks[6], (hidden_dims[0],), jnp.float32)
    wf2 = 0.1 * jax.random.normal(ks[7], (output_dim, hidden_dims[0]), jnp.float32)
    bf2 = 0.1 * jax.random.normal(ks[8], (output_dim,), jnp.float32)
    params = (w1, b1, w2, b2, wf1, bf1, wf2, bf2)

    out = jax.jit(lenet_forward)(x, params)
    out = jax.block_until_ready(out)
    assert out.shape == (N, output_dim), out.shape

    ref = jax.block_until_ready(lenet_reference(x, params))
    # Tolerance relaxed to 2e-2 because the kernel feeds bf16 operands to the MXU
    # (f32 accumulation), while the reference runs in f32 HIGHEST precision.
    np.testing.assert_allclose(np.asarray(out), np.asarray(ref), rtol=2e-2, atol=2e-2)

    print("KERNEL_OK")
</pallas_src>

<mosaic_0001>
module attributes {stable_mosaic.version = 11 : i64} {
  func.func @kernel(%arg0: i32, %arg1: memref<1x196x4xf32, #tpu.memory_space<vmem>>, %arg2: memref<36x16xbf16, #tpu.memory_space<vmem>>, %arg3: memref<1x4xf32, #tpu.memory_space<vmem>>, %arg4: memref<100x8xbf16, #tpu.memory_space<vmem>>, %arg5: memref<1x8xf32, #tpu.memory_space<vmem>>, %arg6: memref<128x10xbf16, #tpu.memory_space<vmem>>, %arg7: memref<1x10xf32, #tpu.memory_space<vmem>>, %arg8: memref<1x1x10xf32, #tpu.memory_space<vmem>>) attributes {dimension_semantics = [#tpu.dimension_semantics<parallel>], iteration_bounds = array<i64: 2>, scalar_prefetch = 0 : i64, scratch_operands = 0 : i64, tpu.core_type = #tpu.core_type<tc>, window_params = [{transform_indices = @transform_0, window_bounds = array<i64: 1, 196, 4>}, {pipeline_mode = #tpu.pipeline_mode<synchronous>, transform_indices = @transform_1, window_bounds = array<i64: 36, 16>}, {pipeline_mode = #tpu.pipeline_mode<synchronous>, transform_indices = @transform_2, window_bounds = array<i64: 1, 4>}, {pipeline_mode = #tpu.pipeline_mode<synchronous>, transform_indices = @transform_3, window_bounds = array<i64: 100, 8>}, {pipeline_mode = #tpu.pipeline_mode<synchronous>, transform_indices = @transform_4, window_bounds = array<i64: 1, 8>}, {pipeline_mode = #tpu.pipeline_mode<synchronous>, transform_indices = @transform_5, window_bounds = array<i64: 128, 10>}, {pipeline_mode = #tpu.pipeline_mode<synchronous>, transform_indices = @transform_6, window_bounds = array<i64: 1, 10>}, {transform_indices = @transform_7, window_bounds = array<i64: 1, 1, 10>}]} {
    %c0 = arith.constant 0 : index
    %c0_0 = arith.constant 0 : index
    %c0_1 = arith.constant 0 : index
    %0 = vector.load %arg1[%c0, %c0_0, %c0_1] : memref<1x196x4xf32, #tpu.memory_space<vmem>>, vector<1x196x4xf32>
    %1 = vector.shape_cast %0 : vector<1x196x4xf32> to vector<196x4xf32>
    %2 = vector.extract_strided_slice %1 {offsets = [0, 0], sizes = [166, 4], strides = [1, 1]} : vector<196x4xf32> to vector<166x4xf32>
    %3 = vector.extract_strided_slice %1 {offsets = [1, 0], sizes = [166, 4], strides = [1, 1]} : vector<196x4xf32> to vector<166x4xf32>
    %4 = vector.extract_strided_slice %1 {offsets = [2, 0], sizes = [166, 4], strides = [1, 1]} : vector<196x4xf32> to vector<166x4xf32>
    %5 = vector.extract_strided_slice %1 {offsets = [14, 0], sizes = [166, 4], strides = [1, 1]} : vector<196x4xf32> to vector<166x4xf32>
    %6 = vector.extract_strided_slice %1 {offsets = [15, 0], sizes = [166, 4], strides = [1, 1]} : vector<196x4xf32> to vector<166x4xf32>
    %7 = vector.extract_strided_slice %1 {offsets = [16, 0], sizes = [166, 4], strides = [1, 1]} : vector<196x4xf32> to vector<166x4xf32>
    %8 = vector.extract_strided_slice %1 {offsets = [28, 0], sizes = [166, 4], strides = [1, 1]} : vector<196x4xf32> to vector<166x4xf32>
    %9 = vector.extract_strided_slice %1 {offsets = [29, 0], sizes = [166, 4], strides = [1, 1]} : vector<196x4xf32> to vector<166x4xf32>
    %10 = vector.extract_strided_slice %1 {offsets = [30, 0], sizes = [166, 4], strides = [1, 1]} : vector<196x4xf32> to vector<166x4xf32>
    %11 = tpu.concatenate %2, %3, %4, %5, %6, %7, %8, %9, %10 in 1 : vector<166x4xf32>, vector<166x4xf32>, vector<166x4xf32>, vector<166x4xf32>, vector<166x4xf32>, vector<166x4xf32>, vector<166x4xf32>, vector<166x4xf32>, vector<166x4xf32> -> vector<166x36xf32>
    %12 = arith.truncf %11 : vector<166x36xf32> to vector<166x36xbf16>
    %c0_2 = arith.constant 0 : index
    %c0_3 = arith.constant 0 : index
    %13 = vector.load %arg2[%c0_2, %c0_3] : memref<36x16xbf16, #tpu.memory_space<vmem>>, vector<36x16xbf16>
    %cst = arith.constant dense<0.000000e+00> : vector<166x16xf32>
    %14 = tpu.matmul %12, %13, %cst {dimension_numbers = #tpu.dot_dimension_numbers<[1], [0], [0], [1], [0, 0, 1, 1], [], []>} : vector<166x36xbf16>, vector<36x16xbf16>, vector<166x16xf32> -> vector<166x16xf32>
    %15 = vector.extract_strided_slice %14 {offsets = [0, 0], sizes = [166, 4], strides = [1, 1]} : vector<166x16xf32> to vector<166x4xf32>
    %16 = vector.extract_strided_slice %14 {offsets = [0, 4], sizes = [166, 4], strides = [1, 1]} : vector<166x16xf32> to vector<166x4xf32>
    %17 = arith.maximumf %15, %16 : vector<166x4xf32>
    %18 = vector.extract_strided_slice %14 {offsets = [0, 8], sizes = [166, 4], strides = [1, 1]} : vector<166x16xf32> to vector<166x4xf32>
    %19 = vector.extract_strided_slice %14 {offsets = [0, 12], sizes = [166, 4], strides = [1, 1]} : vector<166x16xf32> to vector<166x4xf32>
    %20 = arith.maximumf %18, %19 : vector<166x4xf32>
    %21 = arith.maximumf %17, %20 : vector<166x4xf32>
    %c0_4 = arith.constant 0 : index
    %c0_5 = arith.constant 0 : index
    %22 = vector.load %arg3[%c0_4, %c0_5] : memref<1x4xf32, #tpu.memory_space<vmem>>, vector<1x4xf32>
    %23 = vector.broadcast %22 : vector<1x4xf32> to vector<166x4xf32>
    %24 = arith.addf %21, %23 : vector<166x4xf32>
    %cst_6 = arith.constant 0.000000e+00 : f32
    %25 = vector.broadcast %cst_6 : f32 to vector<166x4xf32>
    %26 = arith.maximumf %24, %25 : vector<166x4xf32>
    %27 = vector.extract_strided_slice %26 {offsets = [0, 0], sizes = [162, 4], strides = [1, 1]} : vector<166x4xf32> to vector<162x4xf32>
    %28 = vector.extract_strided_slice %26 {offsets = [1, 0], sizes = [162, 4], strides = [1, 1]} : vector<166x4xf32> to vector<162x4xf32>
    %29 = vector.extract_strided_slice %26 {offsets = [2, 0], sizes = [162, 4], strides = [1, 1]} : vector<166x4xf32> to vector<162x4xf32>
    %30 = vector.extract_strided_slice %26 {offsets = [3, 0], sizes = [162, 4], strides = [1, 1]} : vector<166x4xf32> to vector<162x4xf32>
    %31 = vector.extract_strided_slice %26 {offsets = [4, 0], sizes = [162, 4], strides = [1, 1]} : vector<166x4xf32> to vector<162x4xf32>
    %32 = tpu.concatenate %27, %28, %29, %30, %31 in 1 : vector<162x4xf32>, vector<162x4xf32>, vector<162x4xf32>, vector<162x4xf32>, vector<162x4xf32> -> vector<162x20xf32>
    %33 = vector.extract_strided_slice %32 {offsets = [0, 0], sizes = [106, 20], strides = [1, 1]} : vector<162x20xf32> to vector<106x20xf32>
    %34 = vector.extract_strided_slice %32 {offsets = [14, 0], sizes = [106, 20], strides = [1, 1]} : vector<162x20xf32> to vector<106x20xf32>
    %35 = vector.extract_strided_slice %32 {offsets = [28, 0], sizes = [106, 20], strides = [1, 1]} : vector<162x20xf32> to vector<106x20xf32>
    %36 = vector.extract_strided_slice %32 {offsets = [42, 0], sizes = [106, 20], strides = [1, 1]} : vector<162x20xf32> to vector<106x20xf32>
    %37 = vector.extract_strided_slice %32 {offsets = [56, 0], sizes = [106, 20], strides = [1, 1]} : vector<162x20xf32> to vector<106x20xf32>
    %38 = tpu.concatenate %33, %34, %35, %36, %37 in 1 : vector<106x20xf32>, vector<106x20xf32>, vector<106x20xf32>, vector<106x20xf32>, vector<106x20xf32> -> vector<106x100xf32>
    %39 = arith.truncf %38 : vector<106x100xf32> to vector<106x100xbf16>
    %c0_7 = arith.constant 0 : index
    %c0_8 = arith.constant 0 : index
    %40 = vector.load %arg4[%c0_7, %c0_8] : memref<100x8xbf16, #tpu.memory_space<vmem>>, vector<100x8xbf16>
    %cst_9 = arith.constant dense<0.000000e+00> : vector<106x8xf32>
    %41 = tpu.matmul %39, %40, %cst_9 {dimension_numbers = #tpu.dot_dimension_numbers<[1], [0], [0], [1], [0, 0, 1, 1], [], []>} : vector<106x100xbf16>, vector<100x8xbf16>, vector<106x8xf32> -> vector<106x8xf32>
    %42 = vector.extract_strided_slice %41 {offsets = [0, 0], sizes = [105, 8], strides = [1, 1]} : vector<106x8xf32> to vector<105x8xf32>
    %43 = vector.extract_strided_slice %41 {offsets = [1, 0], sizes = [105, 8], strides = [1, 1]} : vector<106x8xf32> to vector<105x8xf32>
    %44 = arith.maximumf %42, %43 : vector<105x8xf32>
    %45 = vector.extract_strided_slice %44 {offsets = [0, 0], sizes = [91, 8], strides = [1, 1]} : vector<105x8xf32> to vector<91x8xf32>
    %46 = vector.extract_strided_slice %44 {offsets = [14, 0], sizes = [91, 8], strides = [1, 1]} : vector<105x8xf32> to vector<91x8xf32>
    %47 = arith.maximumf %45, %46 : vector<91x8xf32>
    %c0_10 = arith.constant 0 : index
    %c0_11 = arith.constant 0 : index
    %48 = vector.load %arg5[%c0_10, %c0_11] : memref<1x8xf32, #tpu.memory_space<vmem>>, vector<1x8xf32>
    %49 = vector.broadcast %48 : vector<1x8xf32> to vector<91x8xf32>
    %50 = arith.addf %47, %49 : vector<91x8xf32>
    %cst_12 = arith.constant 0.000000e+00 : f32
    %51 = vector.broadcast %cst_12 : f32 to vector<91x8xf32>
    %52 = arith.maximumf %50, %51 : vector<91x8xf32>
    %53 = vector.extract_strided_slice %52 {offsets = [0, 0], sizes = [1, 8], strides = [1, 1]} : vector<91x8xf32> to vector<1x8xf32>
    %54 = vector.extract_strided_slice %52 {offsets = [2, 0], sizes = [1, 8], strides = [1, 1]} : vector<91x8xf32> to vector<1x8xf32>
    %55 = vector.extract_strided_slice %52 {offsets = [4, 0], sizes = [1, 8], strides = [1, 1]} : vector<91x8xf32> to vector<1x8xf32>
    %56 = vector.extract_strided_slice %52 {offsets = [6, 0], sizes = [1, 8], strides = [1, 1]} : vector<91x8xf32> to vector<1x8xf32>
    %57 = vector.extract_strided_slice %52 {offsets = [28, 0], sizes = [1, 8], strides = [1, 1]} : vector<91x8xf32> to vector<1x8xf32>
    %58 = vector.extract_strided_slice %52 {offsets = [30, 0], sizes = [1, 8], strides = [1, 1]} : vector<91x8xf32> to vector<1x8xf32>
    %59 = vector.extract_strided_slice %52 {offsets = [32, 0], sizes = [1, 8], strides = [1, 1]} : vector<91x8xf32> to vector<1x8xf32>
    %60 = vector.extract_strided_slice %52 {offsets = [34, 0], sizes = [1, 8], strides = [1, 1]} : vector<91x8xf32> to vector<1x8xf32>
    %61 = vector.extract_strided_slice %52 {offsets = [56, 0], sizes = [1, 8], strides = [1, 1]} : vector<91x8xf32> to vector<1x8xf32>
    %62 = vector.extract_strided_slice %52 {offsets = [58, 0], sizes = [1, 8], strides = [1, 1]} : vector<91x8xf32> to vector<1x8xf32>
    %63 = vector.extract_strided_slice %52 {offsets = [60, 0], sizes = [1, 8], strides = [1, 1]} : vector<91x8xf32> to vector<1x8xf32>
    %64 = vector.extract_strided_slice %52 {offsets = [62, 0], sizes = [1, 8], strides = [1, 1]} : vector<91x8xf32> to vector<1x8xf32>
    %65 = vector.extract_strided_slice %52 {offsets = [84, 0], sizes = [1, 8], strides = [1, 1]} : vector<91x8xf32> to vector<1x8xf32>
    %66 = vector.extract_strided_slice %52 {offsets = [86, 0], sizes = [1, 8], strides = [1, 1]} : vector<91x8xf32> to vector<1x8xf32>
    %67 = vector.extract_strided_slice %52 {offsets = [88, 0], sizes = [1, 8], strides = [1, 1]} : vector<91x8xf32> to vector<1x8xf32>
    %68 = vector.extract_strided_slice %52 {offsets = [90, 0], sizes = [1, 8], strides = [1, 1]} : vector<91x8xf32> to vector<1x8xf32>
    %69 = tpu.concatenate %53, %54, %55, %56, %57, %58, %59, %60, %61, %62, %63, %64, %65, %66, %67, %68 in 1 : vector<1x8xf32>, vector<1x8xf32>, vector<1x8xf32>, vector<1x8xf32>, vector<1x8xf32>, vector<1x8xf32>, vector<1x8xf32>, vector<1x8xf32>, vector<1x8xf32>, vector<1x8xf32>, vector<1x8xf32>, vector<1x8xf32>, vector<1x8xf32>, vector<1x8xf32>, vector<1x8xf32>, vector<1x8xf32> -> vector<1x128xf32>
    %70 = arith.truncf %69 : vector<1x128xf32> to vector<1x128xbf16>
    %c0_13 = arith.constant 0 : index
    %c0_14 = arith.constant 0 : index
    %71 = vector.load %arg6[%c0_13, %c0_14] : memref<128x10xbf16, #tpu.memory_space<vmem>>, vector<128x10xbf16>
    %cst_15 = arith.constant dense<0.000000e+00> : vector<1x10xf32>
    %72 = tpu.matmul %70, %71, %cst_15 {dimension_numbers = #tpu.dot_dimension_numbers<[1], [0], [0], [1], [0, 0, 1, 1], [], []>} : vector<1x128xbf16>, vector<128x10xbf16>, vector<1x10xf32> -> vector<1x10xf32>
    %c0_16 = arith.constant 0 : index
    %c0_17 = arith.constant 0 : index
    %73 = vector.load %arg7[%c0_16, %c0_17] : memref<1x10xf32, #tpu.memory_space<vmem>>, vector<1x10xf32>
    %74 = arith.addf %72, %73 : vector<1x10xf32>
    %c0_18 = arith.constant 0 : index
    %c0_19 = arith.constant 0 : index
    %c0_20 = arith.constant 0 : index
    %75 = vector.load %arg8[%c0_18, %c0_19, %c0_20] : memref<1x1x10xf32, #tpu.memory_space<vmem>>, vector<1x1x10xf32>
    %76 = vector.shape_cast %75 : vector<1x1x10xf32> to vector<1x10xf32>
    %77 = vector.shape_cast %74 : vector<1x10xf32> to vector<1x1x10xf32>
    tpu.vector_store %arg8[%c0_18, %c0_19, %c0_20], %77 {strides = array<i32>} : memref<1x1x10xf32, #tpu.memory_space<vmem>>, vector<1x1x10xf32>,
    return
  }
  func.func @transform_0(%arg0: i32) -> (i32, i32, i32) {
    %c0_i32 = arith.constant 0 : i32
    %c0_i32_0 = arith.constant 0 : i32
    %c0_i32_1 = arith.constant 0 : i32
    return %arg0, %c0_i32, %c0_i32_0 : i32, i32, i32
  }
  func.func @transform_1(%arg0: i32) -> (i32, i32) {
    %c0_i32 = arith.constant 0 : i32
    %c0_i32_0 = arith.constant 0 : i32
    %c0_i32_1 = arith.constant 0 : i32
    return %c0_i32, %c0_i32_0 : i32, i32
  }
  func.func @transform_2(%arg0: i32) -> (i32, i32) {
    %c0_i32 = arith.constant 0 : i32
    %c0_i32_0 = arith.constant 0 : i32
    %c0_i32_1 = arith.constant 0 : i32
    return %c0_i32, %c0_i32_0 : i32, i32
  }
  func.func @transform_3(%arg0: i32) -> (i32, i32) {
    %c0_i32 = arith.constant 0 : i32
    %c0_i32_0 = arith.constant 0 : i32
    %c0_i32_1 = arith.constant 0 : i32
    return %c0_i32, %c0_i32_0 : i32, i32
  }
  func.func @transform_4(%arg0: i32) -> (i32, i32) {
    %c0_i32 = arith.constant 0 : i32
    %c0_i32_0 = arith.constant 0 : i32
    %c0_i32_1 = arith.constant 0 : i32
    return %c0_i32, %c0_i32_0 : i32, i32
  }
  func.func @transform_5(%arg0: i32) -> (i32, i32) {
    %c0_i32 = arith.constant 0 : i32
    %c0_i32_0 = arith.constant 0 : i32
    %c0_i32_1 = arith.constant 0 : i32
    return %c0_i32, %c0_i32_0 : i32, i32
  }
  func.func @transform_6(%arg0: i32) -> (i32, i32) {
    %c0_i32 = arith.constant 0 : i32
    %c0_i32_0 = arith.constant 0 : i32
    %c0_i32_1 = arith.constant 0 : i32
    return %c0_i32, %c0_i32_0 : i32, i32
  }
  func.func @transform_7(%arg0: i32) -> (i32, i32, i32) {
    %c0_i32 = arith.constant 0 : i32
    %c0_i32_0 = arith.constant 0 : i32
    %c0_i32_1 = arith.constant 0 : i32
    return %arg0, %c0_i32, %c0_i32_0 : i32, i32, i32
  }
}

</mosaic_0001>

<bundles_post_ra>
// kernel: lenet_forward.1
= control target key start
LH: loop header
LB: loop body
LE: loop exit
PB: predicated region body
PF: predicated region fallthrough
CT: control target
= control target key end

     0   :  { %12 = vsyncpa [#allocation3], 0  ;;  %s6124_s0 = inlined_call_operand.vmem [shape: f32[2,196,4], index: 0, kind: input, shape index: {}]   ;;  %s6125_s1 = inlined_call_operand.vmem [shape: bf16[36,16], index: 1, kind: input, shape index: {}]   ;;  %s6126_s2 = inlined_call_operand.vmem [shape: f32[1,4], index: 2, kind: input, shape index: {}]   ;;  %s6127_s3 = inlined_call_operand.vmem [shape: bf16[100,8], index: 3, kind: input, shape index: {}]   ;;  %s6128_s4 = inlined_call_operand.vmem [shape: f32[1,8], index: 4, kind: input, shape index: {}]   ;;  %s6129_s5 = inlined_call_operand.vmem [shape: bf16[128,10], index: 5, kind: input, shape index: {}]   ;;  %s6130_s6 = inlined_call_operand.vmem [shape: f32[1,10], index: 6, kind: input, shape index: {}]   ;;  %s6131_s7 = inlined_call_operand.hbm [shape: f32[2,1,10], index: 7, kind: output, shape index: {}]  }
   0x1   :  { %14 = vsyncpa [#allocation3 + $0x1], 0  ;;  %s4291_s24 = smov 0   ;;  %s4293_s25 = smov 0  }
   0x2   :  { %s4295_s26 = smov 0   ;;  %s4297_s27 = smov 0  }
   0x3 LB: > { %s4312_s28 = sadd.s32 4294967295, %s4225_s27   ;;  %s3130_s29 = sadd.s32 4294967294, %s4225_s27   ;;  %s4225_s27 = sphi %s4297_s27, %s6137_s27   ;;  %s4221_s26 = sphi %s4295_s26, %s6136_s26   ;;  %s4217_s25 = sphi %s4293_s25, %s6135_s25   ;;  %s4213_s24 = sphi %s4291_s24, %s6134_s24  }
   0x4   : > { %s4316_s30 = sadd.s32 1, %s4225_s27   ;;  %s179_s8 = sadd.s32 1, %s4221_s26 }
   0x5   : > { %s176_s9 = ssub.s32 %s4225_s27, %s4316_s30  ;;  %p189_p0 = scmp.ne.s32.totalorder %s4221_s26, %s4217_s25 }
   0x6   : > { %p177_p1 = scmp.eq.s32.totalorder %s176_s9, 0  ;;  %p190_p2 = scmp.eq.s32.totalorder %s4312_s28, 1 }
   0x7   : > { %p195_p3 = scmp.ne.s32.totalorder %s4217_s25, %s4213_s24  ;;  %p196_p4 = scmp.eq.s32.totalorder %s3130_s29, 1 }
   0x8   : > { %s4327_s10 = scalar_select %p177_p1, %s4221_s26, %s179_s8  }
   0x9   : > { %p4329_p5 = por %p190_p2, %p189_p0  ;;  %p4333_p6 = por %p196_p4, %p195_p3 }
   0xa   : > { %p3133_p7 = scmp.ge.s32.totalorder %s4225_s27, 1  ;;  %p240_p8 = scmp.lt.s32.totalorder %s4225_s27, 3 }
   0xc   : > { %p241_p9 = pnand %p3133_p7, %p240_p8 }
   0xd   : > { %p271_p10 = scmp.lt.s32.totalorder (!%p241_p9), %s4312_s28, 1  ;;  %vm535_vm0 = vcmask (!%p241_p9), 1041408   ;;  %v4128_v0 = vld [vmem:[%s6125_s1] sm:$0xff] (!%p241_p9)   ;;  %vm323_vm1 = vcmask (!%p241_p9), 1046528   ;;  %vm642_vm2 = vcmask (!%p241_p9), 1040384   ;;  %v4227_v1 = vmov (!%p241_p9), 0.0  }
   0xe   : > { %244 = sbr.rel (%p241_p9) target bundleno = 1603 (0x643), region = 48  ;;  %3213 = vmatprep.subr.bf16.mxu0 (!%p241_p9), %v4227_v1  ;;  %3263 = vmatprep.subr.bf16.mxu1 (!%p241_p9), %v4227_v1  ;;  %vm428_vm3 = vcmask (!%p241_p9), 1045504   ;;  %vm814_vm4 = vcmask (!%p241_p9), 1043456   ;;  %vm921_vm5 = vcmask (!%p241_p9), 1042432   ;;  %s4228_s20 = smov (!%p241_p9), 20   ;;  %v4129_v36 = vld [vmem:[%s6125_s1 + $0x8] sm:$0xff] (!%p241_p9)  }
   0xf   : > { %3214 = vmatpush3.bf16.msra.mxu0 (!%p241_p9), %v4128_v0  ;;  %s4229_s21 = smov (!%p241_p9), 12   ;;  %s4230_s22 = smov (!%p241_p9), 4   ;;  %vm4236_vm6 = vmmov (!%p241_p9), 0   ;;  %vm1095_vm7 = vcmask (!%p241_p9), 31744   ;;  %vm1117_vm8 = vcmask (!%p241_p9), 64512   ;;  %vm1139_vm9 = vcmask (!%p241_p9), 97280  }
  0x10   : > { %3215 = vmatprep.subr.bf16.mxu0 (!%p241_p9), %v4227_v1  ;;  %s4231_s8 = smov (!%p241_p9), 16   ;;  %s4232_s9 = smov (!%p241_p9), 8   ;;  %3219 = vmatprep.mubr.msk.bf16.mxu0 (!%p241_p9), %vm4236_vm6, %v4227_v1  ;;  %vm1161_vm10 = vcmask (!%p241_p9), 130048   ;;  %vm1183_vm11 = vcmask (!%p241_p9), 162816   ;;  %vm1205_vm12 = vcmask (!%p241_p9), 195584   ;;  %vm1227_vm13 = vcmask (!%p241_p9), 228352  }
  0x11   : > { %s4235_s15 = smov (!%p241_p9), 32   ;;  %3277 = vmatprep.mubr.msk.bf16.mxu1 (!%p241_p9), %vm4236_vm6, %v4227_v1  ;;  %vm1249_vm14 = vcmask (!%p241_p9), 261120   ;;  %vm1302_vm15 = vcmask (!%p241_p9), 293888   ;;  %s4237_s18 = smov (!%p241_p9), 124  }
  0x12   : > { %s4239_s17 = smov (!%p241_p9), 40   ;;  %s4241_s23 = smov (!%p241_p9), 80  }
  0x13   : > { %3216 = vmatpush3.bf16.msra.mxu0 (!%p241_p9), %v4129_v36  ;;  %s4244_s29 = smov (!%p241_p9), 64   ;;  %s4247_s16 = smov (!%p241_p9), 104  }
  0x14   : > { %3217 = vmatprep.subr.bf16.mxu0 (!%p241_p9), %v4227_v1 }
  0x15   : > { %s272_s13 = scalar_select %p271_p10, %s4312_s28, 1 }
  0x17   : > { %s3325_s14 = smul.u32 200, %s272_s13  ;;  %s4233_s13 = smov 24  }
  0x19   : > { %s4349_s19 = scalar_lea.vmem %s6124_s0, %s3325_s14  ;;  %s4234_s14 = smov 28  }
  0x1a   : > { %v4352_v2 = vld [vmem:[%s4349_s19 + $0x10] sm:$0xff]  ;;  %v4355_v3 = vld [vmem:[%s4349_s19 + $0x18] sm:$0xff]  ;;  %v4358_v4 = vld [vmem:[%s4349_s19 + $0x8] sm:$0xff] }
  0x1b   : > { %v3388_v5 = vpack.i.bf16 %v4355_v3, %v4352_v2  ;;  %v536_v6 = vrot.slane %v4358_v4, 6  ;;  %v537_v7 = vrot.slane %v4352_v2, 6  ;;  %v539_v8 = vrot.slane %v4355_v3, 6  ;;  %v4367_v9 = vld [vmem:[%s4349_s19] sm:$0xff]  ;;  %v4385_v23 = vld [vmem:[%s4349_s19 + $0x28] sm:$0xff]  ;;  %v4423_v55 = vld [vmem:[%s4349_s19 + $0x30] sm:$0xff] }
  0x1c   : > { %v324_v10 = vrot.slane %v4367_v9, 1  ;;  %v325_v11 = vrot.slane %v4358_v4, 1  ;;  %v327_v12 = vrot.slane %v4352_v2, 1  ;;  %v643_v13 = vrot.slane %v4358_v4, 7  ;;  %v4379_v18 = vld [vmem:[%s4349_s19 + $0x20] sm:$0xff]  ;;  %v4427_v58 = vld [vmem:[%s4349_s19 + $0x38] sm:$0xff] }
  0x1d   : > { %3389 = vrot.lane.b32.xlu0 %v3388_v5, %s4228_s20  ;;  %v538_v14 = vsel %vm535_vm0, %v536_v6, %v537_v7  ;;  %v540_v15 = vsel %vm535_vm0, %v537_v7, %v539_v8  ;;  %v644_v16 = vrot.slane %v4352_v2, 7  ;;  %v646_v17 = vrot.slane %v4355_v3, 7 }
  0x1e   : > { %v3403_v19 = vpack.i.bf16 %v540_v15, %v538_v14  ;;  %v326_v20 = vsel %vm323_vm1, %v324_v10, %v325_v11  ;;  %v328_v21 = vsel %vm323_vm1, %v325_v11, %v327_v12  ;;  %v429_v22 = vrot.slane %v4367_v9, 2 }
  0x1f   : > { %v3393_v24 = vpack.i.bf16 %v328_v21, %v326_v20  ;;  %v645_v25 = vsel %vm642_vm2, %v643_v13, %v644_v16  ;;  %v647_v26 = vsel %vm642_vm2, %v644_v16, %v646_v17  ;;  %v430_v27 = vrot.slane %v4358_v4, 2 }
  0x20   : > { %3404 = vrot.lane.b32.xlu1 %v3403_v19, %s4229_s21  ;;  %v3408_v28 = vpack.i.bf16 %v647_v26, %v645_v25  ;;  %v432_v29 = vrot.slane %v4352_v2, 2  ;;  %v815_v30 = vrot.slane %v4355_v3, 4  ;;  %v816_v31 = vrot.slane %v4379_v18, 4 }
  0x21   : > { %3394 = vrot.lane.b32.xlu0 %v3393_v24, %s4230_s22  ;;  %v431_v32 = vsel %vm428_vm3, %v429_v22, %v430_v27  ;;  %v818_v33 = vrot.slane %v4385_v23, 4  ;;  %v922_v34 = vrot.slane %v4355_v3, 5  ;;  %v923_v35 = vrot.slane %v4379_v18, 5 }
  0x22   : > { %v433_v37 = vsel %vm428_vm3, %v430_v27, %v432_v29  ;;  %v817_v38 = vsel %vm814_vm4, %v815_v30, %v816_v31  ;;  %v925_v39 = vrot.slane %v4385_v23, 5  ;;  %v541_v40 = vrot.slane %v4379_v18, 6 }
  0x23   : > { %v3398_v41 = vpack.i.bf16 %v433_v37, %v431_v32  ;;  %v819_v42 = vsel %vm814_vm4, %v816_v31, %v818_v33  ;;  %v924_v43 = vsel %vm921_vm5, %v922_v34, %v923_v35  ;;  %v543_v44 = vrot.slane %v4385_v23, 6  ;;  %v4472_v37 = vld [vmem:[%s4349_s19 + $0x40] sm:$0xff] }
  0x24   : > { %3409 = vrot.lane.b32.xlu1 %v3408_v28, %s4231_s8  ;;  %v3413_v45 = vpack.i.bf16 %v819_v42, %v817_v38  ;;  %v926_v46 = vsel %vm921_vm5, %v923_v35, %v925_v39  ;;  %v542_v47 = vsel %vm535_vm0, %v539_v8, %v541_v40  ;;  %v329_v48 = vrot.slane %v4355_v3, 1  ;;  %v4475_v38 = vld [vmem:[%s4349_s19 + $0x48] sm:$0xff] }
  0x25   : > { %3399 = vrot.lane.b32.xlu0 %v3398_v41, %s4232_s9  ;;  %v3418_v49 = vpack.i.bf16 %v926_v46, %v924_v43  ;;  %v544_v50 = vsel %vm535_vm0, %v541_v40, %v543_v44  ;;  %v331_v51 = vrot.slane %v4379_v18, 1  ;;  %v434_v52 = vrot.slane %v4355_v3, 2 }
  0x26   : > { %v330_v53 = vsel %vm323_vm1, %v327_v12, %v329_v48  ;;  %v436_v54 = vrot.slane %v4379_v18, 2  ;;  %v3423_v56 = vpack.i.bf16 %v544_v50, %v542_v47  ;;  %v648_v61 = vrot.slane %v4379_v18, 7 }
  0x27   : > { %v332_v57 = vsel %vm323_vm1, %v329_v48, %v331_v51  ;;  %v435_v59 = vsel %vm428_vm3, %v432_v29, %v434_v52  ;;  %v650_v62 = vrot.slane %v4385_v23, 7  ;;  %v820_v5 = vrot.slane %v4423_v55, 4 }
  0x28   : > { %3414 = vrot.lane.b32.xlu1 %v3413_v45, %s4233_s13  ;;  %v437_v60 = vsel %vm428_vm3, %v434_v52, %v436_v54  ;;  %v3428_v63 = vpack.i.bf16 %v332_v57, %v330_v53  ;;  %v822_v6 = vrot.slane %v4427_v58, 4  ;;  %v649_v7 = vsel %vm642_vm2, %v646_v17, %v648_v61 }
  0x29   : > { %3419 = vrot.lane.b32.xlu0 %v3418_v49, %s4234_s14  ;;  %v3433_v0 = vpack.i.bf16 %v437_v60, %v435_v59  ;;  %v651_v8 = vsel %vm642_vm2, %v648_v61, %v650_v62  ;;  %v927_v10 = vrot.slane %v4423_v55, 5  ;;  %v929_v11 = vrot.slane %v4427_v58, 5 }
  0x2a   : > { %v3443_v12 = vpack.i.bf16 %v651_v8, %v649_v7  ;;  %v3448_v13 = vpack.i.bf16 %v4385_v23, %v4379_v18  ;;  %v821_v14 = vsel %vm814_vm4, %v818_v33, %v820_v5  ;;  %v823_v15 = vsel %vm814_vm4, %v820_v5, %v822_v6  ;;  %v4509_v7 = vld [vmem:[%s4349_s19 + $0x50] sm:$0xff] }
  0x2b   : > { %v545_v16 = vrot.slane %v4423_v55, 6  ;;  %v547_v17 = vrot.slane %v4427_v58, 6  ;;  %v928_v19 = vsel %vm921_vm5, %v925_v39, %v927_v10  ;;  %v930_v20 = vsel %vm921_vm5, %v927_v10, %v929_v11 }
  0x2c   : > { %3424 = vrot.lane.b32.xlu1 %v3423_v56, %s4235_s15  ;;  %v333_v21 = vrot.slane %v4385_v23, 1  ;;  %v335_v18 = vrot.slane %v4423_v55, 1  ;;  %v3453_v22 = vpack.i.bf16 %v823_v15, %v821_v14  ;;  %v3458_v24 = vpack.i.bf16 %v930_v20, %v928_v19 }
  0x2d   : > { %3429 = vrot.lane.b32.xlu0 %v3428_v63, %s4230_s22  ;;  %v546_v25 = vsel %vm535_vm0, %v543_v44, %v545_v16  ;;  %v548_v26 = vsel %vm535_vm0, %v545_v16, %v547_v17  ;;  %v438_v29 = vrot.slane %v4385_v23, 2  ;;  %v440_v30 = vrot.slane %v4423_v55, 2 }
  0x2e   : > { %v334_v27 = vsel %vm323_vm1, %v331_v51, %v333_v21  ;;  %v336_v28 = vsel %vm323_vm1, %v333_v21, %v335_v18  ;;  %v3463_v31 = vpack.i.bf16 %v548_v26, %v546_v25  ;;  %v652_v35 = vrot.slane %v4423_v55, 7 }
  0x2f   : > { %v3468_v32 = vpack.i.bf16 %v336_v28, %v334_v27  ;;  %v439_v33 = vsel %vm428_vm3, %v436_v54, %v438_v29  ;;  %v441_v34 = vsel %vm428_vm3, %v438_v29, %v440_v30  ;;  %v654_v36 = vrot.slane %v4427_v58, 7 }
  0x30   : > { %3434 = vrot.lane.b32.xlu1 %v3433_v0, %s4232_s9  ;;  %v3473_v23 = vpack.i.bf16 %v441_v34, %v439_v33  ;;  %v824_v39 = vrot.slane %v4472_v37, 4  ;;  %v826_v40 = vrot.slane %v4475_v38, 4  ;;  %v653_v41 = vsel %vm642_vm2, %v650_v62, %v652_v35 }
  0x31   : > { %3439 = vrot.lane.b32.xlu0 %v3423_v56, %s4229_s21  ;;  %v655_v42 = vsel %vm642_vm2, %v652_v35, %v654_v36  ;;  %v931_v43 = vrot.slane %v4472_v37, 5  ;;  %v933_v44 = vrot.slane %v4475_v38, 5  ;;  %v3488_v46 = vpack.i.bf16 %v4427_v58, %v4423_v55 }
  0x32   : > { %v3483_v45 = vpack.i.bf16 %v655_v42, %v653_v41  ;;  %v825_v47 = vsel %vm814_vm4, %v822_v6, %v824_v39  ;;  %v827_v48 = vsel %vm814_vm4, %v824_v39, %v826_v40  ;;  %v549_v51 = vrot.slane %v4472_v37, 6 }
  0x33   : > { %v932_v49 = vsel %vm921_vm5, %v929_v11, %v931_v43  ;;  %v934_v50 = vsel %vm921_vm5, %v931_v43, %v933_v44  ;;  %v551_v52 = vrot.slane %v4475_v38, 6  ;;  %v337_v53 = vrot.slane %v4427_v58, 1  ;;  %v4515_v11 = vld [vmem:[%s4349_s19 + $0x58] sm:$0xff] }
  0x34   : > { %3444 = vrot.lane.b32.xlu1 %v3443_v12, %s4231_s8  ;;  %v339_v54 = vrot.slane %v4472_v37, 1  ;;  %v3493_v55 = vpack.i.bf16 %v827_v48, %v825_v47  ;;  %v3498_v56 = vpack.i.bf16 %v934_v50, %v932_v49  ;;  %v550_v57 = vsel %vm535_vm0, %v547_v17, %v549_v51 }
  0x35   : > { %3449 = vrot.lane.b32.xlu0 %v3448_v13, %s4228_s20  ;;  %v552_v59 = vsel %vm535_vm0, %v549_v51, %v551_v52  ;;  %v442_v60 = vrot.slane %v4427_v58, 2  ;;  %v444_v61 = vrot.slane %v4472_v37, 2  ;;  %v338_v62 = vsel %vm323_vm1, %v335_v18, %v337_v53 }
  0x36   : > { %v340_v63 = vsel %vm323_vm1, %v337_v53, %v339_v54  ;;  %v3503_v0 = vpack.i.bf16 %v552_v59, %v550_v57  ;;  %v656_v5 = vrot.slane %v4472_v37, 7  ;;  %v658_v6 = vrot.slane %v4475_v38, 7 }
  0x37   : > { %v3508_v8 = vpack.i.bf16 %v340_v63, %v338_v62  ;;  %v443_v58 = vsel %vm428_vm3, %v440_v30, %v442_v60  ;;  %v445_v10 = vsel %vm428_vm3, %v442_v60, %v444_v61  ;;  %v828_v12 = vrot.slane %v4509_v7, 4 }
  0x38   : > { %3454 = vrot.lane.b32.xlu1 %v3453_v22, %s4233_s13  ;;  %v3513_v13 = vpack.i.bf16 %v445_v10, %v443_v58  ;;  %v657_v14 = vsel %vm642_vm2, %v654_v36, %v656_v5  ;;  %v659_v15 = vsel %vm642_vm2, %v656_v5, %v658_v6  ;;  %v830_v16 = vrot.slane %v4515_v11, 4 }
  0x39   : > { %3459 = vrot.lane.b32.xlu0 %v3458_v24, %s4234_s14  ;;  %v935_v17 = vrot.slane %v4509_v7, 5  ;;  %v937_v19 = vrot.slane %v4515_v11, 5  ;;  %v3523_v20 = vpack.i.bf16 %v659_v15, %v657_v14  ;;  %v3528_v21 = vpack.i.bf16 %v4475_v38, %v4472_v37 }
  0x3a   : > { %v829_v18 = vsel %vm814_vm4, %v826_v40, %v828_v12  ;;  %v831_v22 = vsel %vm814_vm4, %v828_v12, %v830_v16  ;;  %v553_v24 = vrot.slane %v4509_v7, 6  ;;  %v555_v25 = vrot.slane %v4515_v11, 6 }
  0x3b   : > { %v936_v26 = vsel %vm921_vm5, %v933_v44, %v935_v17  ;;  %v938_v27 = vsel %vm921_vm5, %v935_v17, %v937_v19  ;;  %v341_v28 = vrot.slane %v4475_v38, 1  ;;  %v343_v29 = vrot.slane %v4509_v7, 1  ;;  %v4552_v44 = vld [vmem:[%s4349_s19 + $0x60] sm:$0xff]  ;;  %v4597_v17 = vld [vmem:[%s4349_s19 + $0x70] sm:$0xff] }
  0x3c   : > { %3464 = vrot.lane.b32.xlu1 %v3463_v31, %s4235_s15  ;;  %v3533_v30 = vpack.i.bf16 %v831_v22, %v829_v18  ;;  %v556_v33 = vsel %vm535_vm0, %v553_v24, %v555_v25  ;;  %v446_v36 = vrot.slane %v4475_v38, 2  ;;  %v448_v37 = vrot.slane %v4509_v7, 2  ;;  %v4130_v38 = vld [vmem:[%s6125_s1 + $0x10] ss:$0 sps:$4 sm:$0x33]  }
  0x3d   : > { %3469 = vrot.lane.b32.xlu0 %v3468_v32, %s4230_s22  ;;  %v554_v32 = vsel %vm535_vm0, %v551_v52, %v553_v24  ;;  %v342_v34 = vsel %vm323_vm1, %v339_v54, %v341_v28  ;;  %v344_v35 = vsel %vm323_vm1, %v341_v28, %v343_v29  ;;  %v660_v42 = vrot.slane %v4509_v7, 7 }
  0x3e   : > { %v3548_v39 = vpack.i.bf16 %v344_v35, %v342_v34  ;;  %v447_v40 = vsel %vm428_vm3, %v444_v61, %v446_v36  ;;  %v449_v41 = vsel %vm428_vm3, %v446_v36, %v448_v37  ;;  %v662_v43 = vrot.slane %v4515_v11, 7 }
  0x3f   : > { %v832_v47 = vrot.slane %v4552_v44, 4  ;;  %v661_v49 = vsel %vm642_vm2, %v658_v6, %v660_v42  ;;  %v939_v51 = vrot.slane %v4552_v44, 5  ;;  %v3568_v53 = vpack.i.bf16 %v4515_v11, %v4509_v7 }
  0x40   : > { %3474 = vrot.lane.b32.xlu1 %v3473_v23, %s4232_s9  ;;  %v3543_v23 = vpack.i.bf16 %v556_v33, %v554_v32  ;;  %v663_v50 = vsel %vm642_vm2, %v660_v42, %v662_v43  ;;  %v1337_v54 = vsel %vm535_vm0, %v4130_v38, 0  ;;  %v557_v59 = vrot.slane %v4552_v44, 6 }
  0x41   : > { %3479 = vrot.lane.b32.xlu0 %v3463_v31, %s4229_s21  ;;  %v3538_v31 = vpack.i.bf16 %v938_v27, %v936_v26  ;;  %v940_v60 = vsel %vm921_vm5, %v937_v19, %v939_v51  ;;  %3218 = vmatpush3.bf16.msra.mxu0 %v1337_v54  ;;  %v345_v63 = vrot.slane %v4515_v11, 1  ;;  %v450_v58 = vrot.slane %v4515_v11, 2  ;;  %v4643_v54 = vld [vmem:[%s4349_s19 + $0x88] sm:$0xff] }
  0x42   : > { %v558_v7 = vsel %vm535_vm0, %v555_v25, %v557_v59  ;;  %v452_v10 = vrot.slane %v4552_v44, 2  ;;  %v664_v15 = vrot.slane %v4552_v44, 7  ;;  %v836_v18 = vrot.slane %v4597_v17, 4 }
  0x43   : > { %v346_v12 = vsel %vm323_vm1, %v343_v29, %v345_v63  ;;  %v451_v11 = vsel %vm428_vm3, %v448_v37, %v450_v58  ;;  %v943_v27 = vrot.slane %v4597_v17, 5  ;;  %v561_v33 = vrot.slane %v4597_v17, 6 }
  0x44   : > { %3484 = vrot.lane.b32.xlu1 %v3483_v45, %s4231_s8  ;;  %v4555_v45 = vld [vmem:[%s4349_s19 + $0x68] sm:$0xff]  ;;  %v665_v24 = vsel %vm642_vm2, %v662_v43, %v664_v15 }
  0x45   : > { %3489 = vrot.lane.b32.xlu0 %v3488_v46, %s4228_s20  ;;  %v3553_v46 = vpack.i.bf16 %v449_v41, %v447_v40  ;;  %v834_v48 = vrot.slane %v4555_v45, 4  ;;  %v941_v52 = vrot.slane %v4555_v45, 5  ;;  %v559_v62 = vrot.slane %v4555_v45, 6 }
  0x46   : > { %v349_v37 = vrot.slane %v4555_v45, 1  ;;  %v454_v38 = vrot.slane %v4555_v45, 2 }
  0x47   : > { %v835_v57 = vsel %vm814_vm4, %v832_v47, %v834_v48  ;;  %v942_v61 = vsel %vm921_vm5, %v939_v51, %v941_v52  ;;  %v944_v35 = vsel %vm921_vm5, %v941_v52, %v943_v27  ;;  %v562_v41 = vsel %vm535_vm0, %v559_v62, %v561_v33 }
  0x48   : > { %3494 = vrot.lane.b32.xlu1 %v3493_v55, %s4233_s13  ;;  %v3563_v55 = vpack.i.bf16 %v663_v50, %v661_v49  ;;  %v3578_v6 = vpack.i.bf16 %v942_v61, %v940_v60  ;;  %v455_v49 = vsel %vm428_vm3, %v452_v10, %v454_v38  ;;  %v668_v51 = vrot.slane %v4597_v17, 7 }
  0x49   : > { %3499 = vrot.lane.b32.xlu0 %v3498_v56, %s4234_s14  ;;  %v833_v56 = vsel %vm814_vm4, %v830_v16, %v832_v47  ;;  %v666_v16 = vrot.slane %v4555_v45, 7  ;;  %v949_v61 = vrot.slane %v4643_v54, 5 }
  0x4a   : > { %v3573_v5 = vpack.i.bf16 %v835_v57, %v833_v56  ;;  %v842_v56 = vrot.slane %v4643_v54, 4 }
  0x4b   : > { %v667_v25 = vsel %vm642_vm2, %v664_v15, %v666_v16  ;;  %v669_v57 = vsel %vm642_vm2, %v666_v16, %v668_v51 }
  0x4c   : > { %3504 = vrot.lane.b32.xlu1 %v3503_v0, %s4235_s15  ;;  %v3603_v29 = vpack.i.bf16 %v667_v25, %v665_v24  ;;  %v674_v24 = vrot.slane %v4643_v54, 7  ;;  %v4677_v25 = vld [vmem:[%s4349_s19 + $0x90] sm:$0xff] }
  0x4d   : > { %3509 = vrot.lane.b32.xlu0 %v3508_v8, %s4230_s22  ;;  %v560_v8 = vsel %vm535_vm0, %v557_v59, %v559_v62 }
  0x4e   : > { %v3583_v14 = vpack.i.bf16 %v560_v8, %v558_v7 }
  0x50   : > { %3514 = vrot.lane.b32.xlu1 %v3513_v13, %s4232_s9 }
  0x51   : > { %3519 = vrot.lane.b32.xlu0 %v3503_v0, %s4229_s21  ;;  %v347_v0 = vrot.slane %v4552_v44, 1 }
  0x53   : > { %v348_v13 = vsel %vm323_vm1, %v345_v63, %v347_v0  ;;  %v350_v43 = vsel %vm323_vm1, %v347_v0, %v349_v37 }
  0x54   : > { %3524 = vrot.lane.b32.xlu1 %v3523_v20, %s4231_s8  ;;  %v3588_v19 = vpack.i.bf16 %v348_v13, %v346_v12  ;;  %v453_v20 = vsel %vm428_vm3, %v450_v58, %v452_v10  ;;  %v567_v58 = vrot.slane %v4643_v54, 6 }
  0x55   : > { %3529 = vrot.lane.b32.xlu0 %v3528_v21, %s4228_s20  ;;  %v4603_v21 = vld [vmem:[%s4349_s19 + $0x78] sm:$0xff]  ;;  %v3593_v22 = vpack.i.bf16 %v453_v20, %v451_v11 }
  0x56   : > { %v838_v26 = vrot.slane %v4603_v21, 4  ;;  %v945_v28 = vrot.slane %v4603_v21, 5  ;;  %v563_v34 = vrot.slane %v4603_v21, 6  ;;  %v670_v52 = vrot.slane %v4603_v21, 7 }
  0x57   : > { %v3648_v63 = vpack.i.bf16 %v4603_v21, %v4597_v17  ;;  %v353_v10 = vrot.slane %v4603_v21, 1 }
  0x58   : > { %3534 = vrot.lane.b32.xlu1 %v3533_v30, %s4233_s13  ;;  %v3608_v30 = vpack.i.bf16 %v4555_v45, %v4552_v44  ;;  %v839_v32 = vsel %vm814_vm4, %v836_v18, %v838_v26  ;;  %v946_v36 = vsel %vm921_vm5, %v943_v27, %v945_v28  ;;  %v564_v42 = vsel %vm535_vm0, %v561_v33, %v563_v34 }
  0x59   : > { %3539 = vrot.lane.b32.xlu0 %v3538_v31, %s4234_s14  ;;  %v837_v31 = vsel %vm814_vm4, %v834_v48, %v836_v18  ;;  %v3618_v40 = vpack.i.bf16 %v946_v36, %v944_v35  ;;  %v3623_v47 = vpack.i.bf16 %v564_v42, %v562_v41  ;;  %v671_v59 = vsel %vm642_vm2, %v668_v51, %v670_v52 }
  0x5a   : > { %v3643_v62 = vpack.i.bf16 %v671_v59, %v669_v57  ;;  %v569_v36 = vrot.slane %v4677_v25, 6  ;;  %v464_v41 = vrot.slane %v4677_v25, 2  ;;  %v676_v59 = vrot.slane %v4677_v25, 7 }
  0x5c   : > { %3544 = vrot.lane.b32.xlu1 %v3543_v23, %s4235_s15 }
  0x5d   : > { %3549 = vrot.lane.b32.xlu0 %v3548_v39, %s4230_s22  ;;  %v3613_v39 = vpack.i.bf16 %v839_v32, %v837_v31 }
  0x60   : > { %3554 = vrot.lane.b32.xlu1 %v3553_v46, %s4232_s9  ;;  %v456_v46 = vrot.slane %v4597_v17, 2 }
  0x61   : > { %3559 = vrot.lane.b32.xlu0 %v3543_v23, %s4229_s21  ;;  %v351_v23 = vrot.slane %v4597_v17, 1  ;;  %v458_v17 = vrot.slane %v4603_v21, 2 }
  0x62   : > { %v457_v50 = vsel %vm428_vm3, %v454_v38, %v456_v46 }
  0x63   : > { %v352_v44 = vsel %vm323_vm1, %v349_v37, %v351_v23  ;;  %v3633_v45 = vpack.i.bf16 %v457_v50, %v455_v49  ;;  %v354_v11 = vsel %vm323_vm1, %v351_v23, %v353_v10  ;;  %v459_v21 = vsel %vm428_vm3, %v456_v46, %v458_v17 }
  0x64   : > { %3564 = vrot.lane.b32.xlu1 %v3563_v55, %s4231_s8  ;;  %v3628_v48 = vpack.i.bf16 %v352_v44, %v350_v43  ;;  %v357_v23 = vrot.slane %v4643_v54, 1  ;;  %v570_v49 = vsel %vm535_vm0, %v567_v58, %v569_v36 }
  0x65   : > { %3569 = vrot.lane.b32.xlu0 %v3568_v53, %s4228_s20  ;;  %v4640_v53 = vld [vmem:[%s4349_s19 + $0x80] sm:$0xff] }
  0x66   : > { %v840_v55 = vrot.slane %v4640_v53, 4  ;;  %v947_v60 = vrot.slane %v4640_v53, 5  ;;  %v565_v8 = vrot.slane %v4640_v53, 6  ;;  %v355_v12 = vrot.slane %v4640_v53, 1 }
  0x67   : > { %v3688_v44 = vpack.i.bf16 %v4643_v54, %v4640_v53 }
  0x68   : > { %3574 = vrot.lane.b32.xlu1 %v3573_v5, %s4233_s13  ;;  %v841_v0 = vsel %vm814_vm4, %v838_v26, %v840_v55  ;;  %v843_v5 = vsel %vm814_vm4, %v840_v55, %v842_v56  ;;  %v950_v7 = vsel %vm921_vm5, %v947_v60, %v949_v61  ;;  %v566_v15 = vsel %vm535_vm0, %v563_v34, %v565_v8 }
  0x69   : > { %3579 = vrot.lane.b32.xlu0 %v3578_v6, %s4234_s14  ;;  %v948_v6 = vsel %vm921_vm5, %v945_v28, %v947_v60  ;;  %v3653_v13 = vpack.i.bf16 %v843_v5, %v841_v0  ;;  %v568_v16 = vsel %vm535_vm0, %v565_v8, %v567_v58  ;;  %v356_v20 = vsel %vm323_vm1, %v353_v10, %v355_v12  ;;  %v4683_v28 = vld [vmem:[%s4349_s19 + $0x98] sm:$0xff] }
  0x6a   : > { %v3663_v18 = vpack.i.bf16 %v568_v16, %v566_v15  ;;  %v3668_v26 = vpack.i.bf16 %v356_v20, %v354_v11  ;;  %v846_v33 = vrot.slane %v4683_v28, 4  ;;  %v951_v34 = vrot.slane %v4677_v25, 5 }
  0x6b   : > { %v953_v35 = vrot.slane %v4683_v28, 5  ;;  %v571_v37 = vrot.slane %v4683_v28, 6  ;;  %v678_v60 = vrot.slane %v4683_v28, 7  ;;  %v3728_v58 = vpack.i.bf16 %v4683_v28, %v4677_v25 }
  0x6c   : > { %3584 = vrot.lane.b32.xlu1 %v3583_v14, %s4235_s15  ;;  %v4758_v11 = vsel %vm642_vm2, %v674_v24, %v676_v59 }
  0x6d   : > { %3589 = vrot.lane.b32.xlu0 %v3588_v19, %s4230_s22  ;;  %v460_v19 = vrot.slane %v4640_v53, 2  ;;  %v572_v50 = vsel %vm535_vm0, %v569_v36, %v571_v37  ;;  %v4763_v20 = vsel %vm642_vm2, %v676_v59, %v678_v60 }
  0x6f   : > { %v461_v27 = vsel %vm428_vm3, %v458_v17, %v460_v19 }
  0x70   : > { %3594 = vrot.lane.b32.xlu1 %v3593_v22, %s4232_s9  ;;  %v672_v22 = vrot.slane %v4640_v53, 7 }
  0x71   : > { %3599 = vrot.lane.b32.xlu0 %v3583_v14, %s4229_s21  ;;  %v3658_v14 = vpack.i.bf16 %v950_v7, %v948_v6  ;;  %v4740_v6 = vpack.i.bf16 %v572_v50, %v570_v49  ;;  %v3723_v49 = vpack.i.bf16 %v4763_v20, %v4758_v11 }
  0x72   : > { %v673_v31 = vsel %vm642_vm2, %v670_v52, %v672_v22  ;;  %v675_v32 = vsel %vm642_vm2, %v672_v22, %v674_v24  ;;  %v358_v52 = vsel %vm323_vm1, %v355_v12, %v357_v23 }
  0x73   : > { %v3683_v43 = vpack.i.bf16 %v675_v32, %v673_v31 }
  0x74   : > { %3604 = vrot.lane.b32.xlu1 %v3603_v29, %s4231_s8  ;;  %v844_v29 = vrot.slane %v4677_v25, 4 }
  0x75   : > { %3609 = vrot.lane.b32.xlu0 %v3608_v30, %s4228_s20  ;;  %v3673_v30 = vpack.i.bf16 %v461_v27, %v459_v21 }
  0x76   : > { %v845_v38 = vsel %vm814_vm4, %v842_v56, %v844_v29  ;;  %v847_v46 = vsel %vm814_vm4, %v844_v29, %v846_v33 }
  0x77   : > { %v3693_v57 = vpack.i.bf16 %v847_v46, %v845_v38 }
  0x78   : > { %3614 = vrot.lane.b32.xlu1 %v3613_v39, %s4233_s13  ;;  %v359_v39 = vrot.slane %v4677_v25, 1 }
  0x79   : > { %3619 = vrot.lane.b32.xlu0 %v3618_v40, %s4234_s14  ;;  %v462_v40 = vrot.slane %v4643_v54, 2 }
  0x7a   : > { %v360_v53 = vsel %vm323_vm1, %v357_v23, %v359_v39 }
  0x7b   : > { %v4729_v55 = vsel %vm428_vm3, %v462_v40, %v464_v41  ;;  %v3708_v7 = vpack.i.bf16 %v360_v53, %v358_v52 }
  0x7c   : > { %3624 = vrot.lane.b32.xlu1 %v3623_v47, %s4235_s15 }
  0x7d   : > { %3629 = vrot.lane.b32.xlu0 %v3628_v48, %s4230_s22  ;;  %v954_v48 = vsel %vm921_vm5, %v951_v34, %v953_v35 }
  0x80   : > { %3634 = vrot.lane.b32.xlu1 %v3633_v45, %s4232_s9  ;;  %v4724_v45 = vsel %vm428_vm3, %v460_v19, %v462_v40 }
  0x81   : > { %3639 = vrot.lane.b32.xlu0 %v3623_v47, %s4229_s21  ;;  %v952_v47 = vsel %vm921_vm5, %v949_v61, %v951_v34  ;;  %v4734_v61 = vld [vmem:[%s4349_s19 + $0xa0] sm:$0xff]  ;;  %v3713_v8 = vpack.i.bf16 %v4729_v55, %v4724_v45 }
  0x82   : > { %v3698_v5 = vpack.i.bf16 %v954_v48, %v952_v47  ;;  %v848_v12 = vrot.slane %v4734_v61, 4  ;;  %v363_v11 = vrot.slane %v4734_v61, 1 }
  0x84   : > { %3644 = vrot.lane.b32.xlu1 %v3643_v62, %s4231_s8  ;;  %v4737_v62 = vld [vmem:[%s4349_s19 + $0xa8] sm:$0xff]  ;;  %v849_v50 = vsel %vm814_vm4, %v846_v33, %v848_v12 }
  0x85   : > { %3649 = vrot.lane.b32.xlu0 %v3648_v63, %s4228_s20  ;;  %v957_v15 = vrot.slane %v4737_v62, 5 }
  0x88   : > { %3654 = vrot.lane.b32.xlu1 %v3653_v13, %s4233_s13  ;;  %v850_v13 = vrot.slane %v4737_v62, 4 }
  0x89   : > { %3659 = vrot.lane.b32.xlu0 %v3658_v14, %s4234_s14  ;;  %v955_v14 = vrot.slane %v4734_v61, 5 }
  0x8a   : > { %v851_v45 = vsel %vm814_vm4, %v848_v12, %v850_v13 }
  0x8b   : > { %v956_v55 = vsel %vm921_vm5, %v953_v35, %v955_v14 }
  0x8c   : > { %3664 = vrot.lane.b32.xlu1 %v3663_v18, %s4235_s15 }
  0x8d   : > { %3669 = vrot.lane.b32.xlu0 %v3668_v26, %s4230_s22  ;;  %v575_v26 = vrot.slane %v4737_v62, 6 }
  0x8f   : > { %v4701_v42 = vpop.permute.xlu0 %3389 }
  0x90   : > { %3674 = vrot.lane.b32.xlu1 %v3673_v30, %s4232_s9  ;;  %v3391_v54 = vunpack.i.l.bf16 %v4701_v42 }
  0x91   : > { %3679 = vrot.lane.b32.xlu0 %v3663_v18, %s4229_s21 }
  0x92   : > { %v3405_v51 = vpop.permute.xlu1 %3404 }
  0x93   : > { %v3395_v56 = vpop.permute.xlu0 %3394  ;;  %v3407_v21 = vunpack.i.h.bf16 %v3405_v51  ;;  %v3406_v24 = vunpack.i.l.bf16 %v3405_v51 }
  0x94   : > { %v3397_v63 = vunpack.i.h.bf16 %v3395_v56  ;;  %v3396_v0 = vunpack.i.l.bf16 %v3395_v56  ;;  %3684 = vrot.lane.b32.xlu1 %v3683_v43, %s4231_s8 }
  0x95   : > { %3689 = vrot.lane.b32.xlu0 %v3688_v44, %s4228_s20 }
  0x96   : > { %v3410_v10 = vpop.permute.xlu1 %3409  ;;  %v1097_v16 = vsel %vm1095_vm7, %v4358_v4, %v3397_v63  ;;  %v1096_v17 = vsel %vm1095_vm7, %v4367_v9, %v3396_v0  ;;  %v573_v4 = vrot.slane %v4734_v61, 6  ;;  %v3392_v9 = vunpack.i.h.bf16 %v4701_v42 }
  0x97   : > { %v3400_v19 = vpop.permute.xlu0 %3399  ;;  %v3412_v27 = vunpack.i.h.bf16 %v3410_v10  ;;  %v3411_v29 = vunpack.i.l.bf16 %v3410_v10 }
  0x98   : > { %v3402_v18 = vunpack.i.h.bf16 %v3400_v19  ;;  %v3401_v22 = vunpack.i.l.bf16 %v3400_v19  ;;  %3694 = vrot.lane.b32.xlu1 %v3693_v57, %s4233_s13  ;;  %v574_v10 = vsel %vm535_vm0, %v571_v37, %v573_v4 }
  0x99   : > { %3699 = vrot.lane.b32.xlu0 %v3698_v5, %s4234_s14 }
  0x9a   : > { %v1118_v30 = vsel %vm1117_vm8, %v1096_v17, %v3401_v22  ;;  %v1119_v31 = vsel %vm1117_vm8, %v1097_v16, %v3402_v18  ;;  %v3415_v32 = vpop.permute.xlu1 %3414  ;;  %v576_v16 = vsel %vm535_vm0, %v573_v4, %v575_v26 }
  0x9b   : > { %v1140_v34 = vsel %vm1139_vm9, %v1118_v30, %v3406_v24  ;;  %v1141_v36 = vsel %vm1139_vm9, %v1119_v31, %v3407_v21  ;;  %v3417_v23 = vunpack.i.h.bf16 %v3415_v32  ;;  %v3416_v40 = vunpack.i.l.bf16 %v3415_v32  ;;  %v3420_v43 = vpop.permute.xlu0 %3419 }
  0x9c   : > { %v1162_v42 = vsel %vm1161_vm10, %v1140_v34, %v3411_v29  ;;  %v1163_v44 = vsel %vm1161_vm10, %v1141_v36, %v3412_v27  ;;  %v3422_v38 = vunpack.i.h.bf16 %v3420_v43  ;;  %v3421_v46 = vunpack.i.l.bf16 %v3420_v43  ;;  %3704 = vrot.lane.b32.xlu1 %v4740_v6, %s4235_s15 }
  0x9d   : > { %v1184_v47 = vsel %vm1183_vm11, %v1162_v42, %v3391_v54  ;;  %v1185_v48 = vsel %vm1183_vm11, %v1163_v44, %v3392_v9  ;;  %3709 = vrot.lane.b32.xlu0 %v3708_v7, %s4230_s22  ;;  %v958_v7 = vsel %vm921_vm5, %v955_v14, %v957_v15  ;;  %v468_v9 = vrot.slane %v4734_v61, 2 }
  0x9e   : > { %v1206_v51 = vsel %vm1205_vm12, %v1184_v47, %v3416_v40  ;;  %v1207_v52 = vsel %vm1205_vm12, %v1185_v48, %v3417_v23  ;;  %v3425_v53 = vpop.permute.xlu1 %3424  ;;  %v3738_v21 = vpack.i.bf16 %v958_v7, %v956_v55  ;;  %v3743_v27 = vpack.i.bf16 %v576_v16, %v574_v10  ;;  %v4850_v47 = vld [vmem:[%s4349_s19 + $0xb8] sm:$0xff] }
  0x9f   : > { %v1228_v56 = vsel %vm1227_vm13, %v1206_v51, %v3421_v46  ;;  %v1229_v57 = vsel %vm1227_vm13, %v1207_v52, %v3422_v38  ;;  %v3427_v59 = vunpack.i.h.bf16 %v3425_v53  ;;  %v3426_v63 = vunpack.i.l.bf16 %v3425_v53  ;;  %v3430_v33 = vpop.permute.xlu0 %3429 }
  0xa0   : > { %v3432_v0 = vunpack.i.h.bf16 %v3430_v33  ;;  %v3431_v5 = vunpack.i.l.bf16 %v3430_v33  ;;  %3714 = vrot.lane.b32.xlu1 %v3713_v8, %s4232_s9  ;;  %v361_v8 = vrot.slane %v4683_v28, 1  ;;  %v680_v32 = vrot.slane %v4734_v61, 7 }
  0xa1   : > { %v1250_v35 = vsel %vm1249_vm14, %v1228_v56, %v3426_v63  ;;  %v1251_v12 = vsel %vm1249_vm14, %v1229_v57, %v3427_v59  ;;  %3719 = vrot.lane.b32.xlu0 %v4740_v6, %s4229_s21  ;;  %v466_v6 = vrot.slane %v4683_v28, 2  ;;  %v682_v34 = vrot.slane %v4737_v62, 7 }
  0xa2   : > { %v1099_v14 = vsel %vm1095_vm7, %v4355_v3, %v3432_v0  ;;  %v1098_v17 = vsel %vm1095_vm7, %v4352_v2, %v3431_v5  ;;  %v3435_v37 = vpop.permute.xlu1 %3434  ;;  %v1271_v19 = vpack.c.bf16 %v1251_v12, %v1250_v35  ;;  %v3733_v3 = vpack.i.bf16 %v851_v45, %v849_v50 }
  0xa3   : > { %v3437_v20 = vunpack.i.h.bf16 %v3435_v37  ;;  %v3436_v18 = vunpack.i.l.bf16 %v3435_v37  ;;  %v3440_v22 = vpop.permute.xlu0 %3439  ;;  %v362_v30 = vsel %vm323_vm1, %v359_v39, %v361_v8  ;;  %v364_v31 = vsel %vm323_vm1, %v361_v8, %v363_v11  ;;  %v4844_v39 = vld [vmem:[%s4349_s19 + $0xb0] sm:$0xff] }
  0xa4   : > { %v3442_v4 = vunpack.i.h.bf16 %v3440_v22  ;;  %v3441_v54 = vunpack.i.l.bf16 %v3440_v22  ;;  %3724 = vrot.lane.b32.xlu1 %v3723_v49, %s4231_s8  ;;  %3220 = vmatmul.mubr.msk.bf16.vlgmr.msra.gmra.mrb[0].mxu0 %vm1302_vm15, %v1271_v19  ;;  %v467_v40 = vsel %vm428_vm3, %v464_v41, %v466_v6  ;;  %v469_v43 = vsel %vm428_vm3, %v466_v6, %v468_v9 }
  0xa5   : > { %v1120_v2 = vsel %vm1117_vm8, %v1098_v17, %v3436_v18  ;;  %v1121_v24 = vsel %vm1117_vm8, %v1099_v14, %v3437_v20  ;;  %3729 = vrot.lane.b32.xlu0 %v3728_v58, %s4228_s20  ;;  %3223 = vmatprep.mubr.msk.bf16.mxu0 %vm4236_vm6, %v4227_v1  ;;  %v3748_v48 = vpack.i.bf16 %v364_v31, %v362_v30  ;;  %v852_v52 = vrot.slane %v4844_v39, 4 }
  0xa6   : > { %v3445_v29 = vpop.permute.xlu1 %3444  ;;  %v1142_v42 = vsel %vm1139_vm9, %v1120_v2, %v3441_v54  ;;  %v1143_v44 = vsel %vm1139_vm9, %v1121_v24, %v3442_v4  ;;  %v3753_v50 = vpack.i.bf16 %v469_v43, %v467_v40  ;;  %v681_v51 = vsel %vm642_vm2, %v678_v60, %v680_v32  ;;  %v4147_v24 = vld [vmem:[%s4349_s19 + $0x20] sm:$0xff] }
  0xa7   : > { %v3447_v36 = vunpack.i.h.bf16 %v3445_v29  ;;  %v3446_v58 = vunpack.i.l.bf16 %v3445_v29  ;;  %v3450_v23 = vpop.permute.xlu0 %3449  ;;  %v683_v56 = vsel %vm642_vm2, %v680_v32, %v682_v34  ;;  %v854_v57 = vrot.slane %v4850_v47, 4 }
  0xa8   : > { %v3452_v38 = vunpack.i.h.bf16 %v3450_v23  ;;  %v3451_v46 = vunpack.i.l.bf16 %v3450_v23  ;;  %3734 = vrot.lane.b32.xlu1 %v3733_v3, %s4233_s13  ;;  %v959_v5 = vrot.slane %v4844_v39, 5  ;;  %v3763_v10 = vpack.i.bf16 %v683_v56, %v681_v51 }
  0xa9   : > { %v1164_v25 = vsel %vm1161_vm10, %v1142_v42, %v3446_v58  ;;  %v1165_v41 = vsel %vm1161_vm10, %v1143_v44, %v3447_v36  ;;  %3739 = vrot.lane.b32.xlu0 %v3738_v21, %s4234_s14  ;;  %v853_v35 = vsel %vm814_vm4, %v850_v13, %v852_v52  ;;  %v961_v12 = vrot.slane %v4850_v47, 5  ;;  %v4146_v21 = vld [vmem:[%s4349_s19 + $0x28] sm:$0xff] }
  0xaa   : > { %v3455_v49 = vpop.permute.xlu1 %3454  ;;  %v1186_v59 = vsel %vm1183_vm11, %v1164_v25, %v3451_v46  ;;  %v1187_v63 = vsel %vm1183_vm11, %v1165_v41, %v3452_v38  ;;  %v577_v16 = vrot.slane %v4844_v39, 6  ;;  %v855_v37 = vsel %vm814_vm4, %v852_v52, %v854_v57 }
  0xab   : > { %v3457_v53 = vunpack.i.h.bf16 %v3455_v49  ;;  %v3456_v45 = vunpack.i.l.bf16 %v3455_v49  ;;  %v3460_v55 = vpop.permute.xlu0 %3459  ;;  %v1028_v19 = vrot.slane %v4850_v47, 6  ;;  %v3768_v54 = vpack.i.bf16 %v4737_v62, %v4734_v61 }
  0xac   : > { %v3462_v33 = vunpack.i.h.bf16 %v3460_v55  ;;  %v3461_v0 = vunpack.i.l.bf16 %v3460_v55  ;;  %3744 = vrot.lane.b32.xlu1 %v3743_v27, %s4235_s15  ;;  %v960_v3 = vsel %vm921_vm5, %v957_v15, %v959_v5  ;;  %v962_v32 = vsel %vm921_vm5, %v959_v5, %v961_v12 }
  0xad   : > { %v1208_v28 = vsel %vm1205_vm12, %v1186_v59, %v3456_v45  ;;  %v1209_v60 = vsel %vm1205_vm12, %v1187_v63, %v3457_v53  ;;  %3749 = vrot.lane.b32.xlu0 %v3748_v48, %s4230_s22  ;;  %v3773_v23 = vpack.i.bf16 %v855_v37, %v853_v35  ;;  %v578_v15 = vsel %vm535_vm0, %v575_v26, %v577_v16 }
  0xae   : > { %v3465_v7 = vpop.permute.xlu1 %3464  ;;  %v1230_v20 = vsel %vm1227_vm13, %v1208_v28, %v3461_v0  ;;  %v1231_v18 = vsel %vm1227_vm13, %v1209_v60, %v3462_v33  ;;  %v1029_v42 = vsel %vm535_vm0, %v577_v16, %v1028_v19  ;;  %v3778_v46 = vpack.i.bf16 %v962_v32, %v960_v3  ;;  %v4148_v3 = vld [vmem:[%s4349_s19 + $0x38] sm:$0xff] }
  0xaf   : > { %v3467_v8 = vunpack.i.h.bf16 %v3465_v7  ;;  %v3466_v14 = vunpack.i.l.bf16 %v3465_v7  ;;  %v3470_v17 = vpop.permute.xlu0 %3469  ;;  %v684_v35 = vrot.slane %v4844_v39, 7 }
  0xb0   : > { %v3472_v13 = vunpack.i.h.bf16 %v3470_v17  ;;  %v3471_v22 = vunpack.i.l.bf16 %v3470_v17  ;;  %3754 = vrot.lane.b32.xlu1 %v3753_v50, %s4232_s9  ;;  %v3783_v50 = vpack.i.bf16 %v1029_v42, %v578_v15 }
  0xb1   : > { %v1252_v6 = vsel %vm1249_vm14, %v1230_v20, %v3466_v14  ;;  %v1253_v4 = vsel %vm1249_vm14, %v1231_v18, %v3467_v8  ;;  %3759 = vrot.lane.b32.xlu0 %v3743_v27, %s4229_s21  ;;  %v301_v8 = vld [vmem:[%s4349_s19 + $0xc0] sm:$0xf] }
  0xb2   : > { %v1101_v2 = vsel %vm1095_vm7, %v4146_v21, %v3472_v13  ;;  %v1100_v29 = vsel %vm1095_vm7, %v4147_v24, %v3471_v22  ;;  %v3475_v30 = vpop.permute.xlu1 %3474  ;;  %v1272_v31 = vpack.c.bf16 %v1253_v4, %v1252_v6  ;;  %v685_v4 = vsel %vm642_vm2, %v682_v34, %v684_v35 }
  0xb3   : > { %v3477_v27 = vunpack.i.h.bf16 %v3475_v30  ;;  %v3476_v36 = vunpack.i.l.bf16 %v3475_v30  ;;  %v3480_v58 = vpop.permute.xlu0 %3479  ;;  %vm1947_vm2 = vcmask 1044480  }
  0xb4   : > { %v3482_v40 = vunpack.i.h.bf16 %v3480_v58  ;;  %v3481_v43 = vunpack.i.l.bf16 %v3480_v58  ;;  %3764 = vrot.lane.b32.xlu1 %v3763_v10, %s4231_s8  ;;  %3224 = vmatmul.mubr.msk.bf16.gmra.mrb[4].mxu0 %vm1302_vm15, %v1272_v31 }
  0xb5   : > { %v1122_v44 = vsel %vm1117_vm8, %v1100_v29, %v3476_v36  ;;  %v1123_v38 = vsel %vm1117_vm8, %v1101_v2, %v3477_v27  ;;  %3769 = vrot.lane.b32.xlu0 %v3768_v54, %s4228_s20  ;;  %3227 = vmatprep.mubr.msk.bf16.mxu0 %vm4236_vm6, %v4227_v1  ;;  %v856_v54 = vrot.slane %v301_v8, 4  ;;  %v4149_v2 = vld [vmem:[%s4349_s19 + $0x30] sm:$0xff] }
  0xb6   : > { %v3485_v25 = vpop.permute.xlu1 %3484  ;;  %v1144_v26 = vsel %vm1139_vm9, %v1122_v44, %v3481_v43  ;;  %v1145_v51 = vsel %vm1139_vm9, %v1123_v38, %v3482_v40 }
  0xb7   : > { %v3487_v41 = vunpack.i.h.bf16 %v3485_v25  ;;  %v3486_v48 = vunpack.i.l.bf16 %v3485_v25  ;;  %v3490_v49 = vpop.permute.xlu0 %3489  ;;  %v857_v58 = vsel %vm814_vm4, %v854_v57, %v856_v54 }
  0xb8   : > { %v3492_v52 = vunpack.i.h.bf16 %v3490_v49  ;;  %v3491_v53 = vunpack.i.l.bf16 %v3490_v49  ;;  %3774 = vrot.lane.b32.xlu1 %v3773_v23, %s4233_s13  ;;  %v1030_v23 = vrot.slane %v301_v8, 6 }
  0xb9   : > { %v1166_v45 = vsel %vm1161_vm10, %v1144_v26, %v3486_v48  ;;  %v1167_v55 = vsel %vm1161_vm10, %v1145_v51, %v3487_v41  ;;  %3779 = vrot.lane.b32.xlu0 %v3778_v46, %s4234_s14 }
  0xba   : > { %v3495_v56 = vpop.permute.xlu1 %3494  ;;  %v1188_v0 = vsel %vm1183_vm11, %v1166_v45, %v3491_v53  ;;  %v1189_v28 = vsel %vm1183_vm11, %v1167_v55, %v3492_v52 }
  0xbb   : > { %v3497_v59 = vunpack.i.h.bf16 %v3495_v56  ;;  %v3496_v63 = vunpack.i.l.bf16 %v3495_v56  ;;  %v3500_v33 = vpop.permute.xlu0 %3499 }
  0xbc   : > { %v3502_v60 = vunpack.i.h.bf16 %v3500_v33  ;;  %v3501_v5 = vunpack.i.l.bf16 %v3500_v33  ;;  %3784 = vrot.lane.b32.xlu1 %v3783_v50, %s4235_s15 }
  0xbd   : > { %v1210_v7 = vsel %vm1205_vm12, %v1188_v0, %v3496_v63  ;;  %v1211_v10 = vsel %vm1205_vm12, %v1189_v28, %v3497_v59  ;;  %405 = vrot.lane.b32.xlu0 %v363_v11, %s4230_s22 }
  0xbe   : > { %v3505_v16 = vpop.permute.xlu1 %3504  ;;  %v1232_v20 = vsel %vm1227_vm13, %v1210_v7, %v3501_v5  ;;  %v1233_v18 = vsel %vm1227_vm13, %v1211_v10, %v3502_v60  ;;  %v4150_v10 = vld [vmem:[%s4349_s19 + $0x48] sm:$0xff] }
  0xbf   : > { %v3507_v14 = vunpack.i.h.bf16 %v3505_v16  ;;  %v3506_v17 = vunpack.i.l.bf16 %v3505_v16  ;;  %v3510_v37 = vpop.permute.xlu0 %3509  ;;  %v4151_v16 = vld [vmem:[%s4349_s19 + $0x40] sm:$0xff] }
  0xc0   : > { %v3512_v13 = vunpack.i.h.bf16 %v3510_v37  ;;  %v3511_v22 = vunpack.i.l.bf16 %v3510_v37  ;;  %510 = vrot.lane.b32.xlu1 %v468_v9, %s4232_s9  ;;  %v963_v9 = vrot.slane %v301_v8, 5 }
  0xc1   : > { %v1254_v11 = vsel %vm1249_vm14, %v1232_v20, %v3506_v17  ;;  %v1255_v6 = vsel %vm1249_vm14, %v1233_v18, %v3507_v14  ;;  %619 = vrot.lane.b32.xlu0 %v578_v15, %s4229_s21 }
  0xc2   : > { %v1103_v21 = vsel %vm1095_vm7, %v4148_v3, %v3512_v13  ;;  %v1102_v24 = vsel %vm1095_vm7, %v4149_v2, %v3511_v22  ;;  %v3515_v29 = vpop.permute.xlu1 %3514  ;;  %v1273_v61 = vpack.c.bf16 %v1255_v6, %v1254_v11  ;;  %v964_v43 = vsel %vm921_vm5, %v961_v12, %v963_v9 }
  0xc3   : > { %v3517_v30 = vunpack.i.h.bf16 %v3515_v29  ;;  %v3516_v31 = vunpack.i.l.bf16 %v3515_v29  ;;  %v3520_v32 = vpop.permute.xlu0 %3519  ;;  %v1031_v12 = vsel %vm535_vm0, %v1028_v19, %v1030_v23  ;;  %vm2553_vm5 = vcmask 654336  }
  0xc4   : > { %v3522_v27 = vunpack.i.h.bf16 %v3520_v32  ;;  %v3521_v36 = vunpack.i.l.bf16 %v3520_v32  ;;  %726 = vrot.lane.b32.xlu1 %v685_v4, %s4231_s8  ;;  %3228 = vmatmul.mubr.msk.bf16.gmra.mrb[8].mxu0 %vm1302_vm15, %v1273_v61 }
  0xc5   : > { %v1124_v62 = vsel %vm1117_vm8, %v1102_v24, %v3516_v31  ;;  %v1125_v34 = vsel %vm1117_vm8, %v1103_v21, %v3517_v30  ;;  %789 = vrot.lane.b32.xlu0 %v4844_v39, %s4228_s20  ;;  %3231 = vmatprep.mubr.msk.bf16.mxu0 %vm4236_vm6, %v4227_v1 }
  0xc6   : > { %v3525_v40 = vpop.permute.xlu1 %3524  ;;  %v1146_v38 = vsel %vm1139_vm9, %v1124_v62, %v3521_v36  ;;  %v1147_v39 = vsel %vm1139_vm9, %v1125_v34, %v3522_v27 }
  0xc7   : > { %v3527_v15 = vunpack.i.h.bf16 %v3525_v40  ;;  %v3526_v42 = vunpack.i.l.bf16 %v3525_v40  ;;  %v3530_v44 = vpop.permute.xlu0 %3529 }
  0xc8   : > { %v3532_v46 = vunpack.i.h.bf16 %v3530_v44  ;;  %v3531_v25 = vunpack.i.l.bf16 %v3530_v44  ;;  %898 = vrot.lane.b32.xlu1 %v857_v58, %s4233_s13 }
  0xc9   : > { %v1168_v57 = vsel %vm1161_vm10, %v1146_v38, %v3526_v42  ;;  %v1169_v41 = vsel %vm1161_vm10, %v1147_v39, %v3527_v15  ;;  %1005 = vrot.lane.b32.xlu0 %v964_v43, %s4234_s14  ;;  %s4245_s14 = smov 72  }
  0xca   : > { %v3535_v48 = vpop.permute.xlu1 %3534  ;;  %v1190_v51 = vsel %vm1183_vm11, %v1168_v57, %v3531_v25  ;;  %v1191_v52 = vsel %vm1183_vm11, %v1169_v41, %v3532_v46 }
  0xcb   : > { %v3537_v49 = vunpack.i.h.bf16 %v3535_v48  ;;  %v3536_v50 = vunpack.i.l.bf16 %v3535_v48  ;;  %v3540_v26 = vpop.permute.xlu0 %3539  ;;  %v4152_v48 = vld [vmem:[%s4349_s19 + $0x58] sm:$0xff] }
  0xcc   : > { %v3542_v53 = vunpack.i.h.bf16 %v3540_v26  ;;  %v3541_v45 = vunpack.i.l.bf16 %v3540_v26  ;;  %1072 = vrot.lane.b32.xlu1 %v1031_v12, %s4235_s15 }
  0xcd   : > { %v1212_v55 = vsel %vm1205_vm12, %v1190_v51, %v3536_v50  ;;  %v1213_v47 = vsel %vm1205_vm12, %v1191_v52, %v3537_v49  ;;  %v4153_v50 = vld [vmem:[%s4349_s19 + $0x50] sm:$0xff] }
  0xce   : > { %v3545_v56 = vpop.permute.xlu1 %3544  ;;  %v1234_v33 = vsel %vm1227_vm13, %v1212_v55, %v3541_v45  ;;  %v1235_v0 = vsel %vm1227_vm13, %v1213_v47, %v3542_v53 }
  0xcf   : > { %v3547_v19 = vunpack.i.h.bf16 %v3545_v56  ;;  %v3546_v59 = vunpack.i.l.bf16 %v3545_v56  ;;  %v3550_v63 = vpop.permute.xlu0 %3549 }
  0xd0   : > { %v3552_v28 = vunpack.i.h.bf16 %v3550_v63  ;;  %v3551_v60 = vunpack.i.l.bf16 %v3550_v63 }
  0xd1   : > { %v1256_v5 = vsel %vm1249_vm14, %v1234_v33, %v3546_v59  ;;  %v1257_v7 = vsel %vm1249_vm14, %v1235_v0, %v3547_v19 }
  0xd2   : > { %v1105_v35 = vsel %vm1095_vm7, %v4150_v10, %v3552_v28  ;;  %v1104_v8 = vsel %vm1095_vm7, %v4151_v16, %v3551_v60  ;;  %v3555_v14 = vpop.permute.xlu1 %3554  ;;  %v1274_v17 = vpack.c.bf16 %v1257_v7, %v1256_v5 }
  0xd3   : > { %v3557_v37 = vunpack.i.h.bf16 %v3555_v14  ;;  %v3556_v20 = vunpack.i.l.bf16 %v3555_v14  ;;  %v3560_v18 = vpop.permute.xlu0 %3559 }
  0xd4   : > { %v3562_v13 = vunpack.i.h.bf16 %v3560_v18  ;;  %v3561_v22 = vunpack.i.l.bf16 %v3560_v18  ;;  %3232 = vmatmul.mubr.msk.bf16.gmra.mrb[12].mxu0 %vm1302_vm15, %v1274_v17 }
  0xd5   : > { %v1126_v11 = vsel %vm1117_vm8, %v1104_v8, %v3556_v20  ;;  %v1127_v6 = vsel %vm1117_vm8, %v1105_v35, %v3557_v37  ;;  %3235 = vmatprep.mubr.msk.bf16.mxu0 %vm4236_vm6, %v4227_v1 }
  0xd6   : > { %v3565_v4 = vpop.permute.xlu1 %3564  ;;  %v1148_v2 = vsel %vm1139_vm9, %v1126_v11, %v3561_v22  ;;  %v1149_v24 = vsel %vm1139_vm9, %v1127_v6, %v3562_v13 }
  0xd7   : > { %v3567_v54 = vunpack.i.h.bf16 %v3565_v4  ;;  %v3566_v3 = vunpack.i.l.bf16 %v3565_v4  ;;  %v3570_v21 = vpop.permute.xlu0 %3569 }
  0xd8   : > { %v3572_v29 = vunpack.i.h.bf16 %v3570_v21  ;;  %v3571_v61 = vunpack.i.l.bf16 %v3570_v21 }
  0xd9   : > { %v1170_v9 = vsel %vm1161_vm10, %v1148_v2, %v3566_v3  ;;  %v1171_v30 = vsel %vm1161_vm10, %v1149_v24, %v3567_v54 }
  0xda   : > { %v3575_v31 = vpop.permute.xlu1 %3574  ;;  %v1192_v62 = vsel %vm1183_vm11, %v1170_v9, %v3571_v61  ;;  %v1193_v34 = vsel %vm1183_vm11, %v1171_v30, %v3572_v29 }
  0xdb   : > { %v3577_v32 = vunpack.i.h.bf16 %v3575_v31  ;;  %v3576_v27 = vunpack.i.l.bf16 %v3575_v31  ;;  %v3580_v36 = vpop.permute.xlu0 %3579  ;;  %v4154_v31 = vld [vmem:[%s4349_s19 + $0x68] sm:$0xff] }
  0xdc   : > { %v3582_v58 = vunpack.i.h.bf16 %v3580_v36  ;;  %v3581_v23 = vunpack.i.l.bf16 %v3580_v36 }
  0xdd   : > { %v1214_v40 = vsel %vm1205_vm12, %v1192_v62, %v3576_v27  ;;  %v1215_v43 = vsel %vm1205_vm12, %v1193_v34, %v3577_v32  ;;  %v4155_v27 = vld [vmem:[%s4349_s19 + $0x60] sm:$0xff] }
  0xde   : > { %v3585_v15 = vpop.permute.xlu1 %3584  ;;  %v1236_v39 = vsel %vm1227_vm13, %v1214_v40, %v3581_v23  ;;  %v1237_v46 = vsel %vm1227_vm13, %v1215_v43, %v3582_v58 }
  0xdf   : > { %v3587_v42 = vunpack.i.h.bf16 %v3585_v15  ;;  %v3586_v44 = vunpack.i.l.bf16 %v3585_v15  ;;  %v3590_v38 = vpop.permute.xlu0 %3589 }
  0xe0   : > { %v3592_v25 = vunpack.i.h.bf16 %v3590_v38  ;;  %v3591_v57 = vunpack.i.l.bf16 %v3590_v38 }
  0xe1   : > { %v1258_v41 = vsel %vm1249_vm14, %v1236_v39, %v3586_v44  ;;  %v1259_v12 = vsel %vm1249_vm14, %v1237_v46, %v3587_v42 }
  0xe2   : > { %v1107_v49 = vsel %vm1095_vm7, %v4152_v48, %v3592_v25  ;;  %v1106_v26 = vsel %vm1095_vm7, %v4153_v50, %v3591_v57  ;;  %v3595_v51 = vpop.permute.xlu1 %3594  ;;  %v1275_v52 = vpack.c.bf16 %v1259_v12, %v1258_v41 }
  0xe3   : > { %v3597_v53 = vunpack.i.h.bf16 %v3595_v51  ;;  %v3596_v45 = vunpack.i.l.bf16 %v3595_v51  ;;  %v3600_v55 = vpop.permute.xlu0 %3599 }
  0xe4   : > { %v3602_v47 = vunpack.i.h.bf16 %v3600_v55  ;;  %v3601_v56 = vunpack.i.l.bf16 %v3600_v55  ;;  %3236 = vmatmul.mubr.msk.bf16.gmra.mrb[16].mxu0 %vm1302_vm15, %v1275_v52 }
  0xe5   : > { %v1128_v19 = vsel %vm1117_vm8, %v1106_v26, %v3596_v45  ;;  %v1129_v59 = vsel %vm1117_vm8, %v1107_v49, %v3597_v53  ;;  %3239 = vmatprep.mubr.msk.bf16.mxu0 %vm4236_vm6, %v4227_v1 }
  0xe6   : > { %v3605_v63 = vpop.permute.xlu1 %3604  ;;  %v1150_v60 = vsel %vm1139_vm9, %v1128_v19, %v3601_v56  ;;  %v1151_v5 = vsel %vm1139_vm9, %v1129_v59, %v3602_v47 }
  0xe7   : > { %v3607_v33 = vunpack.i.h.bf16 %v3605_v63  ;;  %v3606_v0 = vunpack.i.l.bf16 %v3605_v63  ;;  %v3610_v28 = vpop.permute.xlu0 %3609 }
  0xe8   : > { %v3612_v7 = vunpack.i.h.bf16 %v3610_v28  ;;  %v3611_v10 = vunpack.i.l.bf16 %v3610_v28 }
  0xe9   : > { %v1172_v35 = vsel %vm1161_vm10, %v1150_v60, %v3606_v0  ;;  %v1173_v16 = vsel %vm1161_vm10, %v1151_v5, %v3607_v33 }
  0xea   : > { %v3615_v8 = vpop.permute.xlu1 %3614  ;;  %v1194_v20 = vsel %vm1183_vm11, %v1172_v35, %v3611_v10  ;;  %v1195_v18 = vsel %vm1183_vm11, %v1173_v16, %v3612_v7 }
  0xeb   : > { %v3617_v14 = vunpack.i.h.bf16 %v3615_v8  ;;  %v3616_v17 = vunpack.i.l.bf16 %v3615_v8  ;;  %v3620_v37 = vpop.permute.xlu0 %3619  ;;  %v4156_v8 = vld [vmem:[%s4349_s19 + $0x78] sm:$0xff] }
  0xec   : > { %v3622_v13 = vunpack.i.h.bf16 %v3620_v37  ;;  %v3621_v22 = vunpack.i.l.bf16 %v3620_v37 }
  0xed   : > { %v1216_v11 = vsel %vm1205_vm12, %v1194_v20, %v3616_v17  ;;  %v1217_v6 = vsel %vm1205_vm12, %v1195_v18, %v3617_v14  ;;  %v4157_v17 = vld [vmem:[%s4349_s19 + $0x70] sm:$0xff] }
  0xee   : > { %v3625_v4 = vpop.permute.xlu1 %3624  ;;  %v1238_v2 = vsel %vm1227_vm13, %v1216_v11, %v3621_v22  ;;  %v1239_v24 = vsel %vm1227_vm13, %v1217_v6, %v3622_v13 }
  0xef   : > { %v3627_v54 = vunpack.i.h.bf16 %v3625_v4  ;;  %v3626_v3 = vunpack.i.l.bf16 %v3625_v4  ;;  %v3630_v21 = vpop.permute.xlu0 %3629 }
  0xf0   : > { %v3632_v29 = vunpack.i.h.bf16 %v3630_v21  ;;  %v3631_v61 = vunpack.i.l.bf16 %v3630_v21 }
  0xf1   : > { %v1260_v9 = vsel %vm1249_vm14, %v1238_v2, %v3626_v3  ;;  %v1261_v30 = vsel %vm1249_vm14, %v1239_v24, %v3627_v54 }
  0xf2   : > { %v1109_v32 = vsel %vm1095_vm7, %v4154_v31, %v3632_v29  ;;  %v1108_v36 = vsel %vm1095_vm7, %v4155_v27, %v3631_v61  ;;  %v3635_v62 = vpop.permute.xlu1 %3634  ;;  %v1276_v34 = vpack.c.bf16 %v1261_v30, %v1260_v9 }
  0xf3   : > { %v3637_v58 = vunpack.i.h.bf16 %v3635_v62  ;;  %v3636_v23 = vunpack.i.l.bf16 %v3635_v62  ;;  %v3640_v40 = vpop.permute.xlu0 %3639 }
  0xf4   : > { %v3642_v43 = vunpack.i.h.bf16 %v3640_v40  ;;  %v3641_v15 = vunpack.i.l.bf16 %v3640_v40  ;;  %3240 = vmatmul.mubr.msk.bf16.gmra.mrb[20].mxu0 %vm1302_vm15, %v1276_v34 }
  0xf5   : > { %v1130_v42 = vsel %vm1117_vm8, %v1108_v36, %v3636_v23  ;;  %v1131_v44 = vsel %vm1117_vm8, %v1109_v32, %v3637_v58  ;;  %3243 = vmatprep.mubr.msk.bf16.mxu0 %vm4236_vm6, %v4227_v1 }
  0xf6   : > { %v3645_v38 = vpop.permute.xlu1 %3644  ;;  %v1152_v57 = vsel %vm1139_vm9, %v1130_v42, %v3641_v15  ;;  %v1153_v41 = vsel %vm1139_vm9, %v1131_v44, %v3642_v43 }
  0xf7   : > { %v3647_v39 = vunpack.i.h.bf16 %v3645_v38  ;;  %v3646_v46 = vunpack.i.l.bf16 %v3645_v38  ;;  %v3650_v25 = vpop.permute.xlu0 %3649 }
  0xf8   : > { %v3652_v12 = vunpack.i.h.bf16 %v3650_v25  ;;  %v3651_v48 = vunpack.i.l.bf16 %v3650_v25 }
  0xf9   : > { %v1174_v49 = vsel %vm1161_vm10, %v1152_v57, %v3646_v46  ;;  %v1175_v50 = vsel %vm1161_vm10, %v1153_v41, %v3647_v39 }
  0xfa   : > { %v3655_v26 = vpop.permute.xlu1 %3654  ;;  %v1196_v45 = vsel %vm1183_vm11, %v1174_v49, %v3651_v48  ;;  %v1197_v55 = vsel %vm1183_vm11, %v1175_v50, %v3652_v12 }
  0xfb   : > { %v3657_v51 = vunpack.i.h.bf16 %v3655_v26  ;;  %v3656_v52 = vunpack.i.l.bf16 %v3655_v26  ;;  %v3660_v53 = vpop.permute.xlu0 %3659  ;;  %v4158_v26 = vld [vmem:[%s4349_s19 + $0x88] sm:$0xff] }
  0xfc   : > { %v3662_v47 = vunpack.i.h.bf16 %v3660_v53  ;;  %v3661_v56 = vunpack.i.l.bf16 %v3660_v53 }
  0xfd   : > { %v1218_v19 = vsel %vm1205_vm12, %v1196_v45, %v3656_v52  ;;  %v1219_v59 = vsel %vm1205_vm12, %v1197_v55, %v3657_v51  ;;  %v4159_v52 = vld [vmem:[%s4349_s19 + $0x80] sm:$0xff] }
  0xfe   : > { %v3665_v63 = vpop.permute.xlu1 %3664  ;;  %v1240_v60 = vsel %vm1227_vm13, %v1218_v19, %v3661_v56  ;;  %v1241_v5 = vsel %vm1227_vm13, %v1219_v59, %v3662_v47 }
  0xff   : > { %v3667_v33 = vunpack.i.h.bf16 %v3665_v63  ;;  %v3666_v0 = vunpack.i.l.bf16 %v3665_v63  ;;  %v3670_v28 = vpop.permute.xlu0 %3669 }
 0x100   : > { %v3672_v7 = vunpack.i.h.bf16 %v3670_v28  ;;  %v3671_v10 = vunpack.i.l.bf16 %v3670_v28 }
 0x101   : > { %v1262_v35 = vsel %vm1249_vm14, %v1240_v60, %v3666_v0  ;;  %v1263_v16 = vsel %vm1249_vm14, %v1241_v5, %v3667_v33 }
 0x102   : > { %v1111_v14 = vsel %vm1095_vm7, %v4156_v8, %v3672_v7  ;;  %v1110_v37 = vsel %vm1095_vm7, %v4157_v17, %v3671_v10  ;;  %v3675_v20 = vpop.permute.xlu1 %3674  ;;  %v1277_v18 = vpack.c.bf16 %v1263_v16, %v1262_v35 }
 0x103   : > { %v3677_v13 = vunpack.i.h.bf16 %v3675_v20  ;;  %v3676_v22 = vunpack.i.l.bf16 %v3675_v20  ;;  %v3680_v11 = vpop.permute.xlu0 %3679 }
 0x104   : > { %v3682_v6 = vunpack.i.h.bf16 %v3680_v11  ;;  %v3681_v4 = vunpack.i.l.bf16 %v3680_v11  ;;  %3244 = vmatmul.mubr.msk.bf16.gmra.mrb[24].mxu0 %vm1302_vm15, %v1277_v18 }
 0x105   : > { %v1132_v54 = vsel %vm1117_vm8, %v1110_v37, %v3676_v22  ;;  %v1133_v3 = vsel %vm1117_vm8, %v1111_v14, %v3677_v13  ;;  %3247 = vmatprep.mubr.msk.bf16.mxu0 %vm4236_vm6, %v4227_v1 }
 0x106   : > { %v3685_v21 = vpop.permute.xlu1 %3684  ;;  %v1154_v61 = vsel %vm1139_vm9, %v1132_v54, %v3681_v4  ;;  %v1155_v9 = vsel %vm1139_vm9, %v1133_v3, %v3682_v6 }
 0x107   : > { %v3687_v2 = vunpack.i.h.bf16 %v3685_v21  ;;  %v3686_v24 = vunpack.i.l.bf16 %v3685_v21  ;;  %v3690_v29 = vpop.permute.xlu0 %3689 }
 0x108   : > { %v3692_v30 = vunpack.i.h.bf16 %v3690_v29  ;;  %v3691_v31 = vunpack.i.l.bf16 %v3690_v29 }
 0x109   : > { %v1176_v32 = vsel %vm1161_vm10, %v1154_v61, %v3686_v24  ;;  %v1177_v27 = vsel %vm1161_vm10, %v1155_v9, %v3687_v2 }
 0x10a   : > { %v3695_v36 = vpop.permute.xlu1 %3694  ;;  %v1198_v23 = vsel %vm1183_vm11, %v1176_v32, %v3691_v31  ;;  %v1199_v40 = vsel %vm1183_vm11, %v1177_v27, %v3692_v30 }
 0x10b   : > { %v3697_v62 = vunpack.i.h.bf16 %v3695_v36  ;;  %v3696_v34 = vunpack.i.l.bf16 %v3695_v36  ;;  %v3700_v58 = vpop.permute.xlu0 %3699  ;;  %v4160_v36 = vld [vmem:[%s4349_s19 + $0x98] sm:$0xff] }
 0x10c   : > { %v3702_v43 = vunpack.i.h.bf16 %v3700_v58  ;;  %v3701_v15 = vunpack.i.l.bf16 %v3700_v58 }
 0x10d   : > { %v1220_v42 = vsel %vm1205_vm12, %v1198_v23, %v3696_v34  ;;  %v1221_v44 = vsel %vm1205_vm12, %v1199_v40, %v3697_v62  ;;  %v4161_v34 = vld [vmem:[%s4349_s19 + $0x90] sm:$0xff] }
 0x10e   : > { %v3705_v38 = vpop.permute.xlu1 %3704  ;;  %v1242_v57 = vsel %vm1227_vm13, %v1220_v42, %v3701_v15  ;;  %v1243_v41 = vsel %vm1227_vm13, %v1221_v44, %v3702_v43 }
 0x10f   : > { %v3707_v39 = vunpack.i.h.bf16 %v3705_v38  ;;  %v3706_v46 = vunpack.i.l.bf16 %v3705_v38  ;;  %v3710_v25 = vpop.permute.xlu0 %3709 }
 0x110   : > { %v3712_v12 = vunpack.i.h.bf16 %v3710_v25  ;;  %v3711_v48 = vunpack.i.l.bf16 %v3710_v25 }
 0x111   : > { %v1264_v49 = vsel %vm1249_vm14, %v1242_v57, %v3706_v46  ;;  %v1265_v50 = vsel %vm1249_vm14, %v1243_v41, %v3707_v39 }
 0x112   : > { %v1113_v51 = vsel %vm1095_vm7, %v4158_v26, %v3712_v12  ;;  %v1112_v53 = vsel %vm1095_vm7, %v4159_v52, %v3711_v48  ;;  %v3715_v45 = vpop.permute.xlu1 %3714  ;;  %v1278_v55 = vpack.c.bf16 %v1265_v50, %v1264_v49 }
 0x113   : > { %v3717_v47 = vunpack.i.h.bf16 %v3715_v45  ;;  %v3716_v56 = vunpack.i.l.bf16 %v3715_v45  ;;  %v3720_v19 = vpop.permute.xlu0 %3719 }
 0x114   : > { %v3722_v59 = vunpack.i.h.bf16 %v3720_v19  ;;  %v3721_v63 = vunpack.i.l.bf16 %v3720_v19  ;;  %3248 = vmatmul.mubr.msk.bf16.gmra.mrb[28].mxu0 %vm1302_vm15, %v1278_v55 }
 0x115   : > { %v1134_v33 = vsel %vm1117_vm8, %v1112_v53, %v3716_v56  ;;  %v1135_v0 = vsel %vm1117_vm8, %v1113_v51, %v3717_v47  ;;  %3251 = vmatprep.mubr.msk.bf16.mxu0 %vm4236_vm6, %v4227_v1 }
 0x116   : > { %v3725_v28 = vpop.permute.xlu1 %3724  ;;  %v1156_v10 = vsel %vm1139_vm9, %v1134_v33, %v3721_v63  ;;  %v1157_v35 = vsel %vm1139_vm9, %v1135_v0, %v3722_v59 }
 0x117   : > { %v3727_v60 = vunpack.i.h.bf16 %v3725_v28  ;;  %v3726_v5 = vunpack.i.l.bf16 %v3725_v28  ;;  %v3730_v7 = vpop.permute.xlu0 %3729 }
 0x118   : > { %v3732_v16 = vunpack.i.h.bf16 %v3730_v7  ;;  %v3731_v8 = vunpack.i.l.bf16 %v3730_v7 }
 0x119   : > { %v1178_v14 = vsel %vm1161_vm10, %v1156_v10, %v3726_v5  ;;  %v1179_v17 = vsel %vm1161_vm10, %v1157_v35, %v3727_v60 }
 0x11a   : > { %v3735_v37 = vpop.permute.xlu1 %3734  ;;  %v1200_v22 = vsel %vm1183_vm11, %v1178_v14, %v3731_v8  ;;  %v1201_v11 = vsel %vm1183_vm11, %v1179_v17, %v3732_v16  ;;  %v4162_v16 = vld [vmem:[%s4349_s19 + $0xa0] sm:$0xff]  ;;  %s4238_s19 = smov 120  }
 0x11b   : > { %v3737_v20 = vunpack.i.h.bf16 %v3735_v37  ;;  %v3736_v18 = vunpack.i.l.bf16 %v3735_v37  ;;  %v3740_v13 = vpop.permute.xlu0 %3739 }
 0x11c   : > { %v3742_v6 = vunpack.i.h.bf16 %v3740_v13  ;;  %v3741_v4 = vunpack.i.l.bf16 %v3740_v13 }
 0x11d   : > { %v1222_v54 = vsel %vm1205_vm12, %v1200_v22, %v3736_v18  ;;  %v1223_v3 = vsel %vm1205_vm12, %v1201_v11, %v3737_v20 }
 0x11e   : > { %v3745_v21 = vpop.permute.xlu1 %3744  ;;  %v1244_v61 = vsel %vm1227_vm13, %v1222_v54, %v3741_v4  ;;  %v1245_v9 = vsel %vm1227_vm13, %v1223_v3, %v3742_v6 }
 0x11f   : > { %v3747_v2 = vunpack.i.h.bf16 %v3745_v21  ;;  %v3746_v24 = vunpack.i.l.bf16 %v3745_v21  ;;  %v3750_v29 = vpop.permute.xlu0 %3749 }
 0x120   : > { %v3752_v30 = vunpack.i.h.bf16 %v3750_v29  ;;  %v3751_v31 = vunpack.i.l.bf16 %v3750_v29 }
 0x121   : > { %v1266_v32 = vsel %vm1249_vm14, %v1244_v61, %v3746_v24  ;;  %v1267_v27 = vsel %vm1249_vm14, %v1245_v9, %v3747_v2 }
 0x122   : > { %v1115_v62 = vsel %vm1095_vm7, %v4160_v36, %v3752_v30  ;;  %v1114_v58 = vsel %vm1095_vm7, %v4161_v34, %v3751_v31  ;;  %v3755_v23 = vpop.permute.xlu1 %3754  ;;  %v1279_v40 = vpack.c.bf16 %v1267_v27, %v1266_v32 }
 0x123   : > { %v3757_v43 = vunpack.i.h.bf16 %v3755_v23  ;;  %v3756_v15 = vunpack.i.l.bf16 %v3755_v23  ;;  %v3760_v42 = vpop.permute.xlu0 %3759 }
 0x124   : > { %v3762_v44 = vunpack.i.h.bf16 %v3760_v42  ;;  %v3761_v38 = vunpack.i.l.bf16 %v3760_v42  ;;  %3252 = vmatmul.mubr.msk.bf16.gmra.mrb[32].mxu0 %vm1302_vm15, %v1279_v40 }
 0x125   : > { %v1136_v39 = vsel %vm1117_vm8, %v1114_v58, %v3756_v15  ;;  %v1137_v46 = vsel %vm1117_vm8, %v1115_v62, %v3757_v43  ;;  %3255 = vmatprep.mubr.msk.bf16.mxu0 %vm4236_vm6, %v4227_v1 }
 0x126   : > { %v3765_v25 = vpop.permute.xlu1 %3764  ;;  %v1158_v48 = vsel %vm1139_vm9, %v1136_v39, %v3761_v38  ;;  %v1159_v49 = vsel %vm1139_vm9, %v1137_v46, %v3762_v44 }
 0x127   : > { %v3767_v57 = vunpack.i.h.bf16 %v3765_v25  ;;  %v3766_v41 = vunpack.i.l.bf16 %v3765_v25  ;;  %v3770_v12 = vpop.permute.xlu0 %3769 }
 0x128   : > { %v3772_v50 = vunpack.i.h.bf16 %v3770_v12  ;;  %v3771_v26 = vunpack.i.l.bf16 %v3770_v12 }
 0x129   : > { %v1180_v51 = vsel %vm1161_vm10, %v1158_v48, %v3766_v41  ;;  %v1181_v52 = vsel %vm1161_vm10, %v1159_v49, %v3767_v57 }
 0x12a   : > { %v3775_v53 = vpop.permute.xlu1 %3774  ;;  %v1202_v56 = vsel %vm1183_vm11, %v1180_v51, %v3771_v26  ;;  %v1203_v19 = vsel %vm1183_vm11, %v1181_v52, %v3772_v50 }
 0x12b   : > { %v3777_v45 = vunpack.i.h.bf16 %v3775_v53  ;;  %v3776_v55 = vunpack.i.l.bf16 %v3775_v53  ;;  %v3780_v47 = vpop.permute.xlu0 %3779 }
 0x12c   : > { %v3782_v59 = vunpack.i.h.bf16 %v3780_v47  ;;  %v3781_v63 = vunpack.i.l.bf16 %v3780_v47 }
 0x12d   : > { %v1224_v33 = vsel %vm1205_vm12, %v1202_v56, %v3776_v55  ;;  %v1225_v0 = vsel %vm1205_vm12, %v1203_v19, %v3777_v45 }
 0x12e   : > { %v3785_v28 = vpop.permute.xlu1 %3784  ;;  %v1246_v10 = vsel %vm1227_vm13, %v1224_v33, %v3781_v63  ;;  %v1247_v35 = vsel %vm1227_vm13, %v1225_v0, %v3782_v59 }
 0x12f   : > { %v3787_v60 = vunpack.i.h.bf16 %v3785_v28  ;;  %v3786_v5 = vunpack.i.l.bf16 %v3785_v28  ;;  %v406_v7 = vpop.permute.xlu0 %405 }
 0x130   : > { %v1116_v8 = vsel %vm1095_vm7, %v4162_v16, %v406_v7 }
 0x131   : > { %v1268_v14 = vsel %vm1249_vm14, %v1246_v10, %v3786_v5  ;;  %v1269_v17 = vsel %vm1249_vm14, %v1247_v35, %v3787_v60 }
 0x132   : > { %v511_v37 = vpop.permute.xlu1 %510  ;;  %v1280_v20 = vpack.c.bf16 %v1269_v17, %v1268_v14 }
 0x133   : > { %v1138_v18 = vsel %vm1117_vm8, %v1116_v8, %v511_v37  ;;  %v620_v13 = vpop.permute.xlu0 %619 }
 0x134   : > { %3256 = vmatmul.mubr.msk.bf16.gmra.mrb[36].mxu0 %vm1302_vm15, %v1280_v20  ;;  %v1160_v22 = vsel %vm1139_vm9, %v1138_v18, %v620_v13 }
 0x135   : > { %3259 = vmatprep.mubr.msk.bf16.mxu0 %vm4236_vm6, %v4227_v1 }
 0x136   : > { %v727_v11 = vpop.permute.xlu1 %726 }
 0x137   : > { %v1182_v6 = vsel %vm1161_vm10, %v1160_v22, %v727_v11  ;;  %v790_v4 = vpop.permute.xlu0 %789 }
 0x138   : > { %v1204_v54 = vsel %vm1183_vm11, %v1182_v6, %v790_v4 }
 0x13a   : > { %v899_v3 = vpop.permute.xlu1 %898 }
 0x13b   : > { %v1226_v21 = vsel %vm1205_vm12, %v1204_v54, %v899_v3  ;;  %v1006_v2 = vpop.permute.xlu0 %1005 }
 0x13c   : > { %v1248_v24 = vsel %vm1227_vm13, %v1226_v21, %v1006_v2  ;;  %vm2952_vm13 = vcmask 982016  }
 0x13e   : > { %v1073_v29 = vpop.permute.xlu1 %1072 }
 0x13f   : > { %v1270_v61 = vsel %vm1249_vm14, %v1248_v24, %v1073_v29 }
 0x140   : > { %v1281_v9 = vpack.c.bf16 %v1270_v61, %v1270_v61 }
 0x142   : > { %3260 = vmatmul.mubr.msk.bf16.gmra.mrb[40].mxu0 %vm1302_vm15, %v1281_v9 }
 0x177   : > { %v5112_v30 = vpop.f32.mrb[0].mxu0 }
 0x178   : > { %v3221_v31 = vpop.f32.mrb[1].mxu0 }
 0x179   : > { %v1376_v32 = vpop.f32.mrb[2].mxu0 }
 0x17a   : > { %1482 = vrot.lane.b32.xlu0 %v1376_v32, %s4237_s18  ;;  %v3222_v27 = vpop.f32.mrb[3].mxu0 }
 0x187   : > { %v5115_v36 = vpop.f32.mrb[4].mxu0 }
 0x188   : > { %1484 = vrot.lane.b32.xlu1 %v5115_v36, %s4237_s18  ;;  %v3225_v62 = vpop.f32.mrb[5].mxu0 }
 0x189   : > { %v1384_v34 = vpop.f32.mrb[6].mxu0 }
 0x18a   : > { %1486 = vrot.lane.b32.xlu0 %v1384_v34, %s4237_s18  ;;  %v3226_v58 = vpop.f32.mrb[7].mxu0 }
 0x197   : > { %v5120_v23 = vpop.f32.mrb[8].mxu0 }
 0x198   : > { %1488 = vrot.lane.b32.xlu1 %v5120_v23, %s4237_s18  ;;  %v3229_v40 = vpop.f32.mrb[9].mxu0 }
 0x199   : > { %v5124_v43 = vpop.f32.mrb[10].mxu0 }
 0x19a   : > { %1490 = vrot.lane.b32.xlu0 %v5124_v43, %s4237_s18  ;;  %v3230_v15 = vpop.f32.mrb[11].mxu0 }
 0x1a7   : > { %v1397_v42 = vpop.f32.mrb[12].mxu0 }
 0x1a8   : > { %1492 = vrot.lane.b32.xlu1 %v1397_v42, %s4237_s18  ;;  %v3233_v44 = vpop.f32.mrb[13].mxu0 }
 0x1a9   : > { %v5129_v38 = vpop.f32.mrb[14].mxu0 }
 0x1aa   : > { %1494 = vrot.lane.b32.xlu0 %v5129_v38, %s4237_s18  ;;  %v3234_v39 = vpop.f32.mrb[15].mxu0 }
 0x1b7   : > { %v5133_v46 = vpop.f32.mrb[16].mxu0 }
 0x1b8   : > { %1496 = vrot.lane.b32.xlu1 %v5133_v46, %s4237_s18  ;;  %v3237_v25 = vpop.f32.mrb[17].mxu0 }
 0x1b9   : > { %v5137_v57 = vpop.f32.mrb[18].mxu0 }
 0x1ba   : > { %1498 = vrot.lane.b32.xlu0 %v5137_v57, %s4237_s18  ;;  %v3238_v41 = vpop.f32.mrb[19].mxu0 }
 0x1c7   : > { %v5141_v12 = vpop.f32.mrb[20].mxu0 }
 0x1c8   : > { %1500 = vrot.lane.b32.xlu1 %v5141_v12, %s4237_s18  ;;  %v3241_v48 = vpop.f32.mrb[21].mxu0 }
 0x1c9   : > { %v5145_v49 = vpop.f32.mrb[22].mxu0 }
 0x1ca   : > { %1502 = vrot.lane.b32.xlu0 %v5145_v49, %s4237_s18  ;;  %v3242_v50 = vpop.f32.mrb[23].mxu0 }
 0x1d7   : > { %v5149_v26 = vpop.f32.mrb[24].mxu0 }
 0x1d8   : > { %1504 = vrot.lane.b32.xlu1 %v5149_v26, %s4237_s18  ;;  %v3245_v51 = vpop.f32.mrb[25].mxu0 }
 0x1d9   : > { %v5153_v52 = vpop.f32.mrb[26].mxu0  ;;  %v5289_v51 = vld [vmem:[%s6126_s2] ss:$0 sm:$0xff] }
 0x1da   : > { %1506 = vrot.lane.b32.xlu0 %v5153_v52, %s4237_s18  ;;  %v3246_v53 = vpop.f32.mrb[27].mxu0 }
 0x1e7   : > { %v5157_v45 = vpop.f32.mrb[28].mxu0 }
 0x1e8   : > { %1508 = vrot.lane.b32.xlu1 %v5157_v45, %s4237_s18  ;;  %v3249_v55 = vpop.f32.mrb[29].mxu0 }
 0x1e9   : > { %v5161_v47 = vpop.f32.mrb[30].mxu0 }
 0x1ea   : > { %1510 = vrot.lane.b32.xlu0 %v5161_v47, %s4237_s18  ;;  %v3250_v56 = vpop.f32.mrb[31].mxu0 }
 0x1ec   : > { %v1483_v60 = vpop.permute.xlu0 %1482 }
 0x1ed   : > { %v5183_v10 = vmax.f32 %v1376_v32, %v1483_v60 }
 0x1f7   : > { %v5165_v19 = vpop.f32.mrb[32].mxu0 }
 0x1f8   : > { %1512 = vrot.lane.b32.xlu1 %v5165_v19, %s4237_s18  ;;  %v3253_v59 = vpop.f32.mrb[33].mxu0 }
 0x1f9   : > { %v5169_v63 = vpop.f32.mrb[34].mxu0 }
 0x1fa   : > { %1514 = vrot.lane.b32.xlu0 %v5169_v63, %s4237_s18  ;;  %v3254_v33 = vpop.f32.mrb[35].mxu0  ;;  %v1485_v8 = vpop.permute.xlu1 %1484 }
 0x1fb   : > { %v5196_v18 = vmax.f32 %v5115_v36, %v1485_v8 }
 0x1fc   : > { %v1487_v35 = vpop.permute.xlu0 %1486 }
 0x1fd   : > { %v5187_v16 = vmax.f32 %v1384_v34, %v1487_v35 }
 0x1fe   : > { %1480 = vrot.lane.b32.xlu0 %v5112_v30, %s4237_s18 }
 0x207   : > { %v5175_v0 = vpop.f32.mrb[36].mxu0 }
 0x208   : > { %1516 = vrot.lane.b32.xlu1 %v5175_v0, %s4237_s18  ;;  %v3257_v28 = vpop.f32.mrb[37].mxu0 }
 0x209   : > { %v5179_v5 = vpop.f32.mrb[38].mxu0 }
 0x20a   : > { %1518 = vrot.lane.b32.xlu0 %v5179_v5, %s4237_s18  ;;  %v3258_v7 = vpop.f32.mrb[39].mxu0  ;;  %v1489_v17 = vpop.permute.xlu1 %1488 }
 0x20b   : > { %v5203_v6 = vmax.f32 %v5120_v23, %v1489_v17 }
 0x20c   : > { %v1491_v4 = vpop.permute.xlu0 %1490 }
 0x20d   : > { %v5210_v54 = vmax.f32 %v5124_v43, %v1491_v4 }
 0x20e   : > { %1587 = vrot.lane.b32.xlu0 %v5183_v10, %s4238_s19 }
 0x212   : > { %1591 = vrot.lane.b32.xlu0 %v5187_v16, %s4238_s19 }
 0x215   : > { %v5191_v14 = vpop.f32.mrb[40].mxu0 }
 0x216   : > { %1520 = vrot.lane.b32.xlu1 %v5191_v14, %s4237_s18  ;;  %v3261_v37 = vpop.f32.mrb[41].mxu0  ;;  %s4240_s18 = smov 60  }
 0x217   : > { %v1456_v20 = vpop.f32.mrb[42].mxu0 }
 0x218   : > { %v3262_v13 = vpop.f32.mrb[43].mxu0 }
 0x21a   : > { %v1493_v22 = vpop.permute.xlu1 %1492  ;;  %1589 = vrot.lane.b32.xlu1 %v5196_v18, %s4238_s19 }
 0x21b   : > { %v5200_v11 = vmax.f32 %v1397_v42, %v1493_v22 }
 0x21c   : > { %v1495_v3 = vpop.permute.xlu0 %1494 }
 0x21d   : > { %1597 = vrot.lane.b32.xlu0 %v5200_v11, %s4238_s19  ;;  %v5215_v21 = vmax.f32 %v5129_v38, %v1495_v3 }
 0x21e   : > { %1593 = vrot.lane.b32.xlu1 %v5203_v6, %s4238_s19 }
 0x222   : > { %1595 = vrot.lane.b32.xlu1 %v5210_v54, %s4238_s19 }
 0x226   : > { %1599 = vrot.lane.b32.xlu1 %v5215_v21, %s4238_s19 }
 0x22a   : > { %v1497_v2 = vpop.permute.xlu1 %1496 }
 0x22b   : > { %v5220_v24 = vmax.f32 %v5133_v46, %v1497_v2 }
 0x22c   : > { %v1499_v29 = vpop.permute.xlu0 %1498 }
 0x22d   : > { %v5223_v61 = vmax.f32 %v5137_v57, %v1499_v29  ;;  %1601 = vrot.lane.b32.xlu0 %v5220_v24, %s4238_s19 }
 0x22f   : > { %1603 = vrot.lane.b32.xlu1 %v5223_v61, %s4238_s19 }
 0x23a   : > { %v1501_v9 = vpop.permute.xlu1 %1500 }
 0x23b   : > { %v5230_v31 = vmax.f32 %v5141_v12, %v1501_v9 }
 0x23c   : > { %v1503_v32 = vpop.permute.xlu0 %1502 }
 0x23d   : > { %v5233_v27 = vmax.f32 %v5145_v49, %v1503_v32  ;;  %1605 = vrot.lane.b32.xlu0 %v5230_v31, %s4238_s19 }
 0x23f   : > { %1607 = vrot.lane.b32.xlu1 %v5233_v27, %s4238_s19 }
 0x24a   : > { %v1505_v36 = vpop.permute.xlu1 %1504 }
 0x24b   : > { %v5240_v62 = vmax.f32 %v5149_v26, %v1505_v36 }
 0x24c   : > { %v1507_v34 = vpop.permute.xlu0 %1506 }
 0x24d   : > { %v5243_v58 = vmax.f32 %v5153_v52, %v1507_v34  ;;  %1609 = vrot.lane.b32.xlu0 %v5240_v62, %s4238_s19 }
 0x24f   : > { %1611 = vrot.lane.b32.xlu1 %v5243_v58, %s4238_s19 }
 0x25a   : > { %v1509_v23 = vpop.permute.xlu1 %1508 }
 0x25b   : > { %v5250_v40 = vmax.f32 %v5157_v45, %v1509_v23 }
 0x25c   : > { %v1511_v43 = vpop.permute.xlu0 %1510 }
 0x25d   : > { %v5253_v15 = vmax.f32 %v5161_v47, %v1511_v43  ;;  %1613 = vrot.lane.b32.xlu0 %v5250_v40, %s4238_s19 }
 0x25f   : > { %1615 = vrot.lane.b32.xlu1 %v5253_v15, %s4238_s19 }
 0x26a   : > { %v1513_v42 = vpop.permute.xlu1 %1512 }
 0x26b   : > { %v5260_v44 = vmax.f32 %v5165_v19, %v1513_v42 }
 0x26c   : > { %v1515_v38 = vpop.permute.xlu0 %1514 }
 0x26d   : > { %1617 = vrot.lane.b32.xlu0 %v5260_v44, %s4238_s19  ;;  %v5270_v25 = vmax.f32 %v5169_v63, %v1515_v38 }
 0x270   : > { %v1481_v39 = vpop.permute.xlu0 %1480 }
 0x271   : > { %v5265_v46 = vmax.f32 %v5112_v30, %v1481_v39 }
 0x273   : > { %1585 = vrot.lane.b32.xlu1 %v5265_v46, %s4238_s19 }
 0x277   : > { %1619 = vrot.lane.b32.xlu1 %v5270_v25, %s4238_s19 }
 0x27a   : > { %v1517_v57 = vpop.permute.xlu1 %1516 }
 0x27b   : > { %v5275_v41 = vmax.f32 %v5175_v0, %v1517_v57 }
 0x27c   : > { %v1519_v12 = vpop.permute.xlu0 %1518 }
 0x27d   : > { %v5278_v48 = vmax.f32 %v5179_v5, %v1519_v12  ;;  %1621 = vrot.lane.b32.xlu0 %v5275_v41, %s4238_s19 }
 0x27f   : > { %1623 = vrot.lane.b32.xlu1 %v5278_v48, %s4238_s19 }
 0x280   : > { %v1588_v30 = vpop.permute.xlu0 %1587 }
 0x281   : > { %v1649_v50 = vmax.f32 %v5183_v10, %v1588_v30 }
 0x283   : > { %v1677_v45 = vadd.f32 %v5289_v51, %v1649_v50 }
 0x284   : > { %v1592_v49 = vpop.permute.xlu0 %1591 }
 0x285   : > { %v1651_v26 = vmax.f32 %v5187_v16, %v1592_v49  ;;  %v5299_v19 = vmax.f32 %v1677_v45, 0.0 }
 0x287   : > { %v1679_v55 = vadd.f32 %v5289_v51, %v1651_v26  ;;  %v1844_v60 = vrot.slane %v5299_v19, 2  ;;  %v1949_v37 = vrot.slane %v5299_v19, 3  ;;  %v2053_v42 = vrot.slane %v5299_v19, 4 }
 0x288   : > { %v1521_v52 = vpop.permute.xlu1 %1520 }
 0x289   : > { %v5292_v53 = vmax.f32 %v5191_v14, %v1521_v52  ;;  %v5301_v59 = vmax.f32 %v1679_v55, 0.0  ;;  %v1740_v14 = vrot.slane %v5299_v19, 1 }
 0x28b   : > { %1625 = vrot.lane.b32.xlu0 %v5292_v53, %s4238_s19  ;;  %v1848_v5 = vrot.slane %v5301_v59, 2  ;;  %v1744_v17 = vrot.slane %v5301_v59, 1  ;;  %v1953_v20 = vrot.slane %v5301_v59, 3  ;;  %v2057_v57 = vrot.slane %v5301_v59, 4 }
 0x28c   : > { %v1590_v47 = vpop.permute.xlu1 %1589 }
 0x28d   : > { %v1650_v56 = vmax.f32 %v5196_v18, %v1590_v47 }
 0x28f   : > { %v1678_v63 = vadd.f32 %v5289_v51, %v1650_v56  ;;  %v1598_v18 = vpop.permute.xlu0 %1597 }
 0x290   : > { %v1594_v33 = vpop.permute.xlu1 %1593  ;;  %v1654_v23 = vmax.f32 %v5200_v11, %v1598_v18 }
 0x291   : > { %v5304_v0 = vmax.f32 %v1678_v63, 0.0  ;;  %v1652_v28 = vmax.f32 %v5203_v6, %v1594_v33 }
 0x292   : > { %v1682_v45 = vadd.f32 %v5289_v51, %v1654_v23 }
 0x293   : > { %v1680_v7 = vadd.f32 %v5289_v51, %v1652_v28  ;;  %v1846_v10 = vrot.slane %v5304_v0, 2  ;;  %v1742_v35 = vrot.slane %v5304_v0, 1  ;;  %v1951_v16 = vrot.slane %v5304_v0, 3 }
 0x294   : > { %v1596_v8 = vpop.permute.xlu1 %1595  ;;  %v2055_v9 = vrot.slane %v5304_v0, 4  ;;  %v5367_v18 = vmax.f32 %v1682_v45, 0.0 }
 0x295   : > { %v5317_v13 = vmax.f32 %v1680_v7, 0.0  ;;  %v1653_v22 = vmax.f32 %v5210_v54, %v1596_v8  ;;  %v1847_v6 = vsel %vm428_vm3, %v1844_v60, %v1846_v10  ;;  %v1849_v4 = vsel %vm428_vm3, %v1846_v10, %v1848_v5 }
 0x296   : > { %v3793_v3 = vpack.i.bf16 %v1849_v4, %v1847_v6  ;;  %v1743_v2 = vsel %vm323_vm1, %v1740_v14, %v1742_v35  ;;  %v1745_v29 = vsel %vm323_vm1, %v1742_v35, %v1744_v17  ;;  %v1952_v54 = vsel %vm1947_vm2, %v1949_v37, %v1951_v16 }
 0x297   : > { %v1681_v32 = vadd.f32 %v5289_v51, %v1653_v22  ;;  %v3788_v36 = vpack.i.bf16 %v1745_v29, %v1743_v2  ;;  %v1954_v34 = vsel %vm1947_vm2, %v1951_v16, %v1953_v20  ;;  %v1850_v12 = vrot.slane %v5317_v13, 2 }
 0x298   : > { %3794 = vrot.lane.b32.xlu1 %v3793_v3, %s4232_s9  ;;  %v1600_v43 = vpop.permute.xlu1 %1599  ;;  %v3798_v30 = vpack.i.bf16 %v1954_v34, %v1952_v54  ;;  %v2056_v11 = vsel %vm814_vm4, %v2053_v42, %v2055_v9  ;;  %v2058_v50 = vsel %vm814_vm4, %v2055_v9, %v2057_v57  ;;  %v1955_v56 = vrot.slane %v5317_v13, 3 }
 0x299   : > { %v5337_v38 = vmax.f32 %v1681_v32, 0.0  ;;  %3789 = vrot.lane.b32.xlu0 %v3788_v36, %s4230_s22  ;;  %v1655_v39 = vmax.f32 %v5215_v21, %v1600_v43  ;;  %v1851_v55 = vsel %vm428_vm3, %v1848_v5, %v1850_v12  ;;  %v1746_v63 = vrot.slane %v5317_v13, 1 }
 0x29a   : > { %v3803_v33 = vpack.i.bf16 %v2058_v50, %v2056_v11  ;;  %v1956_v6 = vsel %vm1947_vm2, %v1953_v20, %v1955_v56  ;;  %v2059_v3 = vrot.slane %v5317_v13, 4 }
 0x29b   : > { %v1683_v49 = vadd.f32 %v5289_v51, %v1655_v39  ;;  %v1852_v26 = vrot.slane %v5337_v38, 2  ;;  %v1957_v52 = vrot.slane %v5337_v38, 3  ;;  %v1748_v21 = vrot.slane %v5337_v38, 1 }
 0x29c   : > { %3799 = vrot.lane.b32.xlu1 %v3798_v30, %s4229_s21  ;;  %v2061_v8 = vrot.slane %v5337_v38, 4  ;;  %v1747_v4 = vsel %vm323_vm1, %v1744_v17, %v1746_v63  ;;  %v2060_v17 = vsel %vm814_vm4, %v2057_v57, %v2059_v3  ;;  %v1854_v57 = vrot.slane %v5367_v18, 2 }
 0x29d   : > { %v1853_v47 = vsel %vm428_vm3, %v1850_v12, %v1852_v26  ;;  %v5357_v7 = vmax.f32 %v1683_v49, 0.0  ;;  %v1958_v35 = vsel %vm1947_vm2, %v1955_v56, %v1957_v52  ;;  %v1749_v16 = vsel %vm323_vm1, %v1746_v63, %v1748_v21 }
 0x29e   : > { %v3813_v28 = vpack.i.bf16 %v1853_v47, %v1851_v55  ;;  %v3818_v9 = vpack.i.bf16 %v1958_v35, %v1956_v6  ;;  %v3808_v32 = vpack.i.bf16 %v1749_v16, %v1747_v4  ;;  %v1855_v35 = vsel %vm428_vm3, %v1852_v26, %v1854_v57 }
 0x29f   : > { %v1602_v10 = vpop.permute.xlu0 %1601  ;;  %v1752_v36 = vrot.slane %v5357_v7, 1  ;;  %v1856_v12 = vrot.slane %v5357_v7, 2  ;;  %v1961_v50 = vrot.slane %v5357_v7, 3  ;;  %v2065_v16 = vrot.slane %v5357_v7, 4 }
 0x2a0   : > { %v1656_v5 = vmax.f32 %v5220_v24, %v1602_v10  ;;  %3804 = vrot.lane.b32.xlu1 %v3803_v33, %s4231_s8  ;;  %3814 = vrot.lane.b32.xlu0 %v3813_v28, %s4232_s9  ;;  %v2062_v24 = vsel %vm814_vm4, %v2059_v3, %v2061_v8 }
 0x2a1   : > { %v1604_v22 = vpop.permute.xlu1 %1603  ;;  %v3823_v23 = vpack.i.bf16 %v2062_v24, %v2060_v17  ;;  %v1857_v33 = vsel %vm428_vm3, %v1854_v57, %v1856_v12 }
 0x2a2   : > { %v1684_v2 = vadd.f32 %v5289_v51, %v1656_v5  ;;  %v1657_v29 = vmax.f32 %v5223_v61, %v1604_v22  ;;  %v1750_v61 = vrot.slane %v5367_v18, 1  ;;  %v3833_v5 = vpack.i.bf16 %v1857_v33, %v1855_v35 }
 0x2a4   : > { %v5378_v54 = vmax.f32 %v1684_v2, 0.0  ;;  %v1685_v20 = vadd.f32 %v5289_v51, %v1657_v29  ;;  %3819 = vrot.lane.b32.xlu0 %v3818_v9, %s4229_s21  ;;  %3809 = vrot.lane.b32.xlu1 %v3808_v32, %s4230_s22  ;;  %v1753_v39 = vsel %vm323_vm1, %v1750_v61, %v1752_v36  ;;  %v1751_v49 = vsel %vm323_vm1, %v1748_v21, %v1750_v61 }
 0x2a5   : > { %v3828_v45 = vpack.i.bf16 %v1753_v39, %v1751_v49  ;;  %v1959_v21 = vrot.slane %v5367_v18, 3  ;;  %v2063_v29 = vrot.slane %v5367_v18, 4 }
 0x2a6   : > { %v5385_v34 = vmax.f32 %v1685_v20, 0.0  ;;  %v1754_v43 = vrot.slane %v5378_v54, 1  ;;  %v1858_v56 = vrot.slane %v5378_v54, 2  ;;  %v1963_v4 = vrot.slane %v5378_v54, 3 }
 0x2a7   : > { %v1962_v6 = vsel %vm1947_vm2, %v1959_v21, %v1961_v50  ;;  %v1960_v26 = vsel %vm1947_vm2, %v1957_v52, %v1959_v21  ;;  %v2066_v17 = vsel %vm814_vm4, %v2063_v29, %v2065_v16  ;;  %v2064_v49 = vsel %vm814_vm4, %v2061_v8, %v2063_v29 }
 0x2a8   : > { %3824 = vrot.lane.b32.xlu0 %v3823_v23, %s4231_s8  ;;  %v1756_v30 = vrot.slane %v5385_v34, 1  ;;  %v1860_v11 = vrot.slane %v5385_v34, 2  ;;  %v1755_v55 = vsel %vm323_vm1, %v1752_v36, %v1754_v43  ;;  %v1965_v10 = vrot.slane %v5385_v34, 3 }
 0x2a9   : > { %v1859_v22 = vsel %vm428_vm3, %v1856_v12, %v1858_v56  ;;  %v2069_v24 = vrot.slane %v5385_v34, 4  ;;  %v3838_v20 = vpack.i.bf16 %v1962_v6, %v1960_v26  ;;  %v1964_v23 = vsel %vm1947_vm2, %v1961_v50, %v1963_v4 }
 0x2aa   : > { %v1757_v47 = vsel %vm323_vm1, %v1754_v43, %v1756_v30  ;;  %v1861_v28 = vsel %vm428_vm3, %v1858_v56, %v1860_v11  ;;  %v1966_v32 = vsel %vm1947_vm2, %v1963_v4, %v1965_v10  ;;  %v2067_v43 = vrot.slane %v5378_v54, 4 }
 0x2ab   : > { %v3848_v63 = vpack.i.bf16 %v1757_v47, %v1755_v55  ;;  %v3853_v2 = vpack.i.bf16 %v1861_v28, %v1859_v22  ;;  %v3858_v39 = vpack.i.bf16 %v1966_v32, %v1964_v23 }
 0x2ac   : > { %3829 = vrot.lane.b32.xlu0 %v3828_v45, %s4230_s22  ;;  %v2070_v57 = vsel %vm814_vm4, %v2067_v43, %v2069_v24  ;;  %v2068_v50 = vsel %vm814_vm4, %v2065_v16, %v2067_v43 }
 0x2ad   : > { %3849 = vrot.lane.b32.xlu1 %v3848_v63, %s4230_s22  ;;  %v3863_v56 = vpack.i.bf16 %v2070_v57, %v2068_v50 }
 0x2af   : > { %v1606_v3 = vpop.permute.xlu0 %1605 }
 0x2b0   : > { %v1658_v9 = vmax.f32 %v5230_v31, %v1606_v3  ;;  %3834 = vrot.lane.b32.xlu0 %v3833_v5, %s4232_s9 }
 0x2b1   : > { %3854 = vrot.lane.b32.xlu1 %v3853_v2, %s4232_s9  ;;  %v1608_v36 = vpop.permute.xlu1 %1607 }
 0x2b2   : > { %v1686_v61 = vadd.f32 %v5289_v51, %v1658_v9  ;;  %v1659_v31 = vmax.f32 %v5233_v27, %v1608_v36  ;;  %v3843_v27 = vpack.i.bf16 %v2066_v17, %v2064_v49 }
 0x2b4   : > { %v5424_v52 = vmax.f32 %v1686_v61, 0.0  ;;  %v1687_v12 = vadd.f32 %v5289_v51, %v1659_v31  ;;  %3839 = vrot.lane.b32.xlu0 %v3838_v20, %s4229_s21 }
 0x2b5   : > { %3859 = vrot.lane.b32.xlu1 %v3858_v39, %s4229_s21 }
 0x2b6   : > { %v5433_v45 = vmax.f32 %v1687_v12, 0.0  ;;  %v1862_v55 = vrot.slane %v5424_v52, 2  ;;  %v1758_v47 = vrot.slane %v5424_v52, 1  ;;  %v2071_v33 = vrot.slane %v5424_v52, 4 }
 0x2b7   : > { %v1967_v21 = vrot.slane %v5424_v52, 3 }
 0x2b8   : > { %3844 = vrot.lane.b32.xlu0 %v3843_v27, %s4231_s8  ;;  %v1864_v63 = vrot.slane %v5433_v45, 2  ;;  %v1760_v8 = vrot.slane %v5433_v45, 1  ;;  %v2073_v28 = vrot.slane %v5433_v45, 4  ;;  %v1969_v35 = vrot.slane %v5433_v45, 3 }
 0x2b9   : > { %3864 = vrot.lane.b32.xlu1 %v3863_v56, %s4231_s8  ;;  %v1863_v16 = vsel %vm428_vm3, %v1860_v11, %v1862_v55  ;;  %v1759_v22 = vsel %vm323_vm1, %v1756_v30, %v1758_v47  ;;  %v2072_v9 = vsel %vm814_vm4, %v2069_v24, %v2071_v33  ;;  %v1968_v11 = vsel %vm1947_vm2, %v1965_v10, %v1967_v21 }
 0x2ba   : > { %v1865_v5 = vsel %vm428_vm3, %v1862_v55, %v1864_v63  ;;  %v1761_v6 = vsel %vm323_vm1, %v1758_v47, %v1760_v8  ;;  %v2074_v2 = vsel %vm814_vm4, %v2071_v33, %v2073_v28  ;;  %v1970_v29 = vsel %vm1947_vm2, %v1967_v21, %v1969_v35 }
 0x2bb   : > { %v3873_v4 = vpack.i.bf16 %v1865_v5, %v1863_v16  ;;  %v3868_v3 = vpack.i.bf16 %v1761_v6, %v1759_v22  ;;  %v3883_v32 = vpack.i.bf16 %v2074_v2, %v2072_v9  ;;  %v3878_v36 = vpack.i.bf16 %v1970_v29, %v1968_v11 }
 0x2bd   : > { %3874 = vrot.lane.b32.xlu1 %v3873_v4, %s4232_s9  ;;  %3869 = vrot.lane.b32.xlu0 %v3868_v3, %s4230_s22 }
 0x2bf   : > { %v1610_v26 = vpop.permute.xlu0 %1609 }
 0x2c0   : > { %v1660_v30 = vmax.f32 %v5240_v62, %v1610_v26 }
 0x2c1   : > { %3884 = vrot.lane.b32.xlu1 %v3883_v32, %s4231_s8  ;;  %3879 = vrot.lane.b32.xlu0 %v3878_v36, %s4229_s21  ;;  %v1612_v20 = vpop.permute.xlu1 %1611 }
 0x2c2   : > { %v1688_v17 = vadd.f32 %v5289_v51, %v1660_v30  ;;  %v1661_v61 = vmax.f32 %v5243_v58, %v1612_v20 }
 0x2c4   : > { %v5461_v31 = vmax.f32 %v1688_v17, 0.0  ;;  %v1689_v24 = vadd.f32 %v5289_v51, %v1661_v61 }
 0x2c6   : > { %v5464_v23 = vmax.f32 %v1689_v24, 0.0  ;;  %v1866_v10 = vrot.slane %v5461_v31, 2  ;;  %v1762_v43 = vrot.slane %v5461_v31, 1  ;;  %v2075_v12 = vrot.slane %v5461_v31, 4 }
 0x2c7   : > { %v1971_v58 = vrot.slane %v5461_v31, 3 }
 0x2c8   : > { %v1868_v62 = vrot.slane %v5464_v23, 2  ;;  %v1764_v39 = vrot.slane %v5464_v23, 1  ;;  %v2077_v49 = vrot.slane %v5464_v23, 4  ;;  %v1973_v57 = vrot.slane %v5464_v23, 3 }
 0x2c9   : > { %v1867_v27 = vsel %vm428_vm3, %v1864_v63, %v1866_v10  ;;  %v1763_v55 = vsel %vm323_vm1, %v1760_v8, %v1762_v43  ;;  %v2076_v5 = vsel %vm814_vm4, %v2073_v28, %v2075_v12  ;;  %v1972_v63 = vsel %vm1947_vm2, %v1969_v35, %v1971_v58 }
 0x2ca   : > { %v1869_v50 = vsel %vm428_vm3, %v1866_v10, %v1868_v62  ;;  %v1765_v47 = vsel %vm323_vm1, %v1762_v43, %v1764_v39  ;;  %v2078_v21 = vsel %vm814_vm4, %v2075_v12, %v2077_v49  ;;  %v1974_v16 = vsel %vm1947_vm2, %v1971_v58, %v1973_v57 }
 0x2cb   : > { %v3893_v56 = vpack.i.bf16 %v1869_v50, %v1867_v27  ;;  %v3888_v33 = vpack.i.bf16 %v1765_v47, %v1763_v55  ;;  %v3903_v6 = vpack.i.bf16 %v2078_v21, %v2076_v5  ;;  %v3898_v4 = vpack.i.bf16 %v1974_v16, %v1972_v63 }
 0x2cd   : > { %3894 = vrot.lane.b32.xlu1 %v3893_v56, %s4232_s9  ;;  %3889 = vrot.lane.b32.xlu0 %v3888_v33, %s4230_s22 }
 0x2cf   : > { %v1614_v22 = vpop.permute.xlu0 %1613 }
 0x2d0   : > { %v1662_v8 = vmax.f32 %v5250_v40, %v1614_v22 }
 0x2d1   : > { %3904 = vrot.lane.b32.xlu1 %v3903_v6, %s4231_s8  ;;  %3899 = vrot.lane.b32.xlu0 %v3898_v4, %s4229_s21  ;;  %v1616_v3 = vpop.permute.xlu1 %1615 }
 0x2d2   : > { %v1690_v2 = vadd.f32 %v5289_v51, %v1662_v8  ;;  %v1663_v29 = vmax.f32 %v5253_v15, %v1616_v3 }
 0x2d4   : > { %v5489_v9 = vmax.f32 %v1690_v2, 0.0  ;;  %v1691_v28 = vadd.f32 %v5289_v51, %v1663_v29 }
 0x2d6   : > { %v5492_v11 = vmax.f32 %v1691_v28, 0.0  ;;  %v1870_v35 = vrot.slane %v5489_v9, 2  ;;  %v1766_v26 = vrot.slane %v5489_v9, 1  ;;  %v2079_v36 = vrot.slane %v5489_v9, 4 }
 0x2d7   : > { %v1975_v15 = vrot.slane %v5489_v9, 3 }
 0x2d8   : > { %v1872_v40 = vrot.slane %v5492_v11, 2  ;;  %v1768_v32 = vrot.slane %v5492_v11, 1  ;;  %v2081_v30 = vrot.slane %v5492_v11, 4  ;;  %v1977_v20 = vrot.slane %v5492_v11, 3 }
 0x2d9   : > { %v1871_v17 = vsel %vm428_vm3, %v1868_v62, %v1870_v35  ;;  %v1767_v24 = vsel %vm323_vm1, %v1764_v39, %v1766_v26  ;;  %v2080_v50 = vsel %vm814_vm4, %v2077_v49, %v2079_v36  ;;  %v1976_v62 = vsel %vm1947_vm2, %v1973_v57, %v1975_v15 }
 0x2da   : > { %v1873_v61 = vsel %vm428_vm3, %v1870_v35, %v1872_v40  ;;  %v1769_v10 = vsel %vm323_vm1, %v1766_v26, %v1768_v32  ;;  %v2082_v58 = vsel %vm814_vm4, %v2079_v36, %v2081_v30  ;;  %v1978_v27 = vsel %vm1947_vm2, %v1975_v15, %v1977_v20 }
 0x2db   : > { %v3913_v43 = vpack.i.bf16 %v1873_v61, %v1871_v17  ;;  %v3908_v12 = vpack.i.bf16 %v1769_v10, %v1767_v24  ;;  %v3923_v47 = vpack.i.bf16 %v2082_v58, %v2080_v50  ;;  %v3918_v56 = vpack.i.bf16 %v1978_v27, %v1976_v62 }
 0x2dd   : > { %3914 = vrot.lane.b32.xlu1 %v3913_v43, %s4232_s9  ;;  %3909 = vrot.lane.b32.xlu0 %v3908_v12, %s4230_s22 }
 0x2df   : > { %v1618_v55 = vpop.permute.xlu0 %1617 }
 0x2e0   : > { %v1664_v39 = vmax.f32 %v5260_v44, %v1618_v55 }
 0x2e1   : > { %3924 = vrot.lane.b32.xlu1 %v3923_v47, %s4231_s8  ;;  %3919 = vrot.lane.b32.xlu0 %v3918_v56, %s4229_s21 }
 0x2e2   : > { %v1692_v33 = vadd.f32 %v5289_v51, %v1664_v39 }
 0x2e4   : > { %v5516_v16 = vmax.f32 %v1692_v33, 0.0 }
 0x2e5   : > { %v1586_v21 = vpop.permute.xlu1 %1585 }
 0x2e6   : > { %v1874_v57 = vrot.slane %v5516_v16, 2  ;;  %v1770_v22 = vrot.slane %v5516_v16, 1  ;;  %v2083_v4 = vrot.slane %v5516_v16, 4  ;;  %v1979_v26 = vrot.slane %v5516_v16, 3 }
 0x2e7   : > { %v1648_v24 = vmax.f32 %v5265_v46, %v1586_v21 }
 0x2e8   : > { %v1875_v28 = vsel %vm428_vm3, %v1872_v40, %v1874_v57  ;;  %v1771_v35 = vsel %vm323_vm1, %v1768_v32, %v1770_v22  ;;  %v1980_v46 = vsel %vm1947_vm2, %v1977_v20, %v1979_v26 }
 0x2e9   : > { %v1620_v5 = vpop.permute.xlu1 %1619  ;;  %v1676_v55 = vadd.f32 %v5289_v51, %v1648_v24 }
 0x2ea   : > { %v1665_v63 = vmax.f32 %v5270_v25, %v1620_v5 }
 0x2ec   : > { %v1693_v49 = vadd.f32 %v5289_v51, %v1665_v63 }
 0x2ee   : > { %v5522_v6 = vmax.f32 %v1693_v49, 0.0 }
 0x2ef   : > { %v1622_v44 = vpop.permute.xlu0 %1621 }
 0x2f0   : > { %v1666_v8 = vmax.f32 %v5275_v41, %v1622_v44  ;;  %v1876_v3 = vrot.slane %v5522_v6, 2  ;;  %v1772_v2 = vrot.slane %v5522_v6, 1  ;;  %v2085_v29 = vrot.slane %v5522_v6, 4 }
 0x2f1   : > { %v1624_v25 = vpop.permute.xlu1 %1623  ;;  %v1981_v36 = vrot.slane %v5522_v6, 3  ;;  %v5564_v44 = vmax.f32 %v1676_v55, 0.0 }
 0x2f2   : > { %v1694_v15 = vadd.f32 %v5289_v51, %v1666_v8  ;;  %v1667_v17 = vmax.f32 %v5278_v48, %v1624_v25  ;;  %v1877_v41 = vsel %vm428_vm3, %v1874_v57, %v1876_v3  ;;  %v1773_v61 = vsel %vm323_vm1, %v1770_v22, %v1772_v2 }
 0x2f3   : > { %v3933_v10 = vpack.i.bf16 %v1877_v41, %v1875_v28  ;;  %v3928_v43 = vpack.i.bf16 %v1773_v61, %v1771_v35  ;;  %v2086_v32 = vsel %vm814_vm4, %v2083_v4, %v2085_v29  ;;  %v1982_v58 = vsel %vm1947_vm2, %v1979_v26, %v1981_v36 }
 0x2f4   : > { %v5538_v12 = vmax.f32 %v1694_v15, 0.0  ;;  %v1695_v40 = vadd.f32 %v5289_v51, %v1667_v17  ;;  %v2084_v48 = vsel %vm814_vm4, %v2081_v30, %v2083_v4  ;;  %v3938_v56 = vpack.i.bf16 %v1982_v58, %v1980_v46 }
 0x2f5   : > { %3934 = vrot.lane.b32.xlu1 %v3933_v10, %s4232_s9  ;;  %3929 = vrot.lane.b32.xlu0 %v3928_v43, %s4230_s22  ;;  %v3943_v47 = vpack.i.bf16 %v2086_v32, %v2084_v48  ;;  %v1843_v41 = vrot.slane %v5564_v44, 2  ;;  %v1739_v61 = vrot.slane %v5564_v44, 1 }
 0x2f6   : > { %v5546_v27 = vmax.f32 %v1695_v40, 0.0  ;;  %v1878_v50 = vrot.slane %v5538_v12, 2  ;;  %v1774_v62 = vrot.slane %v5538_v12, 1  ;;  %v2087_v30 = vrot.slane %v5538_v12, 4 }
 0x2f7   : > { %v1983_v21 = vrot.slane %v5538_v12, 3 }
 0x2f8   : > { %v1880_v39 = vrot.slane %v5546_v27, 2  ;;  %v1776_v33 = vrot.slane %v5546_v27, 1  ;;  %v2089_v20 = vrot.slane %v5546_v27, 4  ;;  %v1985_v5 = vrot.slane %v5546_v27, 3 }
 0x2f9   : > { %3944 = vrot.lane.b32.xlu1 %v3943_v47, %s4231_s8  ;;  %3939 = vrot.lane.b32.xlu0 %v3938_v56, %s4229_s21  ;;  %v1879_v63 = vsel %vm428_vm3, %v1876_v3, %v1878_v50  ;;  %v1775_v57 = vsel %vm323_vm1, %v1772_v2, %v1774_v62  ;;  %v2088_v26 = vsel %vm814_vm4, %v2085_v29, %v2087_v30 }
 0x2fa   : > { %v1881_v49 = vsel %vm428_vm3, %v1878_v50, %v1880_v39  ;;  %v1777_v22 = vsel %vm323_vm1, %v1774_v62, %v1776_v33  ;;  %v2090_v25 = vsel %vm814_vm4, %v2087_v30, %v2089_v20  ;;  %v1986_v28 = vsel %vm1947_vm2, %v1983_v21, %v1985_v5 }
 0x2fb   : > { %v3953_v4 = vpack.i.bf16 %v1881_v49, %v1879_v63  ;;  %v3948_v8 = vpack.i.bf16 %v1777_v22, %v1775_v57  ;;  %v1984_v2 = vsel %vm1947_vm2, %v1981_v36, %v1983_v21  ;;  %v3963_v15 = vpack.i.bf16 %v2090_v25, %v2088_v26 }
 0x2fc   : > { %v3958_v17 = vpack.i.bf16 %v1986_v28, %v1984_v2  ;;  %v1741_v29 = vsel %vm323_vm1, %v1739_v61, %v1740_v14  ;;  %v4131_v14 = vld [vmem:[%s6127_s3] sm:$0xff]  }
 0x2fd   : > { %v1626_v35 = vpop.permute.xlu0 %1625  ;;  %3954 = vrot.lane.b32.xlu1 %v3953_v4, %s4232_s9  ;;  %3949 = vrot.lane.b32.xlu0 %v3948_v8, %s4230_s22 }
 0x2fe   : > { %v1668_v3 = vmax.f32 %v5292_v53, %v1626_v35  ;;  %v1845_v53 = vsel %vm428_vm3, %v1843_v41, %v1844_v60  ;;  %3264 = vmatpush3.bf16.msra.mxu1 %v4131_v14 }
 0x2ff   : > { %3265 = vmatprep.subr.bf16.mxu1 %v4227_v1 }
 0x300   : > { %v1696_v24 = vadd.f32 %v5289_v51, %v1668_v3 }
 0x301   : > { %3964 = vrot.lane.b32.xlu1 %v3963_v15, %s4231_s8  ;;  %3959 = vrot.lane.b32.xlu0 %v3958_v17, %s4229_s21 }
 0x302   : > { %v5578_v10 = vmax.f32 %v1696_v24, 0.0 }
 0x304   : > { %v1882_v36 = vrot.slane %v5578_v10, 2  ;;  %v1778_v43 = vrot.slane %v5578_v10, 1  ;;  %v2091_v51 = vrot.slane %v5578_v10, 4  ;;  %v1987_v40 = vrot.slane %v5578_v10, 3 }
 0x305   : > { %1884 = vrot.lane.b32.xlu1 %v1845_v53, %s4232_s9  ;;  %1780 = vrot.lane.b32.xlu0 %v1741_v29, %s4230_s22 }
 0x306   : > { %v1883_v32 = vsel %vm428_vm3, %v1880_v39, %v1882_v36  ;;  %v1779_v60 = vsel %vm323_vm1, %v1776_v33, %v1778_v43  ;;  %v2092_v46 = vsel %vm814_vm4, %v2089_v20, %v2091_v51  ;;  %v1988_v50 = vsel %vm1947_vm2, %v1985_v5, %v1987_v40 }
 0x307   : > { %v3973_v58 = vpack.i.bf16 %v1882_v36, %v1883_v32  ;;  %v3968_v48 = vpack.i.bf16 %v1778_v43, %v1779_v60  ;;  %v3983_v55 = vpack.i.bf16 %v2091_v51, %v2092_v46  ;;  %v3978_v47 = vpack.i.bf16 %v1987_v40, %v1988_v50  ;;  %v4133_v32 = vld [vmem:[%s6127_s3 + $0x10] sm:$0xff]  }
 0x308   : > { %v2052_v39 = vrot.slane %v5564_v44, 4  ;;  %v1948_v33 = vrot.slane %v5564_v44, 3 }
 0x309   : > { %3974 = vrot.lane.b32.xlu1 %v3973_v58, %s4232_s9  ;;  %3969 = vrot.lane.b32.xlu0 %v3968_v48, %s4230_s22 }
 0x30a   : > { %v3795_v62 = vpop.permute.xlu1 %3794  ;;  %v2054_v5 = vsel %vm814_vm4, %v2052_v39, %v2053_v42  ;;  %v1950_v63 = vsel %vm1947_vm2, %v1948_v33, %v1949_v37 }
 0x30b   : > { %v3790_v56 = vpop.permute.xlu0 %3789  ;;  %v3796_v49 = vunpack.i.l.bf16 %v3795_v62  ;;  %v3797_v8 = vunpack.i.h.bf16 %v3795_v62 }
 0x30c   : > { %v3791_v20 = vunpack.i.l.bf16 %v3790_v56  ;;  %v3792_v21 = vunpack.i.h.bf16 %v3790_v56 }
 0x30d   : > { %3984 = vrot.lane.b32.xlu1 %v3983_v55, %s4231_s8  ;;  %3979 = vrot.lane.b32.xlu0 %v3978_v47, %s4229_s21  ;;  %v4134_v47 = vld [vmem:[%s6127_s3 + $0x18] sm:$0xff]  }
 0x30e   : > { %v3800_v30 = vpop.permute.xlu1 %3799  ;;  %v2157_v4 = vsel %vm1095_vm7, %v5299_v19, %v3791_v20  ;;  %v2158_v28 = vsel %vm1095_vm7, %v5304_v0, %v3792_v21  ;;  %v4132_v0 = vld [vmem:[%s6127_s3 + $0x8] sm:$0xff]  }
 0x30f   : > { %v3801_v25 = vunpack.i.l.bf16 %v3800_v30  ;;  %v3802_v42 = vunpack.i.h.bf16 %v3800_v30  ;;  %v2178_v37 = vsel %vm1117_vm8, %v2157_v4, %v3796_v49  ;;  %v2179_v15 = vsel %vm1117_vm8, %v2158_v28, %v3797_v8  ;;  %3266 = vmatpush3.bf16.msra.mxu1 %v4132_v0 }
 0x310   : > { %3267 = vmatprep.subr.bf16.mxu1 %v4227_v1 }
 0x311   : > { %2093 = vrot.lane.b32.xlu1 %v2054_v5, %s4231_s8  ;;  %1989 = vrot.lane.b32.xlu0 %v1950_v63, %s4229_s21  ;;  %v2199_v17 = vsel %vm1139_vm9, %v2178_v37, %v3801_v25  ;;  %v2200_v61 = vsel %vm1139_vm9, %v2179_v15, %v3802_v42  ;;  %v4135_v63 = vld [vmem:[%s6127_s3 + $0x20] sm:$0xff]   ;;  %s4248_s21 = smov 96  }
 0x312   : > { %v3815_v57 = vpop.permute.xlu0 %3814  ;;  %v3805_v22 = vpop.permute.xlu1 %3804 }
 0x313   : > { %v3806_v35 = vunpack.i.l.bf16 %v3805_v22  ;;  %v3807_v3 = vunpack.i.h.bf16 %v3805_v22  ;;  %v3816_v19 = vunpack.i.l.bf16 %v3815_v57  ;;  %v3817_v50 = vunpack.i.h.bf16 %v3815_v57  ;;  %3268 = vmatpush3.bf16.msra.mxu1 %v4133_v32 }
 0x314   : > { %3269 = vmatprep.subr.bf16.mxu1 %v4227_v1 }
 0x315   : > { %v5623_v24 = vsel %vm1161_vm10, %v2199_v17, %v3806_v35  ;;  %v5629_v53 = vsel %vm1161_vm10, %v2200_v61, %v3807_v3 }
 0x316   : > { %v3820_v26 = vpop.permute.xlu0 %3819  ;;  %v3810_v2 = vpop.permute.xlu1 %3809  ;;  %v2254_v58 = vrot.slane %v5623_v24, 6  ;;  %v2255_v48 = vrot.slane %v5629_v53, 6 }
 0x317   : > { %v3811_v41 = vunpack.i.l.bf16 %v3810_v2  ;;  %v3821_v29 = vunpack.i.l.bf16 %v3820_v26  ;;  %v3812_v36 = vunpack.i.h.bf16 %v3810_v2  ;;  %v3822_v30 = vunpack.i.h.bf16 %v3820_v26  ;;  %3270 = vmatpush3.bf16.msra.mxu1 %v4134_v47 }
 0x318   : > { %v2256_v33 = vsel %vm535_vm0, %v2254_v58, %v2255_v48  ;;  %3271 = vmatprep.subr.bf16.mxu1 %v4227_v1 }
 0x319   : > { %v2159_v43 = vsel %vm1095_vm7, %v5301_v59, %v3811_v41  ;;  %v2160_v59 = vsel %vm1095_vm7, %v5317_v13, %v3812_v36 }
 0x31a   : > { %v2180_v51 = vsel %vm1117_vm8, %v2159_v43, %v3816_v19  ;;  %v3825_v40 = vpop.permute.xlu0 %3824  ;;  %v2181_v39 = vsel %vm1117_vm8, %v2160_v59, %v3817_v50 }
 0x31b   : > { %v3826_v60 = vunpack.i.l.bf16 %v3825_v40  ;;  %v2201_v14 = vsel %vm1139_vm9, %v2180_v51, %v3821_v29  ;;  %v3827_v21 = vunpack.i.h.bf16 %v3825_v40  ;;  %v2202_v49 = vsel %vm1139_vm9, %v2181_v39, %v3822_v30  ;;  %3272 = vmatpush3.bf16.msra.mxu1 %v4135_v63 }
 0x31c   : > { %3273 = vmatprep.subr.bf16.mxu1 %v4227_v1 }
 0x31d   : > { %v5644_v46 = vsel %vm1161_vm10, %v2201_v14, %v3826_v60  ;;  %v5663_v4 = vsel %vm1161_vm10, %v2202_v49, %v3827_v21 }
 0x31e   : > { %v2257_v62 = vrot.slane %v5644_v46, 6  ;;  %v3830_v55 = vpop.permute.xlu0 %3829  ;;  %v2325_v37 = vrot.slane %v5644_v46, 4  ;;  %v2326_v15 = vrot.slane %v5663_v4, 4  ;;  %v2259_v63 = vrot.slane %v5663_v4, 6 }
 0x31f   : > { %v3850_v56 = vpop.permute.xlu1 %3849  ;;  %v3832_v22 = vunpack.i.h.bf16 %v3830_v55  ;;  %v3831_v8 = vunpack.i.l.bf16 %v3830_v55 }
 0x320   : > { %v2258_v13 = vsel %vm535_vm0, %v2255_v48, %v2257_v62  ;;  %v3851_v25 = vunpack.i.l.bf16 %v3850_v56  ;;  %v3852_v41 = vunpack.i.h.bf16 %v3850_v56 }
 0x321   : > { %v3988_v20 = vpack.i.bf16 %v2258_v13, %v2256_v33  ;;  %v2162_v17 = vsel %vm1095_vm7, %v5367_v18, %v3832_v22  ;;  %v2161_v19 = vsel %vm1095_vm7, %v5337_v38, %v3831_v8  ;;  %v4136_v38 = vld [vmem:[%s6127_s3 + $0x28] sm:$0xff]  }
 0x322   : > { %v3835_v5 = vpop.permute.xlu0 %3834  ;;  %v2163_v0 = vsel %vm1095_vm7, %v5357_v7, %v3851_v25  ;;  %v2164_v7 = vsel %vm1095_vm7, %v5378_v54, %v3852_v41  ;;  %3274 = vmatpush3.bf16.msra.mxu1 %v4136_v38 }
 0x323   : > { %v3855_v57 = vpop.permute.xlu1 %3854  ;;  %3989 = vrot.lane.b32.xlu0 %v3988_v20, %s4228_s20  ;;  %v3837_v42 = vunpack.i.h.bf16 %v3835_v5  ;;  %v3836_v35 = vunpack.i.l.bf16 %v3835_v5  ;;  %3275 = vmatprep.subr.bf16.mxu1 %v4227_v1 }
 0x324   : > { %v3856_v61 = vunpack.i.l.bf16 %v3855_v57  ;;  %v3857_v29 = vunpack.i.h.bf16 %v3855_v57  ;;  %v2327_v57 = vsel %vm814_vm4, %v2325_v37, %v2326_v15 }
 0x325   : > { %v2182_v51 = vsel %vm1117_vm8, %v2161_v19, %v3836_v35  ;;  %v2183_v40 = vsel %vm1117_vm8, %v2162_v17, %v3837_v42 }
 0x326   : > { %v3840_v28 = vpop.permute.xlu0 %3839  ;;  %v2184_v50 = vsel %vm1117_vm8, %v2163_v0, %v3856_v61  ;;  %v2185_v56 = vsel %vm1117_vm8, %v2164_v7, %v3857_v29 }
 0x327   : > { %v3860_v3 = vpop.permute.xlu1 %3859  ;;  %v3842_v26 = vunpack.i.h.bf16 %v3840_v28  ;;  %v3841_v2 = vunpack.i.l.bf16 %v3840_v28 }
 0x328   : > { %v3861_v36 = vunpack.i.l.bf16 %v3860_v3  ;;  %v3862_v48 = vunpack.i.h.bf16 %v3860_v3 }
 0x329   : > { %v2203_v18 = vsel %vm1139_vm9, %v2182_v51, %v3841_v2  ;;  %v2204_v58 = vsel %vm1139_vm9, %v2183_v40, %v3842_v26 }
 0x32a   : > { %v3845_v43 = vpop.permute.xlu0 %3844  ;;  %v2205_v39 = vsel %vm1139_vm9, %v2184_v50, %v3861_v36  ;;  %v2206_v49 = vsel %vm1139_vm9, %v2185_v56, %v3862_v48 }
 0x32b   : > { %v3847_v32 = vunpack.i.h.bf16 %v3845_v43  ;;  %v3846_v60 = vunpack.i.l.bf16 %v3845_v43  ;;  %v3865_v14 = vpop.permute.xlu1 %3864 }
 0x32c   : > { %v3866_v59 = vunpack.i.l.bf16 %v3865_v14  ;;  %v3867_v54 = vunpack.i.h.bf16 %v3865_v14 }
 0x32d   : > { %v5685_v55 = vsel %vm1161_vm10, %v2203_v18, %v3846_v60  ;;  %v5688_v47 = vsel %vm1161_vm10, %v2204_v58, %v3847_v32  ;;  %v2260_v58 = vsel %vm535_vm0, %v2257_v62, %v2259_v63 }
 0x32e   : > { %v2328_v33 = vrot.slane %v5685_v55, 4  ;;  %v2396_v13 = vrot.slane %v5685_v55, 2  ;;  %v2397_v30 = vrot.slane %v5688_v47, 2  ;;  %v5696_v20 = vsel %vm1161_vm10, %v2205_v39, %v3866_v59 }
 0x32f   : > { %v3870_v21 = vpop.permute.xlu0 %3869  ;;  %v3875_v5 = vpop.permute.xlu1 %3874  ;;  %v2261_v22 = vrot.slane %v5685_v55, 6  ;;  %v2399_v8 = vrot.slane %v5696_v20, 2  ;;  %v2330_v42 = vrot.slane %v5688_v47, 4  ;;  %v5708_v2 = vsel %vm1161_vm10, %v2206_v49, %v3867_v54 }
 0x330   : > { %v3872_v25 = vunpack.i.h.bf16 %v3870_v21  ;;  %v3871_v28 = vunpack.i.l.bf16 %v3870_v21  ;;  %v3876_v35 = vunpack.i.l.bf16 %v3875_v5  ;;  %v2329_v3 = vsel %vm814_vm4, %v2326_v15, %v2328_v33 }
 0x331   : > { %v2398_v26 = vsel %vm428_vm3, %v2396_v13, %v2397_v30  ;;  %v3993_v61 = vpack.i.bf16 %v2329_v3, %v2327_v57  ;;  %v2400_v19 = vsel %vm428_vm3, %v2397_v30, %v2399_v8  ;;  %v2332_v0 = vrot.slane %v5696_v20, 4  ;;  %v4137_v13 = vld [vmem:[%s6127_s3 + $0x30] ss:$0 sps:$4 sm:$0x33]  }
 0x332   : > { %v2165_v17 = vsel %vm1095_vm7, %v5385_v34, %v3871_v28  ;;  %v2166_v29 = vsel %vm1095_vm7, %v5424_v52, %v3872_v25  ;;  %v3877_v36 = vunpack.i.h.bf16 %v3875_v5  ;;  %v4003_v34 = vpack.i.bf16 %v2400_v19, %v2398_v26 }
 0x333   : > { %v3880_v37 = vpop.permute.xlu0 %3879  ;;  %v3885_v41 = vpop.permute.xlu1 %3884  ;;  %v2186_v43 = vsel %vm1117_vm8, %v2165_v17, %v3876_v35  ;;  %3994 = vrot.lane.b32.xlu1 %v3993_v61, %s4239_s17  ;;  %v2262_v60 = vsel %vm535_vm0, %v2259_v63, %v2261_v22  ;;  %v2401_v14 = vrot.slane %v5708_v2, 2  ;;  %v3998_v52 = vpack.i.bf16 %v5708_v2, %v5696_v20 }
 0x334   : > { %v3881_v15 = vunpack.i.l.bf16 %v3880_v37  ;;  %v3882_v51 = vunpack.i.h.bf16 %v3880_v37  ;;  %v3886_v40 = vunpack.i.l.bf16 %v3885_v41  ;;  %4004 = vrot.lane.b32.xlu0 %v4003_v34, %s4240_s18  ;;  %v2187_v48 = vsel %vm1117_vm8, %v2166_v29, %v3877_v36 }
 0x335   : > { %v3887_v59 = vunpack.i.h.bf16 %v3885_v41  ;;  %v2331_v38 = vsel %vm814_vm4, %v2328_v33, %v2330_v42  ;;  %v2333_v7 = vsel %vm814_vm4, %v2330_v42, %v2332_v0  ;;  %v4008_v39 = vpack.i.bf16 %v2262_v60, %v2260_v58 }
 0x336   : > { %v2207_v32 = vsel %vm1139_vm9, %v2186_v43, %v3881_v15  ;;  %v2208_v50 = vsel %vm1139_vm9, %v2187_v48, %v3882_v51  ;;  %v2263_v62 = vrot.slane %v5688_v47, 6  ;;  %v2265_v30 = vrot.slane %v5696_v20, 6 }
 0x337   : > { %v5722_v18 = vsel %vm1161_vm10, %v2207_v32, %v3886_v40  ;;  %3999 = vrot.lane.b32.xlu1 %v3998_v52, %s4241_s23  ;;  %v4013_v33 = vpack.i.bf16 %v2333_v7, %v2331_v38  ;;  %v2402_v54 = vsel %vm428_vm3, %v2399_v8, %v2401_v14  ;;  %v5745_v5 = vsel %vm1161_vm10, %v2208_v50, %v3887_v59 }
 0x338   : > { %v2403_v56 = vrot.slane %v5722_v18, 2  ;;  %4009 = vrot.lane.b32.xlu0 %v4008_v39, %s4228_s20  ;;  %v2336_v63 = vrot.slane %v5722_v18, 4  ;;  %v2650_v57 = vsel %vm535_vm0, %v4137_v13, 0  ;;  %v2334_v25 = vrot.slane %v5708_v2, 4 }
 0x339   : > { %v2264_v28 = vsel %vm535_vm0, %v2261_v22, %v2263_v62  ;;  %v2266_v8 = vsel %vm535_vm0, %v2263_v62, %v2265_v30  ;;  %3276 = vmatpush3.bf16.msra.mxu1 %v2650_v57  ;;  %v4018_v3 = vpack.i.bf16 %v5745_v5, %v5722_v18  ;;  %v2405_v58 = vrot.slane %v5745_v5, 2 }
 0x33a   : > { %v2404_v21 = vsel %vm428_vm3, %v2401_v14, %v2403_v56  ;;  %3305 = vmatprep.subr.bf16.mxu1 %v4227_v1  ;;  %v2337_v37 = vsel %vm814_vm4, %v2334_v25, %v2336_v63  ;;  %v4028_v61 = vpack.i.bf16 %v2266_v8, %v2264_v28  ;;  %v2335_v36 = vsel %vm814_vm4, %v2332_v0, %v2334_v25 }
 0x33b   : > { %v4023_v49 = vpack.i.bf16 %v2404_v21, %v2402_v54  ;;  %4014 = vrot.lane.b32.xlu1 %v4013_v33, %s4239_s17  ;;  %v4033_v51 = vpack.i.bf16 %v2337_v37, %v2335_v36  ;;  %v2269_v7 = vrot.slane %v5722_v18, 6  ;;  %v2267_v33 = vrot.slane %v5708_v2, 6 }
 0x33c   : > { %v2406_v54 = vsel %vm428_vm3, %v2403_v56, %v2405_v58 }
 0x33d   : > { %4024 = vrot.lane.b32.xlu0 %v4023_v49, %s4240_s18  ;;  %v2270_v25 = vsel %vm535_vm0, %v2267_v33, %v2269_v7  ;;  %v2268_v8 = vsel %vm535_vm0, %v2265_v30, %v2267_v33 }
 0x33f   : > { %v3890_v42 = vpop.permute.xlu0 %3889  ;;  %v3895_v35 = vpop.permute.xlu1 %3894  ;;  %4019 = vrot.lane.b32.xlu1 %v4018_v3, %s4241_s23  ;;  %v4048_v3 = vpack.i.bf16 %v2270_v25, %v2268_v8 }
 0x340   : > { %v3892_v26 = vunpack.i.h.bf16 %v3890_v42  ;;  %v3891_v17 = vunpack.i.l.bf16 %v3890_v42  ;;  %v3897_v41 = vunpack.i.h.bf16 %v3895_v35  ;;  %v3896_v22 = vunpack.i.l.bf16 %v3895_v35 }
 0x341   : > { %4029 = vrot.lane.b32.xlu0 %v4028_v61, %s4228_s20 }
 0x342   : > { %v2168_v19 = vsel %vm1095_vm7, %v5461_v31, %v3892_v26  ;;  %v2167_v29 = vsel %vm1095_vm7, %v5433_v45, %v3891_v17  ;;  %v2338_v31 = vrot.slane %v5745_v5, 4 }
 0x343   : > { %v3900_v15 = vpop.permute.xlu0 %3899  ;;  %v3905_v43 = vpop.permute.xlu1 %3904  ;;  %v2189_v14 = vsel %vm1117_vm8, %v2168_v19, %v3897_v41  ;;  %v2188_v52 = vsel %vm1117_vm8, %v2167_v29, %v3896_v22  ;;  %4034 = vrot.lane.b32.xlu1 %v4033_v51, %s4239_s17 }
 0x344   : > { %v3902_v40 = vunpack.i.h.bf16 %v3900_v15  ;;  %v3901_v34 = vunpack.i.l.bf16 %v3900_v15  ;;  %v3907_v32 = vunpack.i.h.bf16 %v3905_v43  ;;  %v3906_v60 = vunpack.i.l.bf16 %v3905_v43 }
 0x345   : > { %v2339_v13 = vsel %vm814_vm4, %v2336_v63, %v2338_v31 }
 0x346   : > { %v2209_v45 = vsel %vm1139_vm9, %v2188_v52, %v3901_v34  ;;  %v2210_v0 = vsel %vm1139_vm9, %v2189_v14, %v3902_v40  ;;  %v2271_v52 = vrot.slane %v5745_v5, 6 }
 0x347   : > { %v5775_v48 = vsel %vm1161_vm10, %v2209_v45, %v3906_v60  ;;  %v5778_v59 = vsel %vm1161_vm10, %v2210_v0, %v3907_v32 }
 0x348   : > { %v2340_v38 = vrot.slane %v5775_v48, 4  ;;  %v2407_v50 = vrot.slane %v5775_v48, 2  ;;  %v4038_v39 = vpack.i.bf16 %v5778_v59, %v5775_v48  ;;  %v2342_v43 = vrot.slane %v5778_v59, 4 }
 0x349   : > { %v2409_v51 = vrot.slane %v5778_v59, 2  ;;  %v2273_v32 = vrot.slane %v5775_v48, 6 }
 0x34a   : > { %v2341_v62 = vsel %vm814_vm4, %v2338_v31, %v2340_v38  ;;  %4039 = vrot.lane.b32.xlu1 %v4038_v39, %s4241_s23  ;;  %v2408_v21 = vsel %vm428_vm3, %v2405_v58, %v2407_v50  ;;  %v2343_v58 = vsel %vm814_vm4, %v2340_v38, %v2342_v43 }
 0x34b   : > { %v4053_v49 = vpack.i.bf16 %v2341_v62, %v2339_v13  ;;  %v4043_v57 = vpack.i.bf16 %v2408_v21, %v2406_v54  ;;  %v2410_v45 = vsel %vm428_vm3, %v2407_v50, %v2409_v51  ;;  %v2274_v33 = vsel %vm535_vm0, %v2271_v52, %v2273_v32 }
 0x34c   : > { %v2272_v54 = vsel %vm535_vm0, %v2269_v7, %v2271_v52 }
 0x34d   : > { %4044 = vrot.lane.b32.xlu0 %v4043_v57, %s4240_s18  ;;  %v4068_v50 = vpack.i.bf16 %v2274_v33, %v2272_v54 }
 0x34e   : > { %4054 = vrot.lane.b32.xlu1 %v4053_v49, %s4239_s17 }
 0x34f   : > { %v3910_v28 = vpop.permute.xlu0 %3909  ;;  %v3915_v63 = vpop.permute.xlu1 %3914 }
 0x350   : > { %v3912_v42 = vunpack.i.h.bf16 %v3910_v28  ;;  %v3911_v35 = vunpack.i.l.bf16 %v3910_v28  ;;  %v3917_v56 = vunpack.i.h.bf16 %v3915_v63  ;;  %v3916_v26 = vunpack.i.l.bf16 %v3915_v63 }
 0x351   : > { %4049 = vrot.lane.b32.xlu0 %v4048_v3, %s4228_s20 }
 0x352   : > { %v2170_v17 = vsel %vm1095_vm7, %v5489_v9, %v3912_v42  ;;  %v2169_v37 = vsel %vm1095_vm7, %v5464_v23, %v3911_v35 }
 0x353   : > { %v3920_v41 = vpop.permute.xlu0 %3919  ;;  %v3925_v22 = vpop.permute.xlu1 %3924  ;;  %v2191_v30 = vsel %vm1117_vm8, %v2170_v17, %v3917_v56  ;;  %v2190_v15 = vsel %vm1117_vm8, %v2169_v37, %v3916_v26 }
 0x354   : > { %v3922_v61 = vunpack.i.h.bf16 %v3920_v41  ;;  %v3921_v19 = vunpack.i.l.bf16 %v3920_v41  ;;  %v3927_v29 = vunpack.i.h.bf16 %v3925_v22  ;;  %v3926_v36 = vunpack.i.l.bf16 %v3925_v22 }
 0x356   : > { %v2211_v9 = vsel %vm1139_vm9, %v2190_v15, %v3921_v19  ;;  %v2212_v23 = vsel %vm1139_vm9, %v2191_v30, %v3922_v61  ;;  %v2275_v30 = vrot.slane %v5778_v59, 6 }
 0x357   : > { %v5809_v40 = vsel %vm1161_vm10, %v2211_v9, %v3926_v36  ;;  %v5812_v34 = vsel %vm1161_vm10, %v2212_v23, %v3927_v29 }
 0x358   : > { %v2344_v60 = vrot.slane %v5809_v40, 4  ;;  %v2411_v14 = vrot.slane %v5809_v40, 2  ;;  %v4058_v31 = vpack.i.bf16 %v5812_v34, %v5809_v40  ;;  %v2413_v41 = vrot.slane %v5812_v34, 2 }
 0x359   : > { %v2277_v15 = vrot.slane %v5809_v40, 6 }
 0x35a   : > { %v2412_v0 = vsel %vm428_vm3, %v2409_v51, %v2411_v14  ;;  %v2345_v39 = vsel %vm814_vm4, %v2342_v43, %v2344_v60  ;;  %4059 = vrot.lane.b32.xlu1 %v4058_v31, %s4241_s23 }
 0x35b   : > { %v4063_v13 = vpack.i.bf16 %v2412_v0, %v2410_v45  ;;  %v4073_v62 = vpack.i.bf16 %v2345_v39, %v2343_v58  ;;  %v2414_v0 = vsel %vm428_vm3, %v2411_v14, %v2413_v41 }
 0x35d   : > { %4064 = vrot.lane.b32.xlu0 %v4063_v13, %s4240_s18 }
 0x35e   : > { %4074 = vrot.lane.b32.xlu1 %v4073_v62, %s4239_s17 }
 0x361   : > { %4069 = vrot.lane.b32.xlu0 %v4068_v50, %s4228_s20 }
 0x367   : > { %v3930_v38 = vpop.permute.xlu0 %3929  ;;  %v3935_v21 = vpop.permute.xlu1 %3934 }
 0x368   : > { %v3932_v49 = vunpack.i.h.bf16 %v3930_v38  ;;  %v3931_v57 = vunpack.i.l.bf16 %v3930_v38  ;;  %v3937_v25 = vunpack.i.h.bf16 %v3935_v21  ;;  %v3936_v28 = vunpack.i.l.bf16 %v3935_v21 }
 0x36a   : > { %v2172_v63 = vsel %vm1095_vm7, %v5516_v16, %v3932_v49  ;;  %v2171_v8 = vsel %vm1095_vm7, %v5492_v11, %v3931_v57  ;;  %v2346_v16 = vrot.slane %v5812_v34, 4  ;;  %v2278_v57 = vsel %vm535_vm0, %v2275_v30, %v2277_v15 }
 0x36b   : > { %v3940_v42 = vpop.permute.xlu0 %3939  ;;  %v3945_v35 = vpop.permute.xlu1 %3944  ;;  %v2193_v17 = vsel %vm1117_vm8, %v2172_v63, %v3937_v25  ;;  %v2192_v37 = vsel %vm1117_vm8, %v2171_v8, %v3936_v28 }
 0x36c   : > { %v3942_v7 = vunpack.i.h.bf16 %v3940_v42  ;;  %v3941_v3 = vunpack.i.l.bf16 %v3940_v42  ;;  %v3947_v56 = vunpack.i.h.bf16 %v3945_v35  ;;  %v3946_v26 = vunpack.i.l.bf16 %v3945_v35 }
 0x36d   : > { %v2347_v38 = vsel %vm814_vm4, %v2344_v60, %v2346_v16  ;;  %v2276_v42 = vsel %vm535_vm0, %v2273_v32, %v2275_v30 }
 0x36e   : > { %v2213_v22 = vsel %vm1139_vm9, %v2192_v37, %v3941_v3  ;;  %v2214_v61 = vsel %vm1139_vm9, %v2193_v17, %v3942_v7  ;;  %v4088_v17 = vpack.i.bf16 %v2278_v57, %v2276_v42 }
 0x36f   : > { %v2234_v11 = vsel %vm1161_vm10, %v2213_v22, %v3946_v26  ;;  %v5844_v19 = vsel %vm1161_vm10, %v2214_v61, %v3947_v56  ;;  %v3950_v29 = vpop.permute.xlu0 %3949  ;;  %v3955_v36 = vpop.permute.xlu1 %3954  ;;  %v2279_v22 = vrot.slane %v5812_v34, 6 }
 0x370   : > { %v2348_v43 = vrot.slane %v2234_v11, 4  ;;  %v2415_v51 = vrot.slane %v2234_v11, 2  ;;  %v3952_v9 = vunpack.i.h.bf16 %v3950_v29  ;;  %v3951_v23 = vunpack.i.l.bf16 %v3950_v29 }
 0x371   : > { %v3957_v52 = vunpack.i.h.bf16 %v3955_v36  ;;  %v3956_v31 = vunpack.i.l.bf16 %v3955_v36  ;;  %v4078_v45 = vpack.i.bf16 %v5844_v19, %v2234_v11  ;;  %v2350_v35 = vrot.slane %v5844_v19, 4 }
 0x372   : > { %v2416_v58 = vsel %vm428_vm3, %v2413_v41, %v2415_v51  ;;  %v2349_v39 = vsel %vm814_vm4, %v2346_v16, %v2348_v43  ;;  %v2174_v13 = vsel %vm1095_vm7, %v5538_v12, %v3952_v9  ;;  %v2173_v62 = vsel %vm1095_vm7, %v5522_v6, %v3951_v23 }
 0x373   : > { %v3960_v33 = vpop.permute.xlu0 %3959  ;;  %v3965_v54 = vpop.permute.xlu1 %3964  ;;  %v4083_v50 = vpack.i.bf16 %v2416_v58, %v2414_v0  ;;  %4079 = vrot.lane.b32.xlu1 %v4078_v45, %s4241_s23  ;;  %v4093_v14 = vpack.i.bf16 %v2349_v39, %v2347_v38  ;;  %v2195_v25 = vsel %vm1117_vm8, %v2174_v13, %v3957_v52  ;;  %v2194_v28 = vsel %vm1117_vm8, %v2173_v62, %v3956_v31 }
 0x374   : > { %v3962_v21 = vunpack.i.h.bf16 %v3960_v33  ;;  %v3961_v49 = vunpack.i.l.bf16 %v3960_v33  ;;  %v3967_v12 = vunpack.i.h.bf16 %v3965_v54  ;;  %v3966_v63 = vunpack.i.l.bf16 %v3965_v54 }
 0x375   : > { %4084 = vrot.lane.b32.xlu0 %v4083_v50, %s4240_s18  ;;  %v2417_v6 = vrot.slane %v5844_v19, 2  ;;  %v2351_v36 = vsel %vm814_vm4, %v2348_v43, %v2350_v35  ;;  %v2280_v23 = vsel %vm535_vm0, %v2277_v15, %v2279_v22  ;;  %vm2538_vm4 = vcmask 490496  }
 0x376   : > { %v2215_v8 = vsel %vm1139_vm9, %v2194_v28, %v3961_v49  ;;  %v2216_v60 = vsel %vm1139_vm9, %v2195_v25, %v3962_v21  ;;  %v4113_v45 = vpack.i.bf16 %v2350_v35, %v2351_v36  ;;  %v4108_v43 = vpack.i.bf16 %v2279_v22, %v2280_v23 }
 0x377   : > { %v2236_v7 = vsel %vm1161_vm10, %v2215_v8, %v3966_v63  ;;  %v2237_v3 = vsel %vm1161_vm10, %v2216_v60, %v3967_v12  ;;  %v1781_v56 = vpop.permute.xlu0 %1780  ;;  %v1885_v26 = vpop.permute.xlu1 %1884  ;;  %4094 = vrot.lane.b32.xlu1 %v4093_v14, %s4239_s17  ;;  %v2418_v61 = vsel %vm428_vm3, %v2415_v51, %v2417_v6 }
 0x378   : > { %v4098_v37 = vpack.i.bf16 %v2237_v3, %v2236_v7  ;;  %v2419_v41 = vrot.slane %v2236_v7, 2  ;;  %v2421_v16 = vrot.slane %v2237_v3, 2  ;;  %v2156_v25 = vsel %vm1095_vm7, %v5564_v44, %v1781_v56 }
 0x379   : > { %4089 = vrot.lane.b32.xlu0 %v4088_v17, %s4228_s20  ;;  %v2177_v63 = vsel %vm1117_vm8, %v2156_v25, %v1885_v26 }
 0x37a   : > { %v2420_v32 = vsel %vm428_vm3, %v2417_v6, %v2419_v41  ;;  %v2422_v39 = vsel %vm428_vm3, %v2419_v41, %v2421_v16  ;;  %vm2523_vm3 = vcmask 326656  }
 0x37b   : > { %v3970_v11 = vpop.permute.xlu0 %3969  ;;  %v3975_v19 = vpop.permute.xlu1 %3974  ;;  %v4103_v29 = vpack.i.bf16 %v2420_v32, %v2418_v61  ;;  %4099 = vrot.lane.b32.xlu1 %v4098_v37, %s4241_s23  ;;  %v4118_v49 = vpack.i.bf16 %v2421_v16, %v2422_v39 }
 0x37c   : > { %v3972_v30 = vunpack.i.h.bf16 %v3970_v11  ;;  %v3971_v9 = vunpack.i.l.bf16 %v3970_v11  ;;  %v3977_v52 = vunpack.i.h.bf16 %v3975_v19  ;;  %v3976_v34 = vunpack.i.l.bf16 %v3975_v19 }
 0x37d   : > { %4104 = vrot.lane.b32.xlu0 %v4103_v29, %s4240_s18 }
 0x37e   : > { %v2176_v51 = vsel %vm1095_vm7, %v5578_v10, %v3972_v30  ;;  %v2175_v31 = vsel %vm1095_vm7, %v5546_v27, %v3971_v9  ;;  %vm2627_vm7 = vcmask 818176  }
 0x37f   : > { %v3980_v0 = vpop.permute.xlu0 %3979  ;;  %v3985_v58 = vpop.permute.xlu1 %3984  ;;  %4114 = vrot.lane.b32.xlu1 %v4113_v45, %s4239_s17  ;;  %v2197_v54 = vsel %vm1117_vm8, %v2176_v51, %v3977_v52  ;;  %v2196_v50 = vsel %vm1117_vm8, %v2175_v31, %v3976_v34 }
 0x380   : > { %v3982_v13 = vunpack.i.h.bf16 %v3980_v0  ;;  %v3981_v15 = vunpack.i.l.bf16 %v3980_v0  ;;  %v3987_v62 = vunpack.i.h.bf16 %v3985_v58  ;;  %v3986_v33 = vunpack.i.l.bf16 %v3985_v58 }
 0x381   : > { %4109 = vrot.lane.b32.xlu0 %v4108_v43, %s4228_s20  ;;  %s4246_s20 = smov 88  }
 0x382   : > { %v2217_v27 = vsel %vm1139_vm9, %v2196_v50, %v3981_v15  ;;  %v2218_v10 = vsel %vm1139_vm9, %v2197_v54, %v3982_v13 }
 0x383   : > { %v2238_v38 = vsel %vm1161_vm10, %v2217_v27, %v3986_v33  ;;  %v2239_v21 = vsel %vm1161_vm10, %v2218_v10, %v3987_v62  ;;  %v1990_v57 = vpop.permute.xlu0 %1989  ;;  %v2094_v12 = vpop.permute.xlu1 %2093 }
 0x384   : > { %v4123_v14 = vpack.i.bf16 %v2239_v21, %v2238_v38  ;;  %v2198_v6 = vsel %vm1139_vm9, %v2177_v63, %v1990_v57  ;;  %vm2944_vm9 = vcmask 719872  }
 0x385   : > { %4119 = vrot.lane.b32.xlu0 %v4118_v49, %s4240_s18  ;;  %v2219_v35 = vsel %vm1161_vm10, %v2198_v6, %v2094_v12  ;;  %s4242_s18 = smov 48  }
 0x386   : > { %4124 = vrot.lane.b32.xlu1 %v4123_v14, %s4241_s23 }
 0x395   : > { %v3990_v28 = vpop.permute.xlu0 %3989 }
 0x396   : > { %v3992_v8 = vunpack.i.h.bf16 %v3990_v28  ;;  %v3991_v60 = vunpack.i.l.bf16 %v3990_v28 }
 0x398   : > { %v2510_v17 = vsel %vm1183_vm11, %v5623_v24, %v3992_v8  ;;  %v2509_v37 = vsel %vm1183_vm11, %v2219_v35, %v3991_v60 }
 0x3a5   : > { %v3995_v42 = vpop.permute.xlu1 %3994 }
 0x3a6   : > { %v3997_v7 = vunpack.i.h.bf16 %v3995_v42  ;;  %v3996_v3 = vunpack.i.l.bf16 %v3995_v42  ;;  %v4005_v44 = vpop.permute.xlu0 %4004 }
 0x3a7   : > { %v4007_v41 = vunpack.i.h.bf16 %v4005_v44  ;;  %v4006_v22 = vunpack.i.l.bf16 %v4005_v44 }
 0x3a8   : > { %v2524_v56 = vsel %vm2523_vm3, %v2509_v37, %v3996_v3  ;;  %v2525_v26 = vsel %vm2523_vm3, %v2510_v17, %v3997_v7 }
 0x3a9   : > { %v4000_v61 = vpop.permute.xlu1 %3999  ;;  %v2539_v11 = vsel %vm2538_vm4, %v2524_v56, %v4006_v22  ;;  %v2540_v19 = vsel %vm2538_vm4, %v2525_v26, %v4007_v41 }
 0x3aa   : > { %v4002_v32 = vunpack.i.h.bf16 %v4000_v61  ;;  %v4001_v16 = vunpack.i.l.bf16 %v4000_v61  ;;  %v4010_v29 = vpop.permute.xlu0 %4009 }
 0x3ab   : > { %v4012_v30 = vunpack.i.h.bf16 %v4010_v29  ;;  %v4011_v9 = vunpack.i.l.bf16 %v4010_v29 }
 0x3ac   : > { %v2554_v24 = vsel %vm2553_vm5, %v2539_v11, %v4001_v16  ;;  %v2555_v36 = vsel %vm2553_vm5, %v2540_v19, %v4002_v32 }
 0x3ad   : > { %v2568_v23 = vpack.c.bf16 %v2555_v36, %v2554_v24  ;;  %v4015_v52 = vpop.permute.xlu1 %4014  ;;  %v2512_v31 = vsel %vm1183_vm11, %v5644_v46, %v4012_v30  ;;  %v2511_v45 = vsel %vm1183_vm11, %v5629_v53, %v4011_v9 }
 0x3ae   : > { %v4017_v34 = vunpack.i.h.bf16 %v4015_v52  ;;  %v4016_v51 = vunpack.i.l.bf16 %v4015_v52 }
 0x3af   : > { %v4025_v0 = vpop.permute.xlu0 %4024  ;;  %3278 = vmatmul.mubr.msk.bf16.vlgmr.msra.gmra.mrb[0].mxu1 %vm2627_vm7, %v2568_v23 }
 0x3b0   : > { %v2526_v58 = vsel %vm2523_vm3, %v2511_v45, %v4016_v51  ;;  %v2527_v43 = vsel %vm2523_vm3, %v2512_v31, %v4017_v34  ;;  %v4027_v39 = vunpack.i.h.bf16 %v4025_v0  ;;  %v4026_v13 = vunpack.i.l.bf16 %v4025_v0  ;;  %3281 = vmatprep.mubr.msk.bf16.mxu1 %vm4236_vm6, %v4227_v1 }
 0x3b1   : > { %v4020_v15 = vpop.permute.xlu1 %4019 }
 0x3b2   : > { %v2541_v62 = vsel %vm2538_vm4, %v2526_v58, %v4026_v13  ;;  %v2542_v46 = vsel %vm2538_vm4, %v2527_v43, %v4027_v39  ;;  %v4022_v33 = vunpack.i.h.bf16 %v4020_v15  ;;  %v4021_v54 = vunpack.i.l.bf16 %v4020_v15 }
 0x3b3   : > { %v4030_v10 = vpop.permute.xlu0 %4029 }
 0x3b4   : > { %v2556_v53 = vsel %vm2553_vm5, %v2541_v62, %v4021_v54  ;;  %v2557_v50 = vsel %vm2553_vm5, %v2542_v46, %v4022_v33  ;;  %v4032_v38 = vunpack.i.h.bf16 %v4030_v10  ;;  %v4031_v21 = vunpack.i.l.bf16 %v4030_v10 }
 0x3b5   : > { %v2569_v27 = vpack.c.bf16 %v2557_v50, %v2556_v53  ;;  %v4035_v49 = vpop.permute.xlu1 %4034 }
 0x3b6   : > { %v4037_v14 = vunpack.i.h.bf16 %v4035_v49  ;;  %v4036_v57 = vunpack.i.l.bf16 %v4035_v49  ;;  %v2514_v25 = vsel %vm1183_vm11, %v5685_v55, %v4032_v38  ;;  %v2513_v28 = vsel %vm1183_vm11, %v5663_v4, %v4031_v21 }
 0x3b7   : > { %3282 = vmatmul.mubr.msk.bf16.gmra.mrb[4].mxu1 %vm2627_vm7, %v2569_v27 }
 0x3b8   : > { %3285 = vmatprep.mubr.msk.bf16.mxu1 %vm4236_vm6, %v4227_v1  ;;  %v2528_v60 = vsel %vm2523_vm3, %v2513_v28, %v4036_v57  ;;  %v2529_v42 = vsel %vm2523_vm3, %v2514_v25, %v4037_v14 }
 0x3bc   : > { %v4040_v12 = vpop.permute.xlu1 %4039 }
 0x3bd   : > { %v4042_v35 = vunpack.i.h.bf16 %v4040_v12  ;;  %v4041_v7 = vunpack.i.l.bf16 %v4040_v12 }
 0x3bf   : > { %v4045_v63 = vpop.permute.xlu0 %4044 }
 0x3c0   : > { %v4047_v6 = vunpack.i.h.bf16 %v4045_v63  ;;  %v4046_v8 = vunpack.i.l.bf16 %v4045_v63  ;;  %v4055_v56 = vpop.permute.xlu1 %4054 }
 0x3c1   : > { %v4057_v16 = vunpack.i.h.bf16 %v4055_v56  ;;  %v4056_v11 = vunpack.i.l.bf16 %v4055_v56 }
 0x3c2   : > { %v2543_v3 = vsel %vm2538_vm4, %v2528_v60, %v4046_v8  ;;  %v2544_v17 = vsel %vm2538_vm4, %v2529_v42, %v4047_v6 }
 0x3c3   : > { %v2558_v37 = vsel %vm2553_vm5, %v2543_v3, %v4041_v7  ;;  %v2559_v55 = vsel %vm2553_vm5, %v2544_v17, %v4042_v35  ;;  %v4050_v4 = vpop.permute.xlu0 %4049 }
 0x3c4   : > { %v2570_v44 = vpack.c.bf16 %v2559_v55, %v2558_v37  ;;  %v4052_v26 = vunpack.i.h.bf16 %v4050_v4  ;;  %v4051_v41 = vunpack.i.l.bf16 %v4050_v4 }
 0x3c6   : > { %3286 = vmatmul.mubr.msk.bf16.gmra.mrb[8].mxu1 %vm2627_vm7, %v2570_v44  ;;  %v2516_v22 = vsel %vm1183_vm11, %v5696_v20, %v4052_v26  ;;  %v2515_v61 = vsel %vm1183_vm11, %v5688_v47, %v4051_v41 }
 0x3c7   : > { %3289 = vmatprep.mubr.msk.bf16.mxu1 %vm4236_vm6, %v4227_v1  ;;  %v2530_v9 = vsel %vm2523_vm3, %v2515_v61, %v4056_v11  ;;  %v2531_v23 = vsel %vm2523_vm3, %v2516_v22, %v4057_v16 }
 0x3cc   : > { %v4060_v32 = vpop.permute.xlu1 %4059 }
 0x3cd   : > { %v4062_v36 = vunpack.i.h.bf16 %v4060_v32  ;;  %v4061_v30 = vunpack.i.l.bf16 %v4060_v32 }
 0x3cf   : > { %v4065_v19 = vpop.permute.xlu0 %4064 }
 0x3d0   : > { %v4067_v29 = vunpack.i.h.bf16 %v4065_v19  ;;  %v4066_v24 = vunpack.i.l.bf16 %v4065_v19  ;;  %v4075_v45 = vpop.permute.xlu1 %4074 }
 0x3d1   : > { %v4077_v15 = vunpack.i.h.bf16 %v4075_v45  ;;  %v4076_v62 = vunpack.i.l.bf16 %v4075_v45 }
 0x3d2   : > { %v2545_v52 = vsel %vm2538_vm4, %v2530_v9, %v4066_v24  ;;  %v2546_v34 = vsel %vm2538_vm4, %v2531_v23, %v4067_v29 }
 0x3d3   : > { %v2560_v20 = vsel %vm2553_vm5, %v2545_v52, %v4061_v30  ;;  %v2561_v47 = vsel %vm2553_vm5, %v2546_v34, %v4062_v36  ;;  %v4070_v31 = vpop.permute.xlu0 %4069 }
 0x3d4   : > { %v2571_v51 = vpack.c.bf16 %v2561_v47, %v2560_v20  ;;  %v4072_v0 = vunpack.i.h.bf16 %v4070_v31  ;;  %v4071_v58 = vunpack.i.l.bf16 %v4070_v31 }
 0x3d6   : > { %3290 = vmatmul.mubr.msk.bf16.gmra.mrb[12].mxu1 %vm2627_vm7, %v2571_v51  ;;  %v2518_v43 = vsel %vm1183_vm11, %v5722_v18, %v4072_v0  ;;  %v2517_v39 = vsel %vm1183_vm11, %v5708_v2, %v4071_v58 }
 0x3d7   : > { %3293 = vmatprep.mubr.msk.bf16.mxu1 %vm4236_vm6, %v4227_v1  ;;  %v2532_v27 = vsel %vm2523_vm3, %v2517_v39, %v4076_v62  ;;  %v2533_v10 = vsel %vm2523_vm3, %v2518_v43, %v4077_v15 }
 0x3e5   : > { %v4080_v13 = vpop.permute.xlu1 %4079 }
 0x3e6   : > { %v4082_v53 = vunpack.i.h.bf16 %v4080_v13  ;;  %v4081_v50 = vunpack.i.l.bf16 %v4080_v13 }
 0x3e7   : > { %v4085_v46 = vpop.permute.xlu0 %4084 }
 0x3e8   : > { %v4087_v33 = vunpack.i.h.bf16 %v4085_v46  ;;  %v4086_v54 = vunpack.i.l.bf16 %v4085_v46 }
 0x3e9   : > { %v4095_v18 = vpop.permute.xlu1 %4094 }
 0x3ea   : > { %v2547_v38 = vsel %vm2538_vm4, %v2532_v27, %v4086_v54  ;;  %v2548_v21 = vsel %vm2538_vm4, %v2533_v10, %v4087_v33  ;;  %v4097_v8 = vunpack.i.h.bf16 %v4095_v18  ;;  %v4096_v60 = vunpack.i.l.bf16 %v4095_v18 }
 0x3eb   : > { %v4090_v49 = vpop.permute.xlu0 %4089  ;;  %v2562_v2 = vsel %vm2553_vm5, %v2547_v38, %v4081_v50  ;;  %v2563_v14 = vsel %vm2553_vm5, %v2548_v21, %v4082_v53 }
 0x3ec   : > { %v4092_v57 = vunpack.i.h.bf16 %v4090_v49  ;;  %v4091_v25 = vunpack.i.l.bf16 %v4090_v49  ;;  %v2572_v28 = vpack.c.bf16 %v2563_v14, %v2562_v2  ;;  %v5997_v14 = vld [vmem:[%s6128_s4] ss:$0 sm:$0xff] }
 0x3ed   : > { %v4100_v6 = vpop.permute.xlu1 %4099 }
 0x3ee   : > { %v2520_v12 = vsel %vm1183_vm11, %v5775_v48, %v4092_v57  ;;  %v2519_v63 = vsel %vm1183_vm11, %v5745_v5, %v4091_v25  ;;  %3294 = vmatmul.mubr.msk.bf16.gmra.mrb[16].mxu1 %vm2627_vm7, %v2572_v28  ;;  %v4102_v3 = vunpack.i.h.bf16 %v4100_v6  ;;  %v4101_v17 = vunpack.i.l.bf16 %v4100_v6  ;;  %v4138_v57 = vld [vmem:[%s6129_s5] sm:$0xff]  }
 0x3ef   : > { %v4105_v42 = vpop.permute.xlu0 %4104  ;;  %3297 = vmatprep.mubr.msk.bf16.mxu1 %vm4236_vm6, %v4227_v1  ;;  %v2534_v37 = vsel %vm2523_vm3, %v2519_v63, %v4096_v60  ;;  %v2535_v48 = vsel %vm2523_vm3, %v2520_v12, %v4097_v8  ;;  %3306 = vmatpush3.bf16.msra.mxu1 %v4138_v57 }
 0x3f0   : > { %v4107_v35 = vunpack.i.h.bf16 %v4105_v42  ;;  %v4106_v7 = vunpack.i.l.bf16 %v4105_v42  ;;  %3307 = vmatprep.subr.bf16.mxu1 %v4227_v1 }
 0x3f1   : > { %v4115_v26 = vpop.permute.xlu1 %4114 }
 0x3f2   : > { %v2549_v55 = vsel %vm2538_vm4, %v2534_v37, %v4106_v7  ;;  %v2550_v5 = vsel %vm2538_vm4, %v2535_v48, %v4107_v35  ;;  %v4117_v11 = vunpack.i.h.bf16 %v4115_v26  ;;  %v4116_v19 = vunpack.i.l.bf16 %v4115_v26 }
 0x3f3   : > { %v4110_v44 = vpop.permute.xlu0 %4109  ;;  %v2564_v4 = vsel %vm2553_vm5, %v2549_v55, %v4101_v17  ;;  %v2565_v56 = vsel %vm2553_vm5, %v2550_v5, %v4102_v3 }
 0x3f4   : > { %v4112_v41 = vunpack.i.h.bf16 %v4110_v44  ;;  %v4111_v22 = vunpack.i.l.bf16 %v4110_v44  ;;  %v2573_v61 = vpack.c.bf16 %v2565_v56, %v2564_v4 }
 0x3f6   : > { %v2522_v32 = vsel %vm1183_vm11, %v5809_v40, %v4112_v41  ;;  %v2521_v16 = vsel %vm1183_vm11, %v5778_v59, %v4111_v22  ;;  %3298 = vmatmul.mubr.msk.bf16.gmra.mrb[20].mxu1 %vm2627_vm7, %v2573_v61  ;;  %vm2948_vm11 = vcmask 850944  }
 0x3f7   : > { %v4120_v29 = vpop.permute.xlu0 %4119  ;;  %3301 = vmatprep.mubr.msk.bf16.mxu1 %vm4236_vm6, %v4227_v1  ;;  %v2536_v9 = vsel %vm2523_vm3, %v2521_v16, %v4116_v19  ;;  %v2537_v23 = vsel %vm2523_vm3, %v2522_v32, %v4117_v11  ;;  %v4139_v16 = vld [vmem:[%s6129_s5 + $0x8] sm:$0xff]  }
 0x3f8   : > { %v4122_v24 = vunpack.i.h.bf16 %v4120_v29  ;;  %v4121_v36 = vunpack.i.l.bf16 %v4120_v29  ;;  %v4125_v30 = vpop.permute.xlu1 %4124  ;;  %3308 = vmatpush3.bf16.msra.mxu1 %v4139_v16 }
 0x3f9   : > { %v4127_v52 = vunpack.i.h.bf16 %v4125_v30  ;;  %v4126_v40 = vunpack.i.l.bf16 %v4125_v30  ;;  %3309 = vmatprep.subr.bf16.mxu1 %v4227_v1 }
 0x3fa   : > { %v2551_v34 = vsel %vm2538_vm4, %v2536_v9, %v4121_v36  ;;  %v2552_v59 = vsel %vm2538_vm4, %v2537_v23, %v4122_v24  ;;  %v4140_v23 = vld [vmem:[%s6129_s5 + $0x10] sm:$0xff]  }
 0x3fb   : > { %v2566_v20 = vsel %vm2553_vm5, %v2551_v34, %v4126_v40  ;;  %v2567_v47 = vsel %vm2553_vm5, %v2552_v59, %v4127_v52  ;;  %v4141_v59 = vld [vmem:[%s6129_s5 + $0x18] sm:$0xff]  }
 0x3fc   : > { %v2574_v51 = vpack.c.bf16 %v2567_v47, %v2566_v20  ;;  %3310 = vmatpush3.bf16.msra.mxu1 %v4140_v23 }
 0x3fd   : > { %3311 = vmatprep.subr.bf16.mxu1 %v4227_v1 }
 0x3fe   : > { %3302 = vmatmul.mubr.msk.bf16.gmra.mrb[24].mxu1 %vm2627_vm7, %v2574_v51 }
 0x3ff   : > { %3321 = vmatprep.mubr.msk.bf16.mxu1 %vm4236_vm6, %v4227_v1  ;;  %vm2939_vm6 = vcmask 523264  }
 0x400   : > { %3312 = vmatpush3.bf16.msra.mxu1 %v4141_v59 }
 0x401   : > { %3313 = vmatprep.subr.bf16.mxu1 %v4227_v1 }
 0x482   : > { %v2686_v31 = vpop.f32.mrb[0].mxu1 }
 0x483   : > { %v3279_v45 = vpop.f32.mrb[1].mxu1  ;;  %v2755_v58 = vrot.slane %v2686_v31, 1 }
 0x484   : > { %v2689_v0 = vpop.f32.mrb[2].mxu1 }
 0x485   : > { %v2756_v43 = vrot.slane %v2689_v0, 1  ;;  %v3280_v39 = vpop.f32.mrb[3].mxu1 }
 0x487   : > { %v2757_v13 = vsel %vm323_vm1, %v2755_v58, %v2756_v43 }
 0x488   : > { %v2796_v15 = vmax.f32 %v2686_v31, %v2757_v13 }
 0x48a   : > { %v2694_v62 = vpop.f32.mrb[4].mxu1 }
 0x48b   : > { %v2758_v46 = vrot.slane %v2694_v62, 1  ;;  %v3283_v33 = vpop.f32.mrb[5].mxu1 }
 0x48c   : > { %v2697_v54 = vpop.f32.mrb[6].mxu1 }
 0x48d   : > { %v2759_v53 = vsel %vm323_vm1, %v2756_v43, %v2758_v46  ;;  %v2760_v50 = vrot.slane %v2697_v54, 1  ;;  %v3284_v27 = vpop.f32.mrb[7].mxu1  ;;  %v4143_v43 = vld [vmem:[%s6129_s5 + $0x28] sm:$0xff]  }
 0x48e   : > { %v2797_v10 = vmax.f32 %v2689_v0, %v2759_v53  ;;  %v4142_v0 = vld [vmem:[%s6129_s5 + $0x20] sm:$0xff]  }
 0x48f   : > { %v2761_v38 = vsel %vm323_vm1, %v2758_v46, %v2760_v50  ;;  %3314 = vmatpush3.bf16.msra.mxu1 %v4142_v0 }
 0x490   : > { %v2798_v21 = vmax.f32 %v2694_v62, %v2761_v38  ;;  %v2820_v18 = vrot.slane %v2797_v10, 6  ;;  %3315 = vmatprep.subr.bf16.mxu1 %v4227_v1 }
 0x492   : > { %v2821_v49 = vrot.slane %v2798_v21, 6 }
 0x493   : > { %3316 = vmatpush3.bf16.msra.mxu1 %v4143_v43 }
 0x494   : > { %v2822_v2 = vsel %vm535_vm0, %v2820_v18, %v2821_v49  ;;  %3317 = vmatprep.subr.bf16.mxu1 %v4227_v1 }
 0x495   : > { %v2842_v25 = vmax.f32 %v2796_v15, %v2822_v2 }
 0x497   : > { %v2855_v28 = vadd.f32 %v5997_v14, %v2842_v25 }
 0x499   : > { %v2702_v12 = vpop.f32.mrb[8].mxu1  ;;  %v6004_v8 = vmax.f32 %v2855_v28, 0.0 }
 0x49a   : > { %v2762_v63 = vrot.slane %v2702_v12, 1  ;;  %v3287_v6 = vpop.f32.mrb[9].mxu1 }
 0x49b   : > { %v2705_v60 = vpop.f32.mrb[10].mxu1  ;;  %v2872_v3 = vrot.slane %v6004_v8, 4  ;;  %v2868_v17 = vrot.slane %v6004_v8, 2  ;;  %v2876_v5 = vrot.slane %v6004_v8, 6 }
 0x49c   : > { %v2763_v42 = vsel %vm323_vm1, %v2760_v50, %v2762_v63  ;;  %v2764_v35 = vrot.slane %v2705_v60, 1  ;;  %v3288_v7 = vpop.f32.mrb[11].mxu1 }
 0x49d   : > { %v2799_v37 = vmax.f32 %v2697_v54, %v2763_v42  ;;  %2873 = vrot.lane.b32.xlu1 %v2872_v3, %s4231_s8  ;;  %2869 = vrot.lane.b32.xlu0 %v2868_v17, %s4232_s9  ;;  %s4243_s8 = smov 56  }
 0x49e   : > { %v2765_v48 = vsel %vm323_vm1, %v2762_v63, %v2764_v35 }
 0x49f   : > { %v2800_v55 = vmax.f32 %v2702_v12, %v2765_v48 }
 0x4a1   : > { %2877 = vrot.lane.b32.xlu0 %v2876_v5, %s4233_s13  ;;  %v2823_v19 = vrot.slane %v2800_v55, 6 }
 0x4a9   : > { %v2710_v44 = vpop.f32.mrb[12].mxu1 }
 0x4aa   : > { %v2766_v4 = vrot.slane %v2710_v44, 1  ;;  %v3291_v56 = vpop.f32.mrb[13].mxu1 }
 0x4ab   : > { %v6014_v26 = vpop.f32.mrb[14].mxu1 }
 0x4ac   : > { %v2767_v41 = vsel %vm323_vm1, %v2764_v35, %v2766_v4  ;;  %v2768_v22 = vrot.slane %v6014_v26, 1  ;;  %v3292_v61 = vpop.f32.mrb[15].mxu1  ;;  %v4144_v35 = vld [vmem:[%s6129_s5 + $0x30] sm:$0xff]  }
 0x4ad   : > { %v2801_v32 = vmax.f32 %v2705_v60, %v2767_v41  ;;  %3318 = vmatpush3.bf16.msra.mxu1 %v4144_v35  ;;  %v4145_v61 = vld [vmem:[%s6129_s5 + $0x38] sm:$0xff]  }
 0x4ae   : > { %v2769_v11 = vsel %vm323_vm1, %v2766_v4, %v2768_v22  ;;  %3319 = vmatprep.subr.bf16.mxu1 %v4227_v1 }
 0x4af   : > { %v2824_v29 = vrot.slane %v2801_v32, 6  ;;  %v2802_v24 = vmax.f32 %v2710_v44, %v2769_v11 }
 0x4b1   : > { %v2825_v36 = vsel %vm535_vm0, %v2823_v19, %v2824_v29  ;;  %v2826_v30 = vrot.slane %v2802_v24, 6  ;;  %3320 = vmatpush3.bf16.msra.mxu1 %v4145_v61 }
 0x4b2   : > { %v2843_v9 = vmax.f32 %v2799_v37, %v2825_v36 }
 0x4b3   : > { %v2827_v52 = vsel %vm535_vm0, %v2824_v29, %v2826_v30 }
 0x4b4   : > { %v2856_v40 = vadd.f32 %v5997_v14, %v2843_v9  ;;  %v2844_v34 = vmax.f32 %v2800_v55, %v2827_v52 }
 0x4b6   : > { %v2862_v20 = vmax.f32 %v2856_v40, 0.0  ;;  %v2857_v47 = vadd.f32 %v5997_v14, %v2844_v34 }
 0x4b8   : > { %v2885_v51 = vrot.slane %v2862_v20, 6  ;;  %v2881_v31 = vrot.slane %v2862_v20, 4  ;;  %v2863_v45 = vmax.f32 %v2857_v47, 0.0 }
 0x4ba   : > { %2886 = vrot.lane.b32.xlu0 %v2885_v51, %s4239_s17  ;;  %2882 = vrot.lane.b32.xlu1 %v2881_v31, %s4235_s15  ;;  %v2893_v58 = vrot.slane %v2863_v45, 2 }
 0x4be   : > { %2890 = vrot.lane.b32.xlu1 %v2863_v45, %s4242_s18  ;;  %2894 = vrot.lane.b32.xlu0 %v2893_v58, %s4243_s8  ;;  %s3173_s8 = sshll.u32 %s4312_s28, 4 }
 0x4c1   : > { %v2718_v39 = vpop.f32.mrb[16].mxu1 }
 0x4c2   : > { %v2770_v13 = vrot.slane %v2718_v39, 1  ;;  %v3295_v15 = vpop.f32.mrb[17].mxu1 }
 0x4c3   : > { %v2721_v62 = vpop.f32.mrb[18].mxu1 }
 0x4c4   : > { %v2771_v46 = vsel %vm323_vm1, %v2768_v22, %v2770_v13  ;;  %v2772_v33 = vrot.slane %v2721_v62, 1  ;;  %v3296_v54 = vpop.f32.mrb[19].mxu1 }
 0x4c5   : > { %v2803_v53 = vmax.f32 %v6014_v26, %v2771_v46 }
 0x4c6   : > { %v2773_v50 = vsel %vm323_vm1, %v2770_v13, %v2772_v33 }
 0x4c7   : > { %v2804_v27 = vmax.f32 %v2718_v39, %v2773_v50 }
 0x4c9   : > { %v2726_v10 = vpop.f32.mrb[20].mxu1  ;;  %v2828_v12 = vrot.slane %v2804_v27, 6 }
 0x4ca   : > { %v2774_v38 = vrot.slane %v2726_v10, 1  ;;  %v3299_v21 = vpop.f32.mrb[21].mxu1 }
 0x4cb   : > { %v2729_v18 = vpop.f32.mrb[22].mxu1 }
 0x4cc   : > { %v2775_v49 = vsel %vm323_vm1, %v2772_v33, %v2774_v38  ;;  %v2776_v2 = vrot.slane %v2729_v18, 1  ;;  %v3300_v57 = vpop.f32.mrb[23].mxu1 }
 0x4cd   : > { %v2805_v25 = vmax.f32 %v2721_v62, %v2775_v49 }
 0x4ce   : > { %v2777_v28 = vsel %vm323_vm1, %v2774_v38, %v2776_v2 }
 0x4cf   : > { %v2829_v63 = vrot.slane %v2805_v25, 6  ;;  %v2806_v6 = vmax.f32 %v2726_v10, %v2777_v28 }
 0x4d1   : > { %v2734_v60 = vpop.f32.mrb[24].mxu1  ;;  %v2830_v42 = vsel %vm535_vm0, %v2828_v12, %v2829_v63 }
 0x4d2   : > { %v2778_v7 = vrot.slane %v2734_v60, 1  ;;  %v3303_v3 = vpop.f32.mrb[25].mxu1  ;;  %v2845_v17 = vmax.f32 %v2803_v53, %v2830_v42  ;;  %v2971_v42 = vld [vmem:[%s6130_s6] sm:$0x1] }
 0x4d3   : > { %v2737_v37 = vpop.f32.mrb[26].mxu1 }
 0x4d4   : > { %v2779_v48 = vsel %vm323_vm1, %v2776_v2, %v2778_v7  ;;  %v2780_v55 = vrot.slane %v2737_v37, 1  ;;  %v3304_v5 = vpop.f32.mrb[27].mxu1  ;;  %v2858_v44 = vadd.f32 %v5997_v14, %v2845_v17 }
 0x4d5   : > { %v2807_v4 = vmax.f32 %v2729_v18, %v2779_v48 }
 0x4d6   : > { %v2781_v56 = vsel %vm323_vm1, %v2778_v7, %v2780_v55  ;;  %v2809_v26 = vmax.f32 %v2737_v37, %v2780_v55  ;;  %v2864_v41 = vmax.f32 %v2858_v44, 0.0  ;;  %vm2937_vm1 = vcmask 457728  }
 0x4d7   : > { %v2808_v22 = vmax.f32 %v2734_v60, %v2781_v56  ;;  %v2831_v11 = vrot.slane %v2807_v4, 6 }
 0x4d8   : > { %v2834_v32 = vrot.slane %v2809_v26, 6  ;;  %2898 = vrot.lane.b32.xlu1 %v2864_v41, %s4244_s29  ;;  %v2901_v16 = vrot.slane %v2864_v41, 2  ;;  %v2905_v1 = vrot.slane %v2864_v41, 4  ;;  %v2909_v30 = vrot.slane %v2864_v41, 6  ;;  %s6082_s29 = scalar_lea.hbm %s6131_s7, %s3173_s8 }
 0x4d9   : > { %v2832_v19 = vrot.slane %v2808_v22, 6 }
 0x4da   : > { %2902 = vrot.lane.b32.xlu0 %v2901_v16, %s4245_s14 }
 0x4db   : > { %v2833_v29 = vsel %vm535_vm0, %v2831_v11, %v2832_v19  ;;  %v2835_v24 = vsel %vm535_vm0, %v2832_v19, %v2834_v32  ;;  %vm2935_vm0 = vcmask 392192  }
 0x4dc   : > { %v2847_v36 = vmax.f32 %v2807_v4, %v2835_v24  ;;  %2906 = vrot.lane.b32.xlu1 %v2905_v1, %s4241_s23  ;;  %v2846_v9 = vmax.f32 %v2806_v6, %v2833_v29  ;;  %s4249_s23 = smov 112  }
 0x4de   : > { %v2860_v23 = vadd.f32 %v5997_v14, %v2847_v36  ;;  %2910 = vrot.lane.b32.xlu0 %v2909_v30, %s4246_s20  ;;  %v2859_v52 = vadd.f32 %v5997_v14, %v2846_v9  ;;  %s4250_s20 = smov [#allocation2]  }
 0x4e0   : > { %v2865_v40 = vmax.f32 %v2859_v52, 0.0  ;;  %v2866_v20 = vmax.f32 %v2860_v23, 0.0 }
 0x4e2   : > { %v2918_v34 = vrot.slane %v2865_v40, 6  ;;  %v2914_v59 = vrot.slane %v2865_v40, 4  ;;  %v2926_v47 = vrot.slane %v2866_v20, 2 }
 0x4e4   : > { %2919 = vrot.lane.b32.xlu0 %v2918_v34, %s4247_s16  ;;  %2915 = vrot.lane.b32.xlu1 %v2914_v59, %s4248_s21  ;;  %s4167_s16 = sshll.u32 %s4250_s20, 4  ;;  %s4168_s16 = int_to_ptr.vmem [resolvable:$false] %s4167_s16 }
 0x4e5   : > { %s4169_s21 = scalar_lea.vmem %s4168_s16, 32 }
 0x4e8   : > { %2927 = vrot.lane.b32.xlu0 %v2926_v47, %s4238_s19  ;;  %2923 = vrot.lane.b32.xlu1 %v2866_v20, %s4249_s23  ;;  %s269_s19 = sand.u32 1, %s4217_s25  }
 0x4e9   : > { %s270_s15 = scalar_lea.vmem [#allocation2], %s269_s19  ;;  %s3063_s28 = scalar_lea.sflag [#allocation3], %s269_s19 }
 0x4ea   : > { %s3075_s17 = sshll.u32 %s270_s15, 4  ;;  %s6084_s17 = int_to_ptr.vmem [resolvable:$true] %s3075_s17 }
 0x4eb   : > { %s4163_s14 = scalar_lea.vmem %s6084_s17, 16  ;;  %p4170_p0 = scmp.lt.s32.totalorder %s6084_s17, %s4168_s16 }
 0x4ec   : > { %p4164_p11 = scmp.ne.s32.totalorder %s6084_s17, %s4163_s14  ;;  %p4171_p1 = scmp.lt.s32.totalorder %s4169_s21, %s4163_s14 }
 0x4ee   : > { %p4165_p12 = pnand %p4164_p11, %p4329_p5  ;;  %p4172_p2 = por %p4171_p1, %p4170_p0 }
 0x4f0   : > { %p4166_p13 = pneg %p4165_p12 }
 0x4f2   : > { %p4173_p3 = pnand %p4172_p2, %p4166_p13 }
 0x50f   : > { %v2870_v51 = vpop.permute.xlu0 %2869  ;;  %v2874_v31 = vpop.permute.xlu1 %2873 }
 0x510   : > { %v2930_v0 = vsel %vm1117_vm8, %v6004_v8, %v2870_v51  ;;  %vm2941_vm8 = vcmask 588800  }
 0x511   : > { %v2931_v43 = vsel %vm1161_vm10, %v2930_v0, %v2874_v31  ;;  %vm2946_vm10 = vcmask 785408  }
 0x513   : > { %v2878_v45 = vpop.permute.xlu0 %2877 }
 0x514   : > { %v2932_v39 = vsel %vm1205_vm12, %v2931_v43, %v2878_v45  ;;  %vm2950_vm12 = vcmask 916480  }
 0x52c   : > { %v2883_v14 = vpop.permute.xlu1 %2882  ;;  %v2887_v58 = vpop.permute.xlu0 %2886 }
 0x52d   : > { %v2933_v13 = vsel %vm1249_vm14, %v2932_v39, %v2883_v14  ;;  %vm3060_vm14 = vcmask 73728  }
 0x52e   : > { %v2934_v62 = vsel %vm2523_vm3, %v2933_v13, %v2887_v58 }
 0x530   : > { %v2891_v15 = vpop.permute.xlu1 %2890  ;;  %v2895_v46 = vpop.permute.xlu0 %2894 }
 0x531   : > { %v2936_v33 = vsel %vm2935_vm0, %v2934_v62, %v2891_v15 }
 0x532   : > { %v2938_v53 = vsel %vm2937_vm1, %v2936_v33, %v2895_v46 }
 0x54a   : > { %v2899_v54 = vpop.permute.xlu1 %2898 }
 0x54b   : > { %v2940_v8 = vsel %vm2939_vm6, %v2938_v53, %v2899_v54 }
 0x54c   : > { %v2903_v50 = vpop.permute.xlu0 %2902 }
 0x54d   : > { %v2942_v27 = vsel %vm2941_vm8, %v2940_v8, %v2903_v50 }
 0x54e   : > { %v2907_v10 = vpop.permute.xlu1 %2906 }
 0x54f   : > { %v2943_v21 = vsel %vm2553_vm5, %v2942_v27, %v2907_v10 }
 0x550   : > { %v2911_v38 = vpop.permute.xlu0 %2910 }
 0x551   : > { %v2945_v18 = vsel %vm2944_vm9, %v2943_v21, %v2911_v38 }
 0x556   : > { %v2920_v49 = vpop.permute.xlu0 %2919  ;;  %v2916_v2 = vpop.permute.xlu1 %2915 }
 0x557   : > { %v2947_v57 = vsel %vm2946_vm10, %v2945_v18, %v2916_v2 }
 0x558   : > { %v2949_v28 = vsel %vm2948_vm11, %v2947_v57, %v2920_v49 }
 0x55a   : > { %v2928_v25 = vpop.permute.xlu0 %2927  ;;  %v2924_v12 = vpop.permute.xlu1 %2923 }
 0x55b   : > { %v2951_v63 = vsel %vm2950_vm12, %v2949_v28, %v2924_v12 }
 0x55c   : > { %v2953_v6 = vsel %vm2952_vm13, %v2951_v63, %v2928_v25 }
 0x55d   : > { %v2954_v60 = vpack.c.bf16 %v2953_v6, %v2953_v6 }
 0x55f   : > { %3322 = vmatmul.mubr.bf16.vlgmr.msra.gmra.mrb[28].mxu1 %v2954_v60 }
 0x632   : > { %v3054_v35 = vpop.f32.mrb[28].mxu1 }
 0x633   : > { %v3055_v7 = vadd.f32 %v3054_v35, %v2971_v42  ;;  %v3323_v3 = vpop.f32.mrb[29].mxu1 }
 0x634   : > { %v3057_v17 = vpop.f32.mrb[30].mxu1 }
 0x635   : > { %v3324_v37 = vpop.f32.mrb[31].mxu1  ;;  %3061 = vst.msk [vmem:[%s270_s15] sm:$0x1] %vm3060_vm14, %v3055_v7 }
 0x636   : > { %4176 = shalt.err (!%p4173_p3)
}
 0x637   : > { %s4177_s23 = scalar_lea.hbm %s6082_s29, 16  ;;  %s4181_s18 = scalar_lea.hbm %s6131_s7, 32 }
 0x638   : > { %p4178_p4 = scmp.ne.s32.totalorder %s6082_s29, %s4177_s23  ;;  %p4182_p9 = scmp.lt.u32.totalorder %s6082_s29, %s6131_s7 }
 0x639   : > { %p4183_p10 = scmp.lt.u32.totalorder %s4181_s18, %s4177_s23  ;;  %p4185_p12 = scmp.lt.u32.totalorder %s4177_s23, %s6082_s29 }
 0x63a   : > { %p4179_p7 = pnand %p4178_p4, %p4329_p5 }
 0x63b   : > { %p4184_p11 = por %p4183_p10, %p4182_p9 }
 0x63c   : > { %p4180_p8 = pneg %p4179_p7 }
 0x63d   : > { %p4186_p13 = por %p4185_p12, %p4184_p11 }
 0x63f   : > { %p4187_p0 = pnand %p4186_p13, %p4180_p8 }
 0x641   : > { %4190 = shalt.err (!%p4187_p0)
}
 0x642   : > { %3326 = dma.vmem_to_hbm [thread:$0]  (%p4329_p5), %s6084_s17, 16, %s6082_s29, %s3063_s28  }
 0x643 PF: > { %p3332_p1 = scmp.ge.s32.totalorder %s4225_s27, 2  ;;  %s3087_s9 = sand.u32 1, %s4213_s24  }
 0x644   : > { %s3088_s13 = scalar_lea.sflag [#allocation3], %s3087_s9 }
 0x645   : > { %p3329_p2 = pnand %p3332_p1, %p4333_p6 }
 0x647   : > { %4208 = dma.done.wait (!%p3329_p2), %s3088_s13, 16  }
 0x648   : > { %4210 = vsyncadd (!%p3329_p2), %s3088_s13, 4294967280  ;;  %p17_p3 = scmp.ge.s32.totalorder %s4316_s30, 4   ;;  %s6134_s24 = smov %s4217_s25 }
 0x649   : > { %s6135_s25 = smov %s4221_s26  ;;  %s6136_s26 = smov %s4327_s10 }
 0x64a   : > { %s6137_s27 = smov %s4316_s30  ;;  %19 = sbr.rel (!%p17_p3) target bundleno = 3 (0x3), region = 83 }
 0x651   :  { %3092 = vsyncpa [#allocation3], 1 }
 0x652   :  { %3094 = vsyncpa [#allocation3 + $0x1], 1 }

</bundles_post_ra>
